<compile_context>
chip_gen: v7x
topology: tpu7x:2x2x1
jax: 0.10.0
libtpu: 0.0.40
codegen_flags: <defaults>
</compile_context>

<pallas_src>
import functools

import jax
import jax.numpy as jnp
from jax.experimental import pallas as pl
from jax.experimental.pallas import tpu as pltpu


_INV_SQRT2 = 0.7071067811865476


# ----------------------------- helpers ------------------------------------ #

def _gelu(x, approximate=False):
    if approximate:
        # tanh-approx GELU: transcendental goes to the EUP slot (v6e/v7x opt-in).
        return jax.nn.gelu(x, approximate=True)
    # exact (erf) GELU, matching torch.nn.GELU default
    return 0.5 * x * (1.0 + jax.lax.erf(x * _INV_SQRT2))


def _layernorm(x, gamma, beta, eps=1e-5):
    mu = jnp.mean(x, axis=-1, keepdims=True)
    var = jnp.mean(jnp.square(x - mu), axis=-1, keepdims=True)
    return (x - mu) * jax.lax.rsqrt(var + eps) * gamma + beta


def _nbytes(shape, dtype):
    n = 1
    for s in shape:
        n *= int(s)
    return n * jnp.dtype(dtype).itemsize


def _pick_tile(n, cap=512):
    """Largest tile <= cap dividing n; prefer multiples of 128, then of 8."""
    for base in (128, 8):
        t = cap
        while t >= base:
            if t <= n and n % t == 0:
                return t
            t //= 2
    return n


def _vmem_cap_bytes():
    """Generation-aware usable VMEM cap (leave headroom for compiler scratch)."""
    try:
        cap = int(pltpu.get_tpu_info().vmem_capacity_bytes)
    except Exception:
        cap = 128 << 20
    return max(int(cap * 0.85), 24 << 20)


# ------------------------------ kernel ------------------------------------- #

def _lamo_kernel(tok_ref, wt_ref, bt_ref, woutr_ref,
                 sw_ref, bout_ref, fx_ref,
                 g2_ref, be2_ref, w1_ref, bb1_ref, w2_ref, bb2_ref,
                 *rest, last_layer, token_major_head, approx_gelu):
    if last_layer:
        g3_ref, be3_ref, w3_ref, b3_ref, o_ref, outp_ref, mmix_ref = rest
    else:
        o_ref, outp_ref, mmix_ref = rest

    # ---- per-batch prep: latent-token update + fused mixing matrix -------- #
    @pl.when(pl.program_id(1) == 0)
    def _prep():
        tok = tok_ref[0].astype(jnp.float32)                       # (Hh, G, D)
        y = jax.lax.dot_general(tok, wt_ref[...],
                                (((2,), (0,)), ((), ())),
                                preferred_element_type=jnp.float32)
        outp = _gelu(y + bt_ref[...])                              # (Hh, G, D)
        outp_ref[0] = outp.astype(outp_ref.dtype)
        # mmix[h*G:(h+1)*G, :] = outp[h] @ w_out[h]   (one batched matmul)
        mm = jax.lax.dot_general(outp, woutr_ref[...],
                                 (((2,), (1,)), ((0,), (0,))),
                                 preferred_element_type=jnp.float32)
        mmix_ref[...] = mm.reshape(mmix_ref.shape).astype(mmix_ref.dtype)

    # ---- per-token-tile fused path ----------------------------------------#
    sw = sw_ref[0]                                                 # (tn, HG) bf16
    fx = fx_ref[0].astype(jnp.float32)                             # (tn, C)

    # attention (deslice + output projection) + residual, one matmul
    mixed = jnp.dot(sw, mmix_ref[...], preferred_element_type=jnp.float32)
    fx1 = mixed + bout_ref[...] + fx

    # fx = mlp(ln_2(fx)) + fx
    y2 = _layernorm(fx1, g2_ref[...], be2_ref[...])
    h = _gelu(jnp.dot(y2.astype(jnp.bfloat16), w1_ref[...],
                      preferred_element_type=jnp.float32) + bb1_ref[...],
              approximate=approx_gelu)
    fx2 = (jnp.dot(h.astype(jnp.bfloat16), w2_ref[...],
                   preferred_element_type=jnp.float32) + bb2_ref[...] + fx1)

    if last_layer:
        y3 = _layernorm(fx2, g3_ref[...], be3_ref[...])
        if token_major_head:
            # out_t[o, n] = sum_c w3t[o, c] * y3[n, c]  -> (out_dim, tn)
            out_t = jax.lax.dot_general(w3_ref[...], y3.astype(jnp.bfloat16),
                                        (((1,), (1,)), ((), ())),
                                        preferred_element_type=jnp.float32)
            o_ref[0] = (out_t + b3_ref[...]).astype(o_ref.dtype)
        else:
            out = (jnp.dot(y3.astype(jnp.bfloat16), w3_ref[...],
                           preferred_element_type=jnp.float32) + b3_ref[...])
            o_ref[0] = out.astype(o_ref.dtype)
    else:
        o_ref[0] = fx2.astype(o_ref.dtype)


# ----------------------------- wrappers ------------------------------------ #

def _fused_forward(params, fx, slice_token, sw_flat, w_out_r, *,
                   last_layer, approx_gelu, single_buffer):
    B, N, C = fx.shape
    _, Hh, G, D = slice_token.shape
    HG = Hh * G
    Ch = params["w1"].shape[1]
    tn = _pick_tile(N)
    nt = N // tn

    w1 = params["w1"].astype(jnp.bfloat16)
    w2 = params["w2"].astype(jnp.bfloat16)

    args, in_specs = [], []
    need = 0

    def add(arr, block_shape, index_map, once=False):
        nonlocal need
        args.append(arr)
        if once and single_buffer:
            # grid-invariant operand: no double buffering (halves its VMEM)
            spec = pl.BlockSpec(block_shape, index_map,
                                pipeline_mode=pl.Buffered(1))
            bufs = 1
        else:
            spec = pl.BlockSpec(block_shape, index_map)
            bufs = 2
        in_specs.append(spec)
        need += bufs * _nbytes(block_shape, arr.dtype)

    add(slice_token,     (1, Hh, G, D), lambda b, i: (b, 0, 0, 0))
    add(params["wt"],    (D, D),        lambda b, i: (0, 0), once=True)
    add(params["bt"],    (1, D),        lambda b, i: (0, 0), once=True)
    add(w_out_r,         (Hh, D, C),    lambda b, i: (0, 0, 0), once=True)
    add(sw_flat,         (1, tn, HG),   lambda b, i: (b, i, 0))
    add(params["b_out"], (1, C),        lambda b, i: (0, 0), once=True)
    add(fx,              (1, tn, C),    lambda b, i: (b, i, 0))
    add(params["ln2_g"], (1, C),        lambda b, i: (0, 0), once=True)
    add(params["ln2_b"], (1, C),        lambda b, i: (0, 0), once=True)
    add(w1,              (C, Ch),       lambda b, i: (0, 0), once=True)
    add(params["b1"],    (1, Ch),       lambda b, i: (0, 0), once=True)
    add(w2,              (Ch, C),       lambda b, i: (0, 0), once=True)
    add(params["b2"],    (1, C),        lambda b, i: (0, 0), once=True)

    out_dim = params["w3"].shape[1] if last_layer else C
    token_major_head = last_layer and out_dim < 128
    o_pad = out_dim

    if last_layer:
        add(params["ln3_g"], (1, C), lambda b, i: (0, 0), once=True)
        add(params["ln3_b"], (1, C), lambda b, i: (0, 0), once=True)
        if token_major_head:
            # tiny head: emit (B, out_dim, N) with tokens on lanes (lane-dense
            # stores), no 128x padding / writeback amplification.
            w3t = params["w3"].T.astype(jnp.bfloat16)              # (O, C)
            b3t = params["b3"].reshape(out_dim, 1).astype(jnp.float32)
            add(w3t, (out_dim, C), lambda b, i: (0, 0), once=True)
            add(b3t, (out_dim, 1), lambda b, i: (0, 0), once=True)
            out_shape = jax.ShapeDtypeStruct((B, out_dim, N), fx.dtype)
            out_spec = pl.BlockSpec((1, out_dim, tn), lambda b, i: (b, 0, i))
            out_block = (1, out_dim, tn)
        else:
            o_pad = -(-out_dim // 128) * 128
            w3p = jnp.zeros((C, o_pad), jnp.bfloat16).at[:, :out_dim].set(
                params["w3"].astype(jnp.bfloat16))
            b3p = jnp.zeros((1, o_pad), jnp.float32).at[:, :out_dim].set(
                params["b3"])
            add(w3p, (C, o_pad), lambda b, i: (0, 0), once=True)
            add(b3p, (1, o_pad), lambda b, i: (0, 0), once=True)
            out_shape = jax.ShapeDtypeStruct((B, N, o_pad), fx.dtype)
            out_spec = pl.BlockSpec((1, tn, o_pad), lambda b, i: (b, i, 0))
            out_block = (1, tn, o_pad)
    else:
        out_shape = jax.ShapeDtypeStruct((B, N, C), fx.dtype)
        out_spec = pl.BlockSpec((1, tn, C), lambda b, i: (b, i, 0))
        out_block = (1, tn, C)

    outp_shape = jax.ShapeDtypeStruct((B, Hh, G, D), slice_token.dtype)
    outp_spec = pl.BlockSpec((1, Hh, G, D), lambda b, i: (b, 0, 0, 0))

    # VMEM budget: block buffers (counted in `need`) + output buffers +
    # in-kernel f32 intermediates / bf16 cast copies + mmix scratch, floored at
    # 32 MiB and capped by the generation's physical VMEM.
    need += 2 * _nbytes(out_block, fx.dtype)
    need += 2 * _nbytes((1, Hh, G, D), slice_token.dtype)
    need += (4 * tn * C + tn * Ch) * 4            # mixed/fx1/y2/fx2 + h (f32)
    need += (tn * C + tn * Ch) * 2                # bf16 matmul operand copies
    need += HG * C * 2                            # mmix scratch (bf16)
    need += (Hh * G * D + Hh * G * C) * 8         # prep f32 temporaries
    vmem_limit = int(min(max(need + (4 << 20), 32 << 20), _vmem_cap_bytes()))

    kernel = functools.partial(_lamo_kernel, last_layer=last_layer,
                               token_major_head=token_major_head,
                               approx_gelu=approx_gelu)

    out, outp = pl.pallas_call(
        kernel,
        out_shape=(out_shape, outp_shape),
        grid_spec=pltpu.PrefetchScalarGridSpec(
            num_scalar_prefetch=0,
            grid=(B, nt),
            in_specs=in_specs,
            out_specs=(out_spec, outp_spec),
            scratch_shapes=[pltpu.VMEM((HG, C), jnp.bfloat16)]),
        compiler_params=pltpu.CompilerParams(
            dimension_semantics=("parallel", "arbitrary"),
            vmem_limit_bytes=vmem_limit),
    )(*args)

    if last_layer:
        if token_major_head:
            out = jnp.transpose(out, (0, 2, 1))     # (B, N, out_dim); reshape if out_dim==1
        elif o_pad != out_dim:
            out = out[:, :, :out_dim]
    return out, outp


def lamo_block_forward(params, fx, slice_token, slice_weights, *, last_layer,
                       approx_gelu=False):
    """LaMO_block.forward(fx, slice_token, slice_weights) -> (out, inp, outp)."""
    B, N, C = fx.shape
    _, Hh, G, D = slice_token.shape

    # lane-dense (B, N, Hh*G) slice weights feeding one (tn,HG)@(HG,C) matmul
    sw_flat = (jnp.transpose(slice_weights, (0, 2, 1, 3))
               .reshape(B, N, Hh * G).astype(jnp.bfloat16))
    # per-head view of the output projection for the batched prep matmul
    w_out_r = params["w_out"].reshape(Hh, D, C).astype(jnp.float32)

    try:
        out, outp = _fused_forward(params, fx, slice_token, sw_flat, w_out_r,
                                   last_layer=last_layer,
                                   approx_gelu=approx_gelu, single_buffer=True)
    except Exception:
        # Fallback for JAX versions without BlockSpec(pipeline_mode=Buffered(1)).
        out, outp = _fused_forward(params, fx, slice_token, sw_flat, w_out_r,
                                   last_layer=last_layer,
                                   approx_gelu=approx_gelu, single_buffer=False)
    return out, slice_token, outp


# --------------------------- pure-JAX reference ----------------------------- #

def _ref_forward(params, fx, slice_token, slice_weights, *, last_layer):
    outp = _gelu(jnp.einsum("bhgd,de->bhge", slice_token, params["wt"])
                 + params["bt"][0])
    out_x = jnp.einsum("bhng,bhgd->bhnd", slice_weights, outp)
    B, Hh, N, D = out_x.shape
    out_x = out_x.transpose(0, 2, 1, 3).reshape(B, N, Hh * D)
    fx1 = out_x @ params["w_out"] + params["b_out"][0] + fx
    y = _layernorm(fx1, params["ln2_g"][0], params["ln2_b"][0])
    h = _gelu(y @ params["w1"] + params["b1"][0])
    fx2 = h @ params["w2"] + params["b2"][0] + fx1
    if last_layer:
        y3 = _layernorm(fx2, params["ln3_g"][0], params["ln3_b"][0])
        return y3 @ params["w3"] + params["b3"][0], slice_token, outp
    return fx2, slice_token, outp


# --------------------------------- main ------------------------------------ #

def _init_params(key, hidden_dim, num_heads, mlp_ratio, out_dim):
    dim_head = hidden_dim // num_heads
    inner = num_heads * dim_head
    hid = hidden_dim * mlp_ratio
    ks = jax.random.split(key, 8)
    s = 0.1
    return {
        "wt": s * jax.random.normal(ks[0], (dim_head, dim_head), jnp.float32),
        "bt": s * jax.random.normal(ks[1], (1, dim_head), jnp.float32),
        "w_out": s * jax.random.normal(ks[2], (inner, hidden_dim), jnp.float32),
        "b_out": s * jax.random.normal(ks[3], (1, hidden_dim), jnp.float32),
        "ln2_g": jnp.ones((1, hidden_dim), jnp.float32),
        "ln2_b": jnp.zeros((1, hidden_dim), jnp.float32),
        "w1": s * jax.random.normal(ks[4], (hidden_dim, hid), jnp.float32),
        "b1": jnp.zeros((1, hid), jnp.float32),
        "w2": s * jax.random.normal(ks[5], (hid, hidden_dim), jnp.float32),
        "b2": jnp.zeros((1, hidden_dim), jnp.float32),
        "ln3_g": jnp.ones((1, hidden_dim), jnp.float32),
        "ln3_b": jnp.zeros((1, hidden_dim), jnp.float32),
        "w3": s * jax.random.normal(ks[6], (hidden_dim, out_dim), jnp.float32),
        "b3": jnp.zeros((1, out_dim), jnp.float32),
    }


if __name__ == "__main__":
    # small config: hidden=32, heads=4 (dim_head=8), slice_num=8, H=W=8, out_dim=1
    B, num_heads, hidden_dim = 2, 4, 32
    slice_num, H, W, mlp_ratio, out_dim = 8, 8, 8, 4, 1
    dim_head = hidden_dim // num_heads
    N = H * W

    key = jax.random.PRNGKey(0)
    k_fx, k_tok, k_w, k_p = jax.random.split(key, 4)

    fx = jax.random.normal(k_fx, (B, N, hidden_dim), jnp.float32)
    slice_token = jax.random.normal(k_tok, (B, num_heads, slice_num, dim_head),
                                    jnp.float32)
    slice_weights = jax.nn.softmax(
        jax.random.normal(k_w, (B, num_heads, N, slice_num), jnp.float32),
        axis=-1)
    params = _init_params(k_p, hidden_dim, num_heads, mlp_ratio, out_dim)

    for last_layer in (True, False):
        out, inp, outp = lamo_block_forward(params, fx, slice_token,
                                            slice_weights,
                                            last_layer=last_layer)
        jax.block_until_ready((out, inp, outp))

        ref_out, ref_inp, ref_outp = _ref_forward(params, fx, slice_token,
                                                  slice_weights,
                                                  last_layer=last_layer)
        assert out.shape == ref_out.shape
        # outp path is pure f32 -> tight; fused path uses bf16 MXU operands with
        # f32 accumulation -> compare to the f32 reference with a bf16 budget.
        assert jnp.allclose(outp, ref_outp, rtol=1e-3, atol=1e-3)
        assert jnp.allclose(inp, ref_inp)
        assert jnp.allclose(out, ref_out, rtol=2e-2, atol=2e-2)

    print("KERNEL_OK")
</pallas_src>

<mosaic_0001>
module attributes {stable_mosaic.version = 11 : i64} {
  func.func @_lamo_kernel(%arg0: i32, %arg1: i32, %arg2: memref<1x4x8x8xf32, #tpu.memory_space<vmem>>, %arg3: memref<8x8xf32, #tpu.memory_space<vmem>>, %arg4: memref<1x8xf32, #tpu.memory_space<vmem>>, %arg5: memref<4x8x32xf32, #tpu.memory_space<vmem>>, %arg6: memref<1x64x32xbf16, #tpu.memory_space<vmem>>, %arg7: memref<1x32xf32, #tpu.memory_space<vmem>>, %arg8: memref<1x64x32xf32, #tpu.memory_space<vmem>>, %arg9: memref<1x32xf32, #tpu.memory_space<vmem>>, %arg10: memref<1x32xf32, #tpu.memory_space<vmem>>, %arg11: memref<32x128xbf16, #tpu.memory_space<vmem>>, %arg12: memref<1x128xf32, #tpu.memory_space<vmem>>, %arg13: memref<128x32xbf16, #tpu.memory_space<vmem>>, %arg14: memref<1x32xf32, #tpu.memory_space<vmem>>, %arg15: memref<1x32xf32, #tpu.memory_space<vmem>>, %arg16: memref<1x32xf32, #tpu.memory_space<vmem>>, %arg17: memref<1x32xbf16, #tpu.memory_space<vmem>>, %arg18: memref<1x1xf32, #tpu.memory_space<vmem>>, %arg19: memref<1x1x64xf32, #tpu.memory_space<vmem>>, %arg20: memref<1x4x8x8xf32, #tpu.memory_space<vmem>>, %arg21: memref<32x32xbf16, #tpu.memory_space<vmem>>) attributes {dimension_semantics = [#tpu.dimension_semantics<parallel>, #tpu.dimension_semantics<arbitrary>], iteration_bounds = array<i64: 2, 1>, scalar_prefetch = 0 : i64, scratch_operands = 1 : i64, tpu.core_type = #tpu.core_type<tc>, window_params = [{transform_indices = @transform_0, window_bounds = array<i64: 1, 4, 8, 8>}, {pipeline_mode = #tpu.pipeline_mode<synchronous>, transform_indices = @transform_1, window_bounds = array<i64: 8, 8>}, {pipeline_mode = #tpu.pipeline_mode<synchronous>, transform_indices = @transform_2, window_bounds = array<i64: 1, 8>}, {pipeline_mode = #tpu.pipeline_mode<synchronous>, transform_indices = @transform_3, window_bounds = array<i64: 4, 8, 32>}, {transform_indices = @transform_4, window_bounds = array<i64: 1, 64, 32>}, {pipeline_mode = #tpu.pipeline_mode<synchronous>, transform_indices = @transform_5, window_bounds = array<i64: 1, 32>}, {transform_indices = @transform_6, window_bounds = array<i64: 1, 64, 32>}, {pipeline_mode = #tpu.pipeline_mode<synchronous>, transform_indices = @transform_7, window_bounds = array<i64: 1, 32>}, {pipeline_mode = #tpu.pipeline_mode<synchronous>, transform_indices = @transform_8, window_bounds = array<i64: 1, 32>}, {pipeline_mode = #tpu.pipeline_mode<synchronous>, transform_indices = @transform_9, window_bounds = array<i64: 32, 128>}, {pipeline_mode = #tpu.pipeline_mode<synchronous>, transform_indices = @transform_10, window_bounds = array<i64: 1, 128>}, {pipeline_mode = #tpu.pipeline_mode<synchronous>, transform_indices = @transform_11, window_bounds = array<i64: 128, 32>}, {pipeline_mode = #tpu.pipeline_mode<synchronous>, transform_indices = @transform_12, window_bounds = array<i64: 1, 32>}, {pipeline_mode = #tpu.pipeline_mode<synchronous>, transform_indices = @transform_13, window_bounds = array<i64: 1, 32>}, {pipeline_mode = #tpu.pipeline_mode<synchronous>, transform_indices = @transform_14, window_bounds = array<i64: 1, 32>}, {pipeline_mode = #tpu.pipeline_mode<synchronous>, transform_indices = @transform_15, window_bounds = array<i64: 1, 32>}, {pipeline_mode = #tpu.pipeline_mode<synchronous>, transform_indices = @transform_16, window_bounds = array<i64: 1, 1>}, {transform_indices = @transform_17, window_bounds = array<i64: 1, 1, 64>}, {transform_indices = @transform_18, window_bounds = array<i64: 1, 4, 8, 8>}]} {
    %c0_i32 = arith.constant 0 : i32
    %0 = arith.cmpi eq, %arg1, %c0_i32 : i32
    %1 = arith.extui %0 : i1 to i32
    %c0_i32_0 = arith.constant 0 : i32
    %2 = arith.cmpi ne, %1, %c0_i32_0 : i32
    scf.if %2 {
      %c0_49 = arith.constant 0 : index
      %c0_50 = arith.constant 0 : index
      %c0_51 = arith.constant 0 : index
      %c0_52 = arith.constant 0 : index
      %91 = vector.load %arg2[%c0_49, %c0_50, %c0_51, %c0_52] : memref<1x4x8x8xf32, #tpu.memory_space<vmem>>, vector<1x4x8x8xf32>
      %92 = vector.shape_cast %91 : vector<1x4x8x8xf32> to vector<4x8x8xf32>
      %c0_53 = arith.constant 0 : index
      %c0_54 = arith.constant 0 : index
      %93 = vector.load %arg3[%c0_53, %c0_54] : memref<8x8xf32, #tpu.memory_space<vmem>>, vector<8x8xf32>
      %cst_55 = arith.constant dense<0.000000e+00> : vector<4x8x8xf32>
      %94 = tpu.matmul %92, %93, %cst_55 {dimension_numbers = #tpu.dot_dimension_numbers<[2], [0], [0, 1], [1], [0, 0, 0, 1, 1, 1], [], []>} : vector<4x8x8xf32>, vector<8x8xf32>, vector<4x8x8xf32> -> vector<4x8x8xf32>
      %c0_56 = arith.constant 0 : index
      %c0_57 = arith.constant 0 : index
      %95 = vector.load %arg4[%c0_56, %c0_57] : memref<1x8xf32, #tpu.memory_space<vmem>>, vector<1x8xf32>
      %96 = vector.shape_cast %95 : vector<1x8xf32> to vector<1x1x8xf32>
      %97 = vector.broadcast %96 : vector<1x1x8xf32> to vector<4x8x8xf32>
      %98 = arith.addf %94, %97 : vector<4x8x8xf32>
      %cst_58 = arith.constant 5.000000e-01 : f32
      %99 = vector.broadcast %cst_58 : f32 to vector<4x8x8xf32>
      %100 = arith.mulf %99, %98 : vector<4x8x8xf32>
      %cst_59 = arith.constant 0.707106769 : f32
      %101 = vector.broadcast %cst_59 : f32 to vector<4x8x8xf32>
      %102 = arith.mulf %98, %101 : vector<4x8x8xf32>
      %103 = math.erf %102 : vector<4x8x8xf32>
      %cst_60 = arith.constant 1.000000e+00 : f32
      %104 = vector.broadcast %cst_60 : f32 to vector<4x8x8xf32>
      %105 = arith.addf %104, %103 : vector<4x8x8xf32>
      %106 = arith.mulf %100, %105 : vector<4x8x8xf32>
      %c0_61 = arith.constant 0 : index
      %c0_62 = arith.constant 0 : index
      %c0_63 = arith.constant 0 : index
      %c0_64 = arith.constant 0 : index
      %107 = vector.load %arg20[%c0_61, %c0_62, %c0_63, %c0_64] : memref<1x4x8x8xf32, #tpu.memory_space<vmem>>, vector<1x4x8x8xf32>
      %108 = vector.shape_cast %107 : vector<1x4x8x8xf32> to vector<4x8x8xf32>
      %109 = vector.shape_cast %106 : vector<4x8x8xf32> to vector<1x4x8x8xf32>
      tpu.vector_store %arg20[%c0_61, %c0_62, %c0_63, %c0_64], %109 {strides = array<i32>} : memref<1x4x8x8xf32, #tpu.memory_space<vmem>>, vector<1x4x8x8xf32>,
      %c0_65 = arith.constant 0 : index
      %c0_66 = arith.constant 0 : index
      %c0_67 = arith.constant 0 : index
      %110 = vector.load %arg5[%c0_65, %c0_66, %c0_67] : memref<4x8x32xf32, #tpu.memory_space<vmem>>, vector<4x8x32xf32>
      %cst_68 = arith.constant dense<0.000000e+00> : vector<4x8x32xf32>
      %111 = tpu.matmul %106, %110, %cst_68 {dimension_numbers = #tpu.dot_dimension_numbers<[2], [1], [1], [2], [0, 0, 0, 1, 1, 2], [0], [0]>} : vector<4x8x8xf32>, vector<4x8x32xf32>, vector<4x8x32xf32> -> vector<4x8x32xf32>
      %112 = vector.shape_cast %111 : vector<4x8x32xf32> to vector<32x32xf32>
      %113 = arith.truncf %112 : vector<32x32xf32> to vector<32x32xbf16>
      %c0_69 = arith.constant 0 : index
      %c0_70 = arith.constant 0 : index
      %114 = vector.load %arg21[%c0_69, %c0_70] : memref<32x32xbf16, #tpu.memory_space<vmem>>, vector<32x32xbf16>
      tpu.vector_store %arg21[%c0_69, %c0_70], %113 {strides = array<i32>} : memref<32x32xbf16, #tpu.memory_space<vmem>>, vector<32x32xbf16>,
    } else {
    }
    %c0 = arith.constant 0 : index
    %c0_1 = arith.constant 0 : index
    %c0_2 = arith.constant 0 : index
    %3 = vector.load %arg6[%c0, %c0_1, %c0_2] : memref<1x64x32xbf16, #tpu.memory_space<vmem>>, vector<1x64x32xbf16>
    %4 = vector.shape_cast %3 : vector<1x64x32xbf16> to vector<64x32xbf16>
    %c0_3 = arith.constant 0 : index
    %c0_4 = arith.constant 0 : index
    %c0_5 = arith.constant 0 : index
    %5 = vector.load %arg8[%c0_3, %c0_4, %c0_5] : memref<1x64x32xf32, #tpu.memory_space<vmem>>, vector<1x64x32xf32>
    %6 = vector.shape_cast %5 : vector<1x64x32xf32> to vector<64x32xf32>
    %c0_6 = arith.constant 0 : index
    %c0_7 = arith.constant 0 : index
    %7 = vector.load %arg21[%c0_6, %c0_7] : memref<32x32xbf16, #tpu.memory_space<vmem>>, vector<32x32xbf16>
    %cst = arith.constant dense<0.000000e+00> : vector<64x32xf32>
    %8 = tpu.matmul %4, %7, %cst {dimension_numbers = #tpu.dot_dimension_numbers<[1], [0], [0], [1], [0, 0, 1, 1], [], []>} : vector<64x32xbf16>, vector<32x32xbf16>, vector<64x32xf32> -> vector<64x32xf32>
    %c0_8 = arith.constant 0 : index
    %c0_9 = arith.constant 0 : index
    %9 = vector.load %arg7[%c0_8, %c0_9] : memref<1x32xf32, #tpu.memory_space<vmem>>, vector<1x32xf32>
    %10 = vector.broadcast %9 : vector<1x32xf32> to vector<64x32xf32>
    %11 = arith.addf %8, %10 : vector<64x32xf32>
    %12 = arith.addf %11, %6 : vector<64x32xf32>
    %c0_10 = arith.constant 0 : index
    %c0_11 = arith.constant 0 : index
    %13 = vector.load %arg9[%c0_10, %c0_11] : memref<1x32xf32, #tpu.memory_space<vmem>>, vector<1x32xf32>
    %c0_12 = arith.constant 0 : index
    %c0_13 = arith.constant 0 : index
    %14 = vector.load %arg10[%c0_12, %c0_13] : memref<1x32xf32, #tpu.memory_space<vmem>>, vector<1x32xf32>
    %cst_14 = arith.constant dense<0.000000e+00> : vector<64xf32>
    %15 = vector.multi_reduction <add>, %12, %cst_14 [1] : vector<64x32xf32> to vector<64xf32>
    %16 = vector.shape_cast %15 : vector<64xf32> to vector<64x1xf32>
    %cst_15 = arith.constant 3.200000e+01 : f32
    %17 = vector.broadcast %cst_15 : f32 to vector<64x1xf32>
    %18 = arith.divf %16, %17 : vector<64x1xf32>
    %19 = vector.broadcast %18 : vector<64x1xf32> to vector<64x32xf32>
    %20 = arith.subf %12, %19 : vector<64x32xf32>
    %21 = arith.mulf %20, %20 : vector<64x32xf32>
    %cst_16 = arith.constant dense<0.000000e+00> : vector<64xf32>
    %22 = vector.multi_reduction <add>, %21, %cst_16 [1] : vector<64x32xf32> to vector<64xf32>
    %23 = vector.shape_cast %22 : vector<64xf32> to vector<64x1xf32>
    %cst_17 = arith.constant 3.200000e+01 : f32
    %24 = vector.broadcast %cst_17 : f32 to vector<64x1xf32>
    %25 = arith.divf %23, %24 : vector<64x1xf32>
    %26 = vector.broadcast %18 : vector<64x1xf32> to vector<64x32xf32>
    %27 = arith.subf %12, %26 : vector<64x32xf32>
    %cst_18 = arith.constant 9.99999974E-6 : f32
    %28 = vector.broadcast %cst_18 : f32 to vector<64x1xf32>
    %29 = arith.addf %25, %28 : vector<64x1xf32>
    %30 = math.rsqrt %29 : vector<64x1xf32>
    %31 = vector.broadcast %30 : vector<64x1xf32> to vector<64x32xf32>
    %32 = arith.mulf %27, %31 : vector<64x32xf32>
    %33 = vector.broadcast %13 : vector<1x32xf32> to vector<64x32xf32>
    %34 = arith.mulf %32, %33 : vector<64x32xf32>
    %35 = vector.broadcast %14 : vector<1x32xf32> to vector<64x32xf32>
    %36 = arith.addf %34, %35 : vector<64x32xf32>
    %37 = arith.truncf %36 : vector<64x32xf32> to vector<64x32xbf16>
    %c0_19 = arith.constant 0 : index
    %c0_20 = arith.constant 0 : index
    %38 = vector.load %arg11[%c0_19, %c0_20] : memref<32x128xbf16, #tpu.memory_space<vmem>>, vector<32x128xbf16>
    %cst_21 = arith.constant dense<0.000000e+00> : vector<64x128xf32>
    %39 = tpu.matmul %37, %38, %cst_21 {dimension_numbers = #tpu.dot_dimension_numbers<[1], [0], [0], [1], [0, 0, 1, 1], [], []>} : vector<64x32xbf16>, vector<32x128xbf16>, vector<64x128xf32> -> vector<64x128xf32>
    %c0_22 = arith.constant 0 : index
    %c0_23 = arith.constant 0 : index
    %40 = vector.load %arg12[%c0_22, %c0_23] : memref<1x128xf32, #tpu.memory_space<vmem>>, vector<1x128xf32>
    %41 = vector.broadcast %40 : vector<1x128xf32> to vector<64x128xf32>
    %42 = arith.addf %39, %41 : vector<64x128xf32>
    %cst_24 = arith.constant 5.000000e-01 : f32
    %43 = vector.broadcast %cst_24 : f32 to vector<64x128xf32>
    %44 = arith.mulf %43, %42 : vector<64x128xf32>
    %cst_25 = arith.constant 0.707106769 : f32
    %45 = vector.broadcast %cst_25 : f32 to vector<64x128xf32>
    %46 = arith.mulf %42, %45 : vector<64x128xf32>
    %47 = math.erf %46 : vector<64x128xf32>
    %cst_26 = arith.constant 1.000000e+00 : f32
    %48 = vector.broadcast %cst_26 : f32 to vector<64x128xf32>
    %49 = arith.addf %48, %47 : vector<64x128xf32>
    %50 = arith.mulf %44, %49 : vector<64x128xf32>
    %51 = arith.truncf %50 : vector<64x128xf32> to vector<64x128xbf16>
    %c0_27 = arith.constant 0 : index
    %c0_28 = arith.constant 0 : index
    %52 = vector.load %arg13[%c0_27, %c0_28] : memref<128x32xbf16, #tpu.memory_space<vmem>>, vector<128x32xbf16>
    %cst_29 = arith.constant dense<0.000000e+00> : vector<64x32xf32>
    %53 = tpu.matmul %51, %52, %cst_29 {dimension_numbers = #tpu.dot_dimension_numbers<[1], [0], [0], [1], [0, 0, 1, 1], [], []>} : vector<64x128xbf16>, vector<128x32xbf16>, vector<64x32xf32> -> vector<64x32xf32>
    %c0_30 = arith.constant 0 : index
    %c0_31 = arith.constant 0 : index
    %54 = vector.load %arg14[%c0_30, %c0_31] : memref<1x32xf32, #tpu.memory_space<vmem>>, vector<1x32xf32>
    %55 = vector.broadcast %54 : vector<1x32xf32> to vector<64x32xf32>
    %56 = arith.addf %53, %55 : vector<64x32xf32>
    %57 = arith.addf %56, %12 : vector<64x32xf32>
    %c0_32 = arith.constant 0 : index
    %c0_33 = arith.constant 0 : index
    %58 = vector.load %arg15[%c0_32, %c0_33] : memref<1x32xf32, #tpu.memory_space<vmem>>, vector<1x32xf32>
    %c0_34 = arith.constant 0 : index
    %c0_35 = arith.constant 0 : index
    %59 = vector.load %arg16[%c0_34, %c0_35] : memref<1x32xf32, #tpu.memory_space<vmem>>, vector<1x32xf32>
    %cst_36 = arith.constant dense<0.000000e+00> : vector<64xf32>
    %60 = vector.multi_reduction <add>, %57, %cst_36 [1] : vector<64x32xf32> to vector<64xf32>
    %61 = vector.shape_cast %60 : vector<64xf32> to vector<64x1xf32>
    %cst_37 = arith.constant 3.200000e+01 : f32
    %62 = vector.broadcast %cst_37 : f32 to vector<64x1xf32>
    %63 = arith.divf %61, %62 : vector<64x1xf32>
    %64 = vector.broadcast %63 : vector<64x1xf32> to vector<64x32xf32>
    %65 = arith.subf %57, %64 : vector<64x32xf32>
    %66 = arith.mulf %65, %65 : vector<64x32xf32>
    %cst_38 = arith.constant dense<0.000000e+00> : vector<64xf32>
    %67 = vector.multi_reduction <add>, %66, %cst_38 [1] : vector<64x32xf32> to vector<64xf32>
    %68 = vector.shape_cast %67 : vector<64xf32> to vector<64x1xf32>
    %cst_39 = arith.constant 3.200000e+01 : f32
    %69 = vector.broadcast %cst_39 : f32 to vector<64x1xf32>
    %70 = arith.divf %68, %69 : vector<64x1xf32>
    %71 = vector.broadcast %63 : vector<64x1xf32> to vector<64x32xf32>
    %72 = arith.subf %57, %71 : vector<64x32xf32>
    %cst_40 = arith.constant 9.99999974E-6 : f32
    %73 = vector.broadcast %cst_40 : f32 to vector<64x1xf32>
    %74 = arith.addf %70, %73 : vector<64x1xf32>
    %75 = math.rsqrt %74 : vector<64x1xf32>
    %76 = vector.broadcast %75 : vector<64x1xf32> to vector<64x32xf32>
    %77 = arith.mulf %72, %76 : vector<64x32xf32>
    %78 = vector.broadcast %58 : vector<1x32xf32> to vector<64x32xf32>
    %79 = arith.mulf %77, %78 : vector<64x32xf32>
    %80 = vector.broadcast %59 : vector<1x32xf32> to vector<64x32xf32>
    %81 = arith.addf %79, %80 : vector<64x32xf32>
    %c0_41 = arith.constant 0 : index
    %c0_42 = arith.constant 0 : index
    %82 = vector.load %arg17[%c0_41, %c0_42] : memref<1x32xbf16, #tpu.memory_space<vmem>>, vector<1x32xbf16>
    %83 = arith.truncf %81 : vector<64x32xf32> to vector<64x32xbf16>
    %cst_43 = arith.constant dense<0.000000e+00> : vector<1x64xf32>
    %84 = tpu.matmul %82, %83, %cst_43 {dimension_numbers = #tpu.dot_dimension_numbers<[1], [1], [0], [0], [0, 0, 1, 0], [], []>} : vector<1x32xbf16>, vector<64x32xbf16>, vector<1x64xf32> -> vector<1x64xf32>
    %c0_44 = arith.constant 0 : index
    %c0_45 = arith.constant 0 : index
    %85 = vector.load %arg18[%c0_44, %c0_45] : memref<1x1xf32, #tpu.memory_space<vmem>>, vector<1x1xf32>
    %86 = vector.broadcast %85 : vector<1x1xf32> to vector<1x64xf32>
    %87 = arith.addf %84, %86 : vector<1x64xf32>
    %c0_46 = arith.constant 0 : index
    %c0_47 = arith.constant 0 : index
    %c0_48 = arith.constant 0 : index
    %88 = vector.load %arg19[%c0_46, %c0_47, %c0_48] : memref<1x1x64xf32, #tpu.memory_space<vmem>>, vector<1x1x64xf32>
    %89 = vector.shape_cast %88 : vector<1x1x64xf32> to vector<1x64xf32>
    %90 = vector.shape_cast %87 : vector<1x64xf32> to vector<1x1x64xf32>
    tpu.vector_store %arg19[%c0_46, %c0_47, %c0_48], %90 {strides = array<i32>} : memref<1x1x64xf32, #tpu.memory_space<vmem>>, vector<1x1x64xf32>,
    return
  }
  func.func @transform_0(%arg0: i32, %arg1: i32) -> (i32, i32, i32, i32) {
    %c0_i32 = arith.constant 0 : i32
    %c0_i32_0 = arith.constant 0 : i32
    %c0_i32_1 = arith.constant 0 : i32
    %c0_i32_2 = arith.constant 0 : i32
    return %arg0, %c0_i32, %c0_i32_0, %c0_i32_1 : i32, i32, i32, i32
  }
  func.func @transform_1(%arg0: i32, %arg1: i32) -> (i32, i32) {
    %c0_i32 = arith.constant 0 : i32
    %c0_i32_0 = arith.constant 0 : i32
    %c0_i32_1 = arith.constant 0 : i32
    return %c0_i32, %c0_i32_0 : i32, i32
  }
  func.func @transform_2(%arg0: i32, %arg1: i32) -> (i32, i32) {
    %c0_i32 = arith.constant 0 : i32
    %c0_i32_0 = arith.constant 0 : i32
    %c0_i32_1 = arith.constant 0 : i32
    return %c0_i32, %c0_i32_0 : i32, i32
  }
  func.func @transform_3(%arg0: i32, %arg1: i32) -> (i32, i32, i32) {
    %c0_i32 = arith.constant 0 : i32
    %c0_i32_0 = arith.constant 0 : i32
    %c0_i32_1 = arith.constant 0 : i32
    %c0_i32_2 = arith.constant 0 : i32
    return %c0_i32, %c0_i32_0, %c0_i32_1 : i32, i32, i32
  }
  func.func @transform_4(%arg0: i32, %arg1: i32) -> (i32, i32, i32) {
    %c0_i32 = arith.constant 0 : i32
    %c0_i32_0 = arith.constant 0 : i32
    return %arg0, %arg1, %c0_i32 : i32, i32, i32
  }
  func.func @transform_5(%arg0: i32, %arg1: i32) -> (i32, i32) {
    %c0_i32 = arith.constant 0 : i32
    %c0_i32_0 = arith.constant 0 : i32
    %c0_i32_1 = arith.constant 0 : i32
    return %c0_i32, %c0_i32_0 : i32, i32
  }
  func.func @transform_6(%arg0: i32, %arg1: i32) -> (i32, i32, i32) {
    %c0_i32 = arith.constant 0 : i32
    %c0_i32_0 = arith.constant 0 : i32
    return %arg0, %arg1, %c0_i32 : i32, i32, i32
  }
  func.func @transform_7(%arg0: i32, %arg1: i32) -> (i32, i32) {
    %c0_i32 = arith.constant 0 : i32
    %c0_i32_0 = arith.constant 0 : i32
    %c0_i32_1 = arith.constant 0 : i32
    return %c0_i32, %c0_i32_0 : i32, i32
  }
  func.func @transform_8(%arg0: i32, %arg1: i32) -> (i32, i32) {
    %c0_i32 = arith.constant 0 : i32
    %c0_i32_0 = arith.constant 0 : i32
    %c0_i32_1 = arith.constant 0 : i32
    return %c0_i32, %c0_i32_0 : i32, i32
  }
  func.func @transform_9(%arg0: i32, %arg1: i32) -> (i32, i32) {
    %c0_i32 = arith.constant 0 : i32
    %c0_i32_0 = arith.constant 0 : i32
    %c0_i32_1 = arith.constant 0 : i32
    return %c0_i32, %c0_i32_0 : i32, i32
  }
  func.func @transform_10(%arg0: i32, %arg1: i32) -> (i32, i32) {
    %c0_i32 = arith.constant 0 : i32
    %c0_i32_0 = arith.constant 0 : i32
    %c0_i32_1 = arith.constant 0 : i32
    return %c0_i32, %c0_i32_0 : i32, i32
  }
  func.func @transform_11(%arg0: i32, %arg1: i32) -> (i32, i32) {
    %c0_i32 = arith.constant 0 : i32
    %c0_i32_0 = arith.constant 0 : i32
    %c0_i32_1 = arith.constant 0 : i32
    return %c0_i32, %c0_i32_0 : i32, i32
  }
  func.func @transform_12(%arg0: i32, %arg1: i32) -> (i32, i32) {
    %c0_i32 = arith.constant 0 : i32
    %c0_i32_0 = arith.constant 0 : i32
    %c0_i32_1 = arith.constant 0 : i32
    return %c0_i32, %c0_i32_0 : i32, i32
  }
  func.func @transform_13(%arg0: i32, %arg1: i32) -> (i32, i32) {
    %c0_i32 = arith.constant 0 : i32
    %c0_i32_0 = arith.constant 0 : i32
    %c0_i32_1 = arith.constant 0 : i32
    return %c0_i32, %c0_i32_0 : i32, i32
  }
  func.func @transform_14(%arg0: i32, %arg1: i32) -> (i32, i32) {
    %c0_i32 = arith.constant 0 : i32
    %c0_i32_0 = arith.constant 0 : i32
    %c0_i32_1 = arith.constant 0 : i32
    return %c0_i32, %c0_i32_0 : i32, i32
  }
  func.func @transform_15(%arg0: i32, %arg1: i32) -> (i32, i32) {
    %c0_i32 = arith.constant 0 : i32
    %c0_i32_0 = arith.constant 0 : i32
    %c0_i32_1 = arith.constant 0 : i32
    return %c0_i32, %c0_i32_0 : i32, i32
  }
  func.func @transform_16(%arg0: i32, %arg1: i32) -> (i32, i32) {
    %c0_i32 = arith.constant 0 : i32
    %c0_i32_0 = arith.constant 0 : i32
    %c0_i32_1 = arith.constant 0 : i32
    return %c0_i32, %c0_i32_0 : i32, i32
  }
  func.func @transform_17(%arg0: i32, %arg1: i32) -> (i32, i32, i32) {
    %c0_i32 = arith.constant 0 : i32
    %c0_i32_0 = arith.constant 0 : i32
    return %arg0, %c0_i32, %arg1 : i32, i32, i32
  }
  func.func @transform_18(%arg0: i32, %arg1: i32) -> (i32, i32, i32, i32) {
    %c0_i32 = arith.constant 0 : i32
    %c0_i32_0 = arith.constant 0 : i32
    %c0_i32_1 = arith.constant 0 : i32
    %c0_i32_2 = arith.constant 0 : i32
    return %arg0, %c0_i32, %c0_i32_0, %c0_i32_1 : i32, i32, i32, i32
  }
}

module attributes {stable_mosaic.version = 11 : i64} {
  func.func @_lamo_kernel(%arg0: i32, %arg1: i32, %arg2: memref<1x4x8x8xf32, #tpu.memory_space<vmem>>, %arg3: memref<8x8xf32, #tpu.memory_space<vmem>>, %arg4: memref<1x8xf32, #tpu.memory_space<vmem>>, %arg5: memref<4x8x32xf32, #tpu.memory_space<vmem>>, %arg6: memref<1x64x32xbf16, #tpu.memory_space<vmem>>, %arg7: memref<1x32xf32, #tpu.memory_space<vmem>>, %arg8: memref<1x64x32xf32, #tpu.memory_space<vmem>>, %arg9: memref<1x32xf32, #tpu.memory_space<vmem>>, %arg10: memref<1x32xf32, #tpu.memory_space<vmem>>, %arg11: memref<32x128xbf16, #tpu.memory_space<vmem>>, %arg12: memref<1x128xf32, #tpu.memory_space<vmem>>, %arg13: memref<128x32xbf16, #tpu.memory_space<vmem>>, %arg14: memref<1x32xf32, #tpu.memory_space<vmem>>, %arg15: memref<1x32xf32, #tpu.memory_space<vmem>>, %arg16: memref<1x32xf32, #tpu.memory_space<vmem>>, %arg17: memref<1x32xbf16, #tpu.memory_space<vmem>>, %arg18: memref<1x1xf32, #tpu.memory_space<vmem>>, %arg19: memref<1x1x64xf32, #tpu.memory_space<vmem>>, %arg20: memref<1x4x8x8xf32, #tpu.memory_space<vmem>>, %arg21: memref<32x32xbf16, #tpu.memory_space<vmem>>) attributes {dimension_semantics = [#tpu.dimension_semantics<parallel>, #tpu.dimension_semantics<arbitrary>], iteration_bounds = array<i64: 2, 1>, scalar_prefetch = 0 : i64, scratch_operands = 1 : i64, tpu.core_type = #tpu.core_type<tc>, window_params = [{transform_indices = @transform_0, window_bounds = array<i64: 1, 4, 8, 8>}, {pipeline_mode = #tpu.pipeline_mode<synchronous>, transform_indices = @transform_1, window_bounds = array<i64: 8, 8>}, {pipeline_mode = #tpu.pipeline_mode<synchronous>, transform_indices = @transform_2, window_bounds = array<i64: 1, 8>}, {pipeline_mode = #tpu.pipeline_mode<synchronous>, transform_indices = @transform_3, window_bounds = array<i64: 4, 8, 32>}, {transform_indices = @transform_4, window_bounds = array<i64: 1, 64, 32>}, {pipeline_mode = #tpu.pipeline_mode<synchronous>, transform_indices = @transform_5, window_bounds = array<i64: 1, 32>}, {transform_indices = @transform_6, window_bounds = array<i64: 1, 64, 32>}, {pipeline_mode = #tpu.pipeline_mode<synchronous>, transform_indices = @transform_7, window_bounds = array<i64: 1, 32>}, {pipeline_mode = #tpu.pipeline_mode<synchronous>, transform_indices = @transform_8, window_bounds = array<i64: 1, 32>}, {pipeline_mode = #tpu.pipeline_mode<synchronous>, transform_indices = @transform_9, window_bounds = array<i64: 32, 128>}, {pipeline_mode = #tpu.pipeline_mode<synchronous>, transform_indices = @transform_10, window_bounds = array<i64: 1, 128>}, {pipeline_mode = #tpu.pipeline_mode<synchronous>, transform_indices = @transform_11, window_bounds = array<i64: 128, 32>}, {pipeline_mode = #tpu.pipeline_mode<synchronous>, transform_indices = @transform_12, window_bounds = array<i64: 1, 32>}, {pipeline_mode = #tpu.pipeline_mode<synchronous>, transform_indices = @transform_13, window_bounds = array<i64: 1, 32>}, {pipeline_mode = #tpu.pipeline_mode<synchronous>, transform_indices = @transform_14, window_bounds = array<i64: 1, 32>}, {pipeline_mode = #tpu.pipeline_mode<synchronous>, transform_indices = @transform_15, window_bounds = array<i64: 1, 32>}, {pipeline_mode = #tpu.pipeline_mode<synchronous>, transform_indices = @transform_16, window_bounds = array<i64: 1, 1>}, {transform_indices = @transform_17, window_bounds = array<i64: 1, 1, 64>}, {transform_indices = @transform_18, window_bounds = array<i64: 1, 4, 8, 8>}]} {
    %c0_i32 = arith.constant 0 : i32
    %0 = arith.cmpi eq, %arg1, %c0_i32 : i32
    %1 = arith.extui %0 : i1 to i32
    %c0_i32_0 = arith.constant 0 : i32
    %2 = arith.cmpi ne, %1, %c0_i32_0 : i32
    scf.if %2 {
      %c0_49 = arith.constant 0 : index
      %c0_50 = arith.constant 0 : index
      %c0_51 = arith.constant 0 : index
      %c0_52 = arith.constant 0 : index
      %91 = vector.load %arg2[%c0_49, %c0_50, %c0_51, %c0_52] : memref<1x4x8x8xf32, #tpu.memory_space<vmem>>, vector<1x4x8x8xf32>
      %92 = vector.shape_cast %91 : vector<1x4x8x8xf32> to vector<4x8x8xf32>
      %c0_53 = arith.constant 0 : index
      %c0_54 = arith.constant 0 : index
      %93 = vector.load %arg3[%c0_53, %c0_54] : memref<8x8xf32, #tpu.memory_space<vmem>>, vector<8x8xf32>
      %cst_55 = arith.constant dense<0.000000e+00> : vector<4x8x8xf32>
      %94 = tpu.matmul %92, %93, %cst_55 {dimension_numbers = #tpu.dot_dimension_numbers<[2], [0], [0, 1], [1], [0, 0, 0, 1, 1, 1], [], []>} : vector<4x8x8xf32>, vector<8x8xf32>, vector<4x8x8xf32> -> vector<4x8x8xf32>
      %c0_56 = arith.constant 0 : index
      %c0_57 = arith.constant 0 : index
      %95 = vector.load %arg4[%c0_56, %c0_57] : memref<1x8xf32, #tpu.memory_space<vmem>>, vector<1x8xf32>
      %96 = vector.shape_cast %95 : vector<1x8xf32> to vector<1x1x8xf32>
      %97 = vector.broadcast %96 : vector<1x1x8xf32> to vector<4x8x8xf32>
      %98 = arith.addf %94, %97 : vector<4x8x8xf32>
      %cst_58 = arith.constant 5.000000e-01 : f32
      %99 = vector.broadcast %cst_58 : f32 to vector<4x8x8xf32>
      %100 = arith.mulf %99, %98 : vector<4x8x8xf32>
      %cst_59 = arith.constant 0.707106769 : f32
      %101 = vector.broadcast %cst_59 : f32 to vector<4x8x8xf32>
      %102 = arith.mulf %98, %101 : vector<4x8x8xf32>
      %103 = math.erf %102 : vector<4x8x8xf32>
      %cst_60 = arith.constant 1.000000e+00 : f32
      %104 = vector.broadcast %cst_60 : f32 to vector<4x8x8xf32>
      %105 = arith.addf %104, %103 : vector<4x8x8xf32>
      %106 = arith.mulf %100, %105 : vector<4x8x8xf32>
      %c0_61 = arith.constant 0 : index
      %c0_62 = arith.constant 0 : index
      %c0_63 = arith.constant 0 : index
      %c0_64 = arith.constant 0 : index
      %107 = vector.load %arg20[%c0_61, %c0_62, %c0_63, %c0_64] : memref<1x4x8x8xf32, #tpu.memory_space<vmem>>, vector<1x4x8x8xf32>
      %108 = vector.shape_cast %107 : vector<1x4x8x8xf32> to vector<4x8x8xf32>
      %109 = vector.shape_cast %106 : vector<4x8x8xf32> to vector<1x4x8x8xf32>
      tpu.vector_store %arg20[%c0_61, %c0_62, %c0_63, %c0_64], %109 {strides = array<i32>} : memref<1x4x8x8xf32, #tpu.memory_space<vmem>>, vector<1x4x8x8xf32>,
      %c0_65 = arith.constant 0 : index
      %c0_66 = arith.constant 0 : index
      %c0_67 = arith.constant 0 : index
      %110 = vector.load %arg5[%c0_65, %c0_66, %c0_67] : memref<4x8x32xf32, #tpu.memory_space<vmem>>, vector<4x8x32xf32>
      %cst_68 = arith.constant dense<0.000000e+00> : vector<4x8x32xf32>
      %111 = tpu.matmul %106, %110, %cst_68 {dimension_numbers = #tpu.dot_dimension_numbers<[2], [1], [1], [2], [0, 0, 0, 1, 1, 2], [0], [0]>} : vector<4x8x8xf32>, vector<4x8x32xf32>, vector<4x8x32xf32> -> vector<4x8x32xf32>
      %112 = vector.shape_cast %111 : vector<4x8x32xf32> to vector<32x32xf32>
      %113 = arith.truncf %112 : vector<32x32xf32> to vector<32x32xbf16>
      %c0_69 = arith.constant 0 : index
      %c0_70 = arith.constant 0 : index
      %114 = vector.load %arg21[%c0_69, %c0_70] : memref<32x32xbf16, #tpu.memory_space<vmem>>, vector<32x32xbf16>
      tpu.vector_store %arg21[%c0_69, %c0_70], %113 {strides = array<i32>} : memref<32x32xbf16, #tpu.memory_space<vmem>>, vector<32x32xbf16>,
    } else {
    }
    %c0 = arith.constant 0 : index
    %c0_1 = arith.constant 0 : index
    %c0_2 = arith.constant 0 : index
    %3 = vector.load %arg6[%c0, %c0_1, %c0_2] : memref<1x64x32xbf16, #tpu.memory_space<vmem>>, vector<1x64x32xbf16>
    %4 = vector.shape_cast %3 : vector<1x64x32xbf16> to vector<64x32xbf16>
    %c0_3 = arith.constant 0 : index
    %c0_4 = arith.constant 0 : index
    %c0_5 = arith.constant 0 : index
    %5 = vector.load %arg8[%c0_3, %c0_4, %c0_5] : memref<1x64x32xf32, #tpu.memory_space<vmem>>, vector<1x64x32xf32>
    %6 = vector.shape_cast %5 : vector<1x64x32xf32> to vector<64x32xf32>
    %c0_6 = arith.constant 0 : index
    %c0_7 = arith.constant 0 : index
    %7 = vector.load %arg21[%c0_6, %c0_7] : memref<32x32xbf16, #tpu.memory_space<vmem>>, vector<32x32xbf16>
    %cst = arith.constant dense<0.000000e+00> : vector<64x32xf32>
    %8 = tpu.matmul %4, %7, %cst {dimension_numbers = #tpu.dot_dimension_numbers<[1], [0], [0], [1], [0, 0, 1, 1], [], []>} : vector<64x32xbf16>, vector<32x32xbf16>, vector<64x32xf32> -> vector<64x32xf32>
    %c0_8 = arith.constant 0 : index
    %c0_9 = arith.constant 0 : index
    %9 = vector.load %arg7[%c0_8, %c0_9] : memref<1x32xf32, #tpu.memory_space<vmem>>, vector<1x32xf32>
    %10 = vector.broadcast %9 : vector<1x32xf32> to vector<64x32xf32>
    %11 = arith.addf %8, %10 : vector<64x32xf32>
    %12 = arith.addf %11, %6 : vector<64x32xf32>
    %c0_10 = arith.constant 0 : index
    %c0_11 = arith.constant 0 : index
    %13 = vector.load %arg9[%c0_10, %c0_11] : memref<1x32xf32, #tpu.memory_space<vmem>>, vector<1x32xf32>
    %c0_12 = arith.constant 0 : index
    %c0_13 = arith.constant 0 : index
    %14 = vector.load %arg10[%c0_12, %c0_13] : memref<1x32xf32, #tpu.memory_space<vmem>>, vector<1x32xf32>
    %cst_14 = arith.constant dense<0.000000e+00> : vector<64xf32>
    %15 = vector.multi_reduction <add>, %12, %cst_14 [1] : vector<64x32xf32> to vector<64xf32>
    %16 = vector.shape_cast %15 : vector<64xf32> to vector<64x1xf32>
    %cst_15 = arith.constant 3.200000e+01 : f32
    %17 = vector.broadcast %cst_15 : f32 to vector<64x1xf32>
    %18 = arith.divf %16, %17 : vector<64x1xf32>
    %19 = vector.broadcast %18 : vector<64x1xf32> to vector<64x32xf32>
    %20 = arith.subf %12, %19 : vector<64x32xf32>
    %21 = arith.mulf %20, %20 : vector<64x32xf32>
    %cst_16 = arith.constant dense<0.000000e+00> : vector<64xf32>
    %22 = vector.multi_reduction <add>, %21, %cst_16 [1] : vector<64x32xf32> to vector<64xf32>
    %23 = vector.shape_cast %22 : vector<64xf32> to vector<64x1xf32>
    %cst_17 = arith.constant 3.200000e+01 : f32
    %24 = vector.broadcast %cst_17 : f32 to vector<64x1xf32>
    %25 = arith.divf %23, %24 : vector<64x1xf32>
    %26 = vector.broadcast %18 : vector<64x1xf32> to vector<64x32xf32>
    %27 = arith.subf %12, %26 : vector<64x32xf32>
    %cst_18 = arith.constant 9.99999974E-6 : f32
    %28 = vector.broadcast %cst_18 : f32 to vector<64x1xf32>
    %29 = arith.addf %25, %28 : vector<64x1xf32>
    %30 = math.rsqrt %29 : vector<64x1xf32>
    %31 = vector.broadcast %30 : vector<64x1xf32> to vector<64x32xf32>
    %32 = arith.mulf %27, %31 : vector<64x32xf32>
    %33 = vector.broadcast %13 : vector<1x32xf32> to vector<64x32xf32>
    %34 = arith.mulf %32, %33 : vector<64x32xf32>
    %35 = vector.broadcast %14 : vector<1x32xf32> to vector<64x32xf32>
    %36 = arith.addf %34, %35 : vector<64x32xf32>
    %37 = arith.truncf %36 : vector<64x32xf32> to vector<64x32xbf16>
    %c0_19 = arith.constant 0 : index
    %c0_20 = arith.constant 0 : index
    %38 = vector.load %arg11[%c0_19, %c0_20] : memref<32x128xbf16, #tpu.memory_space<vmem>>, vector<32x128xbf16>
    %cst_21 = arith.constant dense<0.000000e+00> : vector<64x128xf32>
    %39 = tpu.matmul %37, %38, %cst_21 {dimension_numbers = #tpu.dot_dimension_numbers<[1], [0], [0], [1], [0, 0, 1, 1], [], []>} : vector<64x32xbf16>, vector<32x128xbf16>, vector<64x128xf32> -> vector<64x128xf32>
    %c0_22 = arith.constant 0 : index
    %c0_23 = arith.constant 0 : index
    %40 = vector.load %arg12[%c0_22, %c0_23] : memref<1x128xf32, #tpu.memory_space<vmem>>, vector<1x128xf32>
    %41 = vector.broadcast %40 : vector<1x128xf32> to vector<64x128xf32>
    %42 = arith.addf %39, %41 : vector<64x128xf32>
    %cst_24 = arith.constant 5.000000e-01 : f32
    %43 = vector.broadcast %cst_24 : f32 to vector<64x128xf32>
    %44 = arith.mulf %43, %42 : vector<64x128xf32>
    %cst_25 = arith.constant 0.707106769 : f32
    %45 = vector.broadcast %cst_25 : f32 to vector<64x128xf32>
    %46 = arith.mulf %42, %45 : vector<64x128xf32>
    %47 = math.erf %46 : vector<64x128xf32>
    %cst_26 = arith.constant 1.000000e+00 : f32
    %48 = vector.broadcast %cst_26 : f32 to vector<64x128xf32>
    %49 = arith.addf %48, %47 : vector<64x128xf32>
    %50 = arith.mulf %44, %49 : vector<64x128xf32>
    %51 = arith.truncf %50 : vector<64x128xf32> to vector<64x128xbf16>
    %c0_27 = arith.constant 0 : index
    %c0_28 = arith.constant 0 : index
    %52 = vector.load %arg13[%c0_27, %c0_28] : memref<128x32xbf16, #tpu.memory_space<vmem>>, vector<128x32xbf16>
    %cst_29 = arith.constant dense<0.000000e+00> : vector<64x32xf32>
    %53 = tpu.matmul %51, %52, %cst_29 {dimension_numbers = #tpu.dot_dimension_numbers<[1], [0], [0], [1], [0, 0, 1, 1], [], []>} : vector<64x128xbf16>, vector<128x32xbf16>, vector<64x32xf32> -> vector<64x32xf32>
    %c0_30 = arith.constant 0 : index
    %c0_31 = arith.constant 0 : index
    %54 = vector.load %arg14[%c0_30, %c0_31] : memref<1x32xf32, #tpu.memory_space<vmem>>, vector<1x32xf32>
    %55 = vector.broadcast %54 : vector<1x32xf32> to vector<64x32xf32>
    %56 = arith.addf %53, %55 : vector<64x32xf32>
    %57 = arith.addf %56, %12 : vector<64x32xf32>
    %c0_32 = arith.constant 0 : index
    %c0_33 = arith.constant 0 : index
    %58 = vector.load %arg15[%c0_32, %c0_33] : memref<1x32xf32, #tpu.memory_space<vmem>>, vector<1x32xf32>
    %c0_34 = arith.constant 0 : index
    %c0_35 = arith.constant 0 : index
    %59 = vector.load %arg16[%c0_34, %c0_35] : memref<1x32xf32, #tpu.memory_space<vmem>>, vector<1x32xf32>
    %cst_36 = arith.constant dense<0.000000e+00> : vector<64xf32>
    %60 = vector.multi_reduction <add>, %57, %cst_36 [1] : vector<64x32xf32> to vector<64xf32>
    %61 = vector.shape_cast %60 : vector<64xf32> to vector<64x1xf32>
    %cst_37 = arith.constant 3.200000e+01 : f32
    %62 = vector.broadcast %cst_37 : f32 to vector<64x1xf32>
    %63 = arith.divf %61, %62 : vector<64x1xf32>
    %64 = vector.broadcast %63 : vector<64x1xf32> to vector<64x32xf32>
    %65 = arith.subf %57, %64 : vector<64x32xf32>
    %66 = arith.mulf %65, %65 : vector<64x32xf32>
    %cst_38 = arith.constant dense<0.000000e+00> : vector<64xf32>
    %67 = vector.multi_reduction <add>, %66, %cst_38 [1] : vector<64x32xf32> to vector<64xf32>
    %68 = vector.shape_cast %67 : vector<64xf32> to vector<64x1xf32>
    %cst_39 = arith.constant 3.200000e+01 : f32
    %69 = vector.broadcast %cst_39 : f32 to vector<64x1xf32>
    %70 = arith.divf %68, %69 : vector<64x1xf32>
    %71 = vector.broadcast %63 : vector<64x1xf32> to vector<64x32xf32>
    %72 = arith.subf %57, %71 : vector<64x32xf32>
    %cst_40 = arith.constant 9.99999974E-6 : f32
    %73 = vector.broadcast %cst_40 : f32 to vector<64x1xf32>
    %74 = arith.addf %70, %73 : vector<64x1xf32>
    %75 = math.rsqrt %74 : vector<64x1xf32>
    %76 = vector.broadcast %75 : vector<64x1xf32> to vector<64x32xf32>
    %77 = arith.mulf %72, %76 : vector<64x32xf32>
    %78 = vector.broadcast %58 : vector<1x32xf32> to vector<64x32xf32>
    %79 = arith.mulf %77, %78 : vector<64x32xf32>
    %80 = vector.broadcast %59 : vector<1x32xf32> to vector<64x32xf32>
    %81 = arith.addf %79, %80 : vector<64x32xf32>
    %c0_41 = arith.constant 0 : index
    %c0_42 = arith.constant 0 : index
    %82 = vector.load %arg17[%c0_41, %c0_42] : memref<1x32xbf16, #tpu.memory_space<vmem>>, vector<1x32xbf16>
    %83 = arith.truncf %81 : vector<64x32xf32> to vector<64x32xbf16>
    %cst_43 = arith.constant dense<0.000000e+00> : vector<1x64xf32>
    %84 = tpu.matmul %82, %83, %cst_43 {dimension_numbers = #tpu.dot_dimension_numbers<[1], [1], [0], [0], [0, 0, 1, 0], [], []>} : vector<1x32xbf16>, vector<64x32xbf16>, vector<1x64xf32> -> vector<1x64xf32>
    %c0_44 = arith.constant 0 : index
    %c0_45 = arith.constant 0 : index
    %85 = vector.load %arg18[%c0_44, %c0_45] : memref<1x1xf32, #tpu.memory_space<vmem>>, vector<1x1xf32>
    %86 = vector.broadcast %85 : vector<1x1xf32> to vector<1x64xf32>
    %87 = arith.addf %84, %86 : vector<1x64xf32>
    %c0_46 = arith.constant 0 : index
    %c0_47 = arith.constant 0 : index
    %c0_48 = arith.constant 0 : index
    %88 = vector.load %arg19[%c0_46, %c0_47, %c0_48] : memref<1x1x64xf32, #tpu.memory_space<vmem>>, vector<1x1x64xf32>
    %89 = vector.shape_cast %88 : vector<1x1x64xf32> to vector<1x64xf32>
    %90 = vector.shape_cast %87 : vector<1x64xf32> to vector<1x1x64xf32>
    tpu.vector_store %arg19[%c0_46, %c0_47, %c0_48], %90 {strides = array<i32>} : memref<1x1x64xf32, #tpu.memory_space<vmem>>, vector<1x1x64xf32>,
    return
  }
  func.func @transform_0(%arg0: i32, %arg1: i32) -> (i32, i32, i32, i32) {
    %c0_i32 = arith.constant 0 : i32
    %c0_i32_0 = arith.constant 0 : i32
    %c0_i32_1 = arith.constant 0 : i32
    %c0_i32_2 = arith.constant 0 : i32
    return %arg0, %c0_i32, %c0_i32_0, %c0_i32_1 : i32, i32, i32, i32
  }
  func.func @transform_1(%arg0: i32, %arg1: i32) -> (i32, i32) {
    %c0_i32 = arith.constant 0 : i32
    %c0_i32_0 = arith.constant 0 : i32
    %c0_i32_1 = arith.constant 0 : i32
    return %c0_i32, %c0_i32_0 : i32, i32
  }
  func.func @transform_2(%arg0: i32, %arg1: i32) -> (i32, i32) {
    %c0_i32 = arith.constant 0 : i32
    %c0_i32_0 = arith.constant 0 : i32
    %c0_i32_1 = arith.constant 0 : i32
    return %c0_i32, %c0_i32_0 : i32, i32
  }
  func.func @transform_3(%arg0: i32, %arg1: i32) -> (i32, i32, i32) {
    %c0_i32 = arith.constant 0 : i32
    %c0_i32_0 = arith.constant 0 : i32
    %c0_i32_1 = arith.constant 0 : i32
    %c0_i32_2 = arith.constant 0 : i32
    return %c0_i32, %c0_i32_0, %c0_i32_1 : i32, i32, i32
  }
  func.func @transform_4(%arg0: i32, %arg1: i32) -> (i32, i32, i32) {
    %c0_i32 = arith.constant 0 : i32
    %c0_i32_0 = arith.constant 0 : i32
    return %arg0, %arg1, %c0_i32 : i32, i32, i32
  }
  func.func @transform_5(%arg0: i32, %arg1: i32) -> (i32, i32) {
    %c0_i32 = arith.constant 0 : i32
    %c0_i32_0 = arith.constant 0 : i32
    %c0_i32_1 = arith.constant 0 : i32
    return %c0_i32, %c0_i32_0 : i32, i32
  }
  func.func @transform_6(%arg0: i32, %arg1: i32) -> (i32, i32, i32) {
    %c0_i32 = arith.constant 0 : i32
    %c0_i32_0 = arith.constant 0 : i32
    return %arg0, %arg1, %c0_i32 : i32, i32, i32
  }
  func.func @transform_7(%arg0: i32, %arg1: i32) -> (i32, i32) {
    %c0_i32 = arith.constant 0 : i32
    %c0_i32_0 = arith.constant 0 : i32
    %c0_i32_1 = arith.constant 0 : i32
    return %c0_i32, %c0_i32_0 : i32, i32
  }
  func.func @transform_8(%arg0: i32, %arg1: i32) -> (i32, i32) {
    %c0_i32 = arith.constant 0 : i32
    %c0_i32_0 = arith.constant 0 : i32
    %c0_i32_1 = arith.constant 0 : i32
    return %c0_i32, %c0_i32_0 : i32, i32
  }
  func.func @transform_9(%arg0: i32, %arg1: i32) -> (i32, i32) {
    %c0_i32 = arith.constant 0 : i32
    %c0_i32_0 = arith.constant 0 : i32
    %c0_i32_1 = arith.constant 0 : i32
    return %c0_i32, %c0_i32_0 : i32, i32
  }
  func.func @transform_10(%arg0: i32, %arg1: i32) -> (i32, i32) {
    %c0_i32 = arith.constant 0 : i32
    %c0_i32_0 = arith.constant 0 : i32
    %c0_i32_1 = arith.constant 0 : i32
    return %c0_i32, %c0_i32_0 : i32, i32
  }
  func.func @transform_11(%arg0: i32, %arg1: i32) -> (i32, i32) {
    %c0_i32 = arith.constant 0 : i32
    %c0_i32_0 = arith.constant 0 : i32
    %c0_i32_1 = arith.constant 0 : i32
    return %c0_i32, %c0_i32_0 : i32, i32
  }
  func.func @transform_12(%arg0: i32, %arg1: i32) -> (i32, i32) {
    %c0_i32 = arith.constant 0 : i32
    %c0_i32_0 = arith.constant 0 : i32
    %c0_i32_1 = arith.constant 0 : i32
    return %c0_i32, %c0_i32_0 : i32, i32
  }
  func.func @transform_13(%arg0: i32, %arg1: i32) -> (i32, i32) {
    %c0_i32 = arith.constant 0 : i32
    %c0_i32_0 = arith.constant 0 : i32
    %c0_i32_1 = arith.constant 0 : i32
    return %c0_i32, %c0_i32_0 : i32, i32
  }
  func.func @transform_14(%arg0: i32, %arg1: i32) -> (i32, i32) {
    %c0_i32 = arith.constant 0 : i32
    %c0_i32_0 = arith.constant 0 : i32
    %c0_i32_1 = arith.constant 0 : i32
    return %c0_i32, %c0_i32_0 : i32, i32
  }
  func.func @transform_15(%arg0: i32, %arg1: i32) -> (i32, i32) {
    %c0_i32 = arith.constant 0 : i32
    %c0_i32_0 = arith.constant 0 : i32
    %c0_i32_1 = arith.constant 0 : i32
    return %c0_i32, %c0_i32_0 : i32, i32
  }
  func.func @transform_16(%arg0: i32, %arg1: i32) -> (i32, i32) {
    %c0_i32 = arith.constant 0 : i32
    %c0_i32_0 = arith.constant 0 : i32
    %c0_i32_1 = arith.constant 0 : i32
    return %c0_i32, %c0_i32_0 : i32, i32
  }
  func.func @transform_17(%arg0: i32, %arg1: i32) -> (i32, i32, i32) {
    %c0_i32 = arith.constant 0 : i32
    %c0_i32_0 = arith.constant 0 : i32
    return %arg0, %c0_i32, %arg1 : i32, i32, i32
  }
  func.func @transform_18(%arg0: i32, %arg1: i32) -> (i32, i32, i32, i32) {
    %c0_i32 = arith.constant 0 : i32
    %c0_i32_0 = arith.constant 0 : i32
    %c0_i32_1 = arith.constant 0 : i32
    %c0_i32_2 = arith.constant 0 : i32
    return %arg0, %c0_i32, %c0_i32_0, %c0_i32_1 : i32, i32, i32, i32
  }
}

</mosaic_0001>

<bundles_post_ra>
// kernel: tpu_custom_call.1
= control target key start
LH: loop header
LB: loop body
LE: loop exit
PB: predicated region body
PF: predicated region fallthrough
CT: control target
= control target key end

     0   :  { %s3040_s0 = inlined_call_operand.vmem [shape: f32[2,4,8,8], index: 0, kind: input, shape index: {}]   ;;  %s3041_s1 = inlined_call_operand.vmem [shape: f32[8,8], index: 1, kind: input, shape index: {}]   ;;  %s3042_s2 = inlined_call_operand.vmem [shape: f32[1,8], index: 2, kind: input, shape index: {}]   ;;  %s3043_s3 = inlined_call_operand.vmem [shape: f32[4,8,32], index: 3, kind: input, shape index: {}]   ;;  %s3044_s4 = inlined_call_operand.vmem [shape: bf16[2,64,32], index: 4, kind: input, shape index: {}]   ;;  %s3045_s5 = inlined_call_operand.vmem [shape: f32[1,32], index: 5, kind: input, shape index: {}]   ;;  %s3046_s6 = inlined_call_operand.vmem [shape: f32[2,64,32], index: 6, kind: input, shape index: {}]   ;;  %s3047_s7 = inlined_call_operand.vmem [shape: f32[1,32], index: 7, kind: input, shape index: {}]   ;;  %s3048_s8 = inlined_call_operand.vmem [shape: f32[1,32], index: 8, kind: input, shape index: {}]   ;;  %s3049_s9 = inlined_call_operand.vmem [shape: bf16[32,128], index: 9, kind: input, shape index: {}]   ;;  %s3050_s10 = inlined_call_operand.vmem [shape: f32[1,128], index: 10, kind: input, shape index: {}]   ;;  %s3051_s11 = inlined_call_operand.vmem [shape: bf16[128,32], index: 11, kind: input, shape index: {}]   ;;  %s3052_s12 = inlined_call_operand.vmem [shape: f32[1,32], index: 12, kind: input, shape index: {}]   ;;  %s3053_s13 = inlined_call_operand.vmem [shape: f32[1,32], index: 13, kind: input, shape index: {}]   ;;  %s3054_s14 = inlined_call_operand.vmem [shape: f32[1,32], index: 14, kind: input, shape index: {}]   ;;  %s3055_s15 = inlined_call_operand.vmem [shape: bf16[1,32], index: 15, kind: input, shape index: {}]   ;;  %s3056_s16 = inlined_call_operand.<no memory space> [shape: f32[1,1], index: 16, kind: input, shape index: {}]   ;;  %s3057_s17 = inlined_call_operand.hbm [shape: f32[2,1,64], index: 17, kind: output, shape index: {0}]   ;;  %s3058_s18 = inlined_call_operand.hbm [shape: f32[2,4,8,8], index: 18, kind: output, shape index: {1}]  }
   0x1   :  { %3063 = sst [smem:[#allocation15_spill]] %s3040_s0  ;;  %v24_v0 = vstv %s3056_s16 }
   0x2   :  { %3064 = sst [smem:[#allocation16_spill]] %s3041_s1  ;;  %25 = vst [vmem:[#allocation3] sm:$0x1] %v24_v0 }
   0x3   :  { %3065 = sst [smem:[#allocation17_spill]] %s3042_s2 }
   0x4   :  { %3066 = sst [smem:[#allocation18_spill]] %s3043_s3 }
   0x5   :  { %26 = vsyncpa [#allocation5], 0 }
   0x6   :  { %28 = vsyncpa [#allocation5 + $0x1], 0 }
   0x7   :  { %29 = vsyncpa [#allocation7], 0 }
   0x8   :  { %31 = vsyncpa [#allocation7 + $0x1], 0  ;;  %s2589_s29 = smov 0   ;;  %s2591_s30 = smov 0  }
   0x9   :  { %s2593_s0 = smov 0   ;;  %s2595_s19 = smov 0  }
   0xa   :  { %s2597_s1 = smov 0   ;;  %s2599_s20 = smov 0  }
   0xb LB: > { %3067 = sst [smem:[#allocation10_spill]] %s2470_s0  ;;  %s2043_s16 = sadd.s32 4294967295, %s2482_s20   ;;  %s2482_s20 = sphi %s2599_s20, %s37_s20   ;;  %s2478_s1 = sphi %s2597_s1, %s3083_s1   ;;  %s2474_s19 = sphi %s2595_s19, %s3082_s19   ;;  %s2470_s0 = sphi %s2593_s0, %s3081_s0   ;;  %s2466_s30 = sphi %s2591_s30, %s3085_s30   ;;  %s2462_s29 = sphi %s2589_s29, %s3084_s29  }
   0xc   : > { %3068 = sst [smem:[#allocation11_spill]] %s2478_s1  ;;  %s2044_s21 = sadd.s32 4294967294, %s2482_s20  }
   0xd   : > { %s49_s22 = sadd.s32 1, %s2478_s1  ;;  %s434_s2 = sadd.s32 1, %s2470_s0 }
   0xe   : > { %p51_p0 = scmp.ge.s32.totalorder %s49_s22, 2  ;;  %p444_p1 = scmp.ne.s32.totalorder %s2470_s0, %s2466_s30 }
   0xf   : > { %p445_p2 = scmp.eq.s32.totalorder %s2043_s16, 1  ;;  %p450_p3 = scmp.ne.s32.totalorder %s2466_s30, %s2462_s29 }
  0x10   : > { %s3087_s22 = smov (%p51_p0, %s49_s22), 0  ;;  %p451_p5 = scmp.eq.s32.totalorder %s2044_s21, 1 }
  0x11   : > { %3069 = sst [smem:[#allocation12_spill]] %s3087_s22  ;;  %p2629_p4 = por %p445_p2, %p444_p1 }
  0x12   : > { %s429_s24 = ssub.s32 %s2478_s1, %s3087_s22  ;;  %p2047_p6 = scmp.ge.s32.totalorder %s2482_s20, 1 }
  0x13   : > { %p432_p7 = scmp.eq.s32.totalorder %s429_s24, 0  ;;  %p2636_p8 = por %p451_p5, %p450_p3 }
  0x14   : > { %p571_p9 = scmp.lt.s32.totalorder %s2482_s20, 3 }
  0x15   : > { %s3071_s25 = scalar_select %p2636_p8, 1, 0 }
  0x16   : > { %s2642_s26 = scalar_select %p432_p7, %s2470_s0, %s434_s2  }
  0x17   : > { %3072 = sst [smem:[#allocation13_spill]] %s3071_s25  ;;  %p572_p10 = pnand %p2047_p6, %p571_p9 }
  0x18   : > { %3073 = sst [smem:[#allocation14_spill]] %s2642_s26  ;;  %s3074_s16 = sld [smem:[#allocation16_spill]] (!%p572_p10)  ;;  %vm689_vm0 = vcmask (!%p572_p10), 64512   ;;  %v2484_v6 = vmov (!%p572_p10), 0.0   ;;  %vm2485_vm1 = vmmov (!%p572_p10), 0   ;;  %vm1109_vm2 = vcmask (!%p572_p10), 261120  }
  0x19   : > { %575 = sbr.rel (%p572_p10) target bundleno = 2076 (0x81c), region = 88  ;;  %p647_p11 = scmp.lt.s32.totalorder (!%p572_p10), %s2474_s19, 1  ;;  %v2064_v56 = vld [vmem:[%s3045_s5] ss:$0 sm:$0xff] (!%p572_p10) }
  0x1a   : > { %s3075_s1 = sld [smem:[#allocation15_spill]] (!%p572_p10)  ;;  %s3076_s3 = sld [smem:[#allocation18_spill]] (!%p572_p10) }
  0x1b   : > { %s2103_s25 = sshll.u32 (!%p572_p10), %s2474_s19, 9 }
  0x1e   : > { %v681_v1 = vld [vmem:[%s3074_s16] sm:$0xff] (!%p572_p10)  ;;  %s3077_s16 = sld [smem:[#allocation17_spill]] (!%p572_p10) }
  0x1f   : > { %2146 = vmatprep.subr.mxu0 (!%p572_p10), %v681_v1  ;;  %2234 = vmatprep.subr.mxu1 (!%p572_p10), %v681_v1 }
  0x20   : > { %2147 = vmatpush3.msra.mxu0 %v681_v1  ;;  %2235 = vmatpush3.msra.mxu1 %v681_v1  ;;  %s2649_s21 = scalar_select %p647_p11, %s2474_s19, 1  ;;  %v811_v7 = vld [vmem:[%s3076_s3] sm:$0xff]  ;;  %v813_v8 = vld [vmem:[%s3076_s3 + $0x10] sm:$0xff]  ;;  %v812_v37 = vld [vmem:[%s3076_s3 + $0x8] sm:$0xff] }
  0x21   : > { %2154 = vmatprep.subr.mxu1 %v2484_v6  ;;  %2164 = vmatprep.subr.mxu0 %v2484_v6  ;;  %v814_v39 = vld [vmem:[%s3076_s3 + $0x18] sm:$0xff] }
  0x22   : > { %s2100_s24 = sshll.u32 %s2649_s21, 5  ;;  %s2102_s28 = sshll.u32 %s2649_s21, 6 }
  0x23   : > { %s651_s26 = scalar_lea.vmem %s3075_s1, %s2100_s24  ;;  %s2658_s27 = scalar_lea.vmem %s3044_s4, %s2100_s24 }
  0x24   : > { %v677_v2 = vld [vmem:[%s651_s26] sm:$0xff]  ;;  %v679_v3 = vld [vmem:[%s651_s26 + $0x10] sm:$0xff]  ;;  %v678_v4 = vld [vmem:[%s651_s26 + $0x8] sm:$0xff]  ;;  %s2681_s24 = sand.u32 1, %s2466_s30   ;;  %s2723_s1 = scalar_lea.vmem %s3046_s6, %s2102_s28 }
  0x25   : > { %2148 = vmatprep.mubr.msk.f32.mxu0 %vm689_vm0, %v677_v2  ;;  %2151 = vmatprep.mubr.msk.f32.mxu1 %vm689_vm0, %v679_v3  ;;  %v680_v5 = vld [vmem:[%s651_s26 + $0x18] sm:$0xff]  ;;  %v2055_v9 = vld [vmem:[%s3077_s16] ss:$0 sm:$0xff]  ;;  %s2048_s2 = sshll.u32 %s2681_s24, 5  ;;  %v2303_v53 = vld [vmem:[%s2658_s27 + $0x8] sm:$0xff]   ;;  %s2961_s26 = scalar_lea.hbm %s3058_s18, %s2103_s25 }
  0x26   : > { %2149 = vmatmul.mubr.msk.f32.vlgmr.msra.gmra.mrb[0].mxu0 %vm689_vm0, %v678_v4  ;;  %2152 = vmatmul.mubr.msk.f32.vlgmr.msra.gmra.mrb[0].mxu1 %vm689_vm0, %v680_v5  ;;  %s2687_s0 = scalar_lea.vmem [#allocation6], %s2048_s2  ;;  %v2302_v40 = vld [vmem:[%s2658_s27] sm:$0xff]   ;;  %v2304_v54 = vld [vmem:[%s2658_s27 + $0x10] sm:$0xff]   ;;  %v2305_v55 = vld [vmem:[%s2658_s27 + $0x18] sm:$0xff]   ;;  %s2487_s2 = smov [#allocation6]  }
  0x27   : > { %2155 = vmatpush3.msra.mxu1 %v811_v7  ;;  %2156 = vmatprep.mubr.msk.f32.mxu1 %vm2485_vm1, %v2484_v6  ;;  %v1122_v57 = vld [vmem:[%s2723_s1 + $0x10] sm:$0xff]  ;;  %v1120_v60 = vld [vmem:[%s2723_s1] sm:$0xff]  ;;  %v1123_v63 = vld [vmem:[%s2723_s1 + $0x18] sm:$0xff]  ;;  %s1908_s22 = sshll.u32 %s2687_s0, 4  ;;  %s2956_s22 = int_to_ptr.vmem [resolvable:$true] %s1908_s22 }
  0x28   : > { %2159 = vmatprep.subr.mxu1 %v2484_v6  ;;  %2165 = vmatpush3.msra.mxu0 %v813_v8  ;;  %v1121_v3 = vld [vmem:[%s2723_s1 + $0x8] sm:$0xff]  ;;  %s2372_s16 = scalar_lea.vmem %s2956_s22, 512 }
  0x29   : > { %2166 = vmatprep.mubr.msk.f32.mxu0 %vm2485_vm1, %v2484_v6  ;;  %p2373_p12 = scmp.ne.s32.totalorder %s2956_s22, %s2372_s16 }
  0x2b   : > { %p2374_p13 = pnand %p2373_p12, %p2629_p4 }
  0x2d   : > { %p2375_p0 = pneg %p2374_p13 }
  0xf9   : > { %v2150_v10 = vpop.f32.mrb[0].mxu0  ;;  %v2153_v11 = vpop.f32.mrb[0].mxu1 }
  0xfa   : > { %v774_v12 = vadd.f32 %v2150_v10, %v2055_v9  ;;  %v784_v13 = vadd.f32 %v2153_v11, %v2055_v9  ;;  %v768_v14 = vpop.f32.mrb[1].mxu0  ;;  %v778_v15 = vpop.f32.mrb[1].mxu1 }
  0xfb   : > { %v769_v16 = vadd.f32 %v2055_v9, %v768_v14  ;;  %v779_v17 = vadd.f32 %v2055_v9, %v778_v15  ;;  %v1124_v15 = vld [vmem:[%s2723_s1 + $0x20] sm:$0xff] }
  0xfc   : > { %v792_v18 = vmul.f32 0.70710677, %v774_v12  ;;  %v794_v19 = vmul.f32 0.70710677, %v784_v13  ;;  %v788_v24 = vmul.f32 0.5, %v774_v12  ;;  %v790_v27 = vmul.f32 0.5, %v784_v13 }
  0xfd   : > { %v791_v20 = vmul.f32 0.70710677, %v769_v16  ;;  %v793_v21 = vmul.f32 0.70710677, %v779_v17  ;;  %v787_v31 = vmul.f32 0.5, %v769_v16  ;;  %v789_v34 = vmul.f32 0.5, %v779_v17 }
  0xfe   : > { %2316 = verf.f32 %v792_v18  ;;  %v1126_v12 = vld [vmem:[%s2723_s1 + $0x30] sm:$0xff] }
  0xff   : > { %2318 = verf.f32 %v794_v19  ;;  %v1127_v19 = vld [vmem:[%s2723_s1 + $0x38] sm:$0xff] }
 0x100   : > { %2320 = verf.f32 %v791_v20 }
 0x101   : > { %2322 = verf.f32 %v793_v21 }
 0x108   : > { %v2317_v22 = vpop.eup %2316 }
 0x109   : > { %v2319_v23 = vpop.eup %2318  ;;  %v800_v25 = vadd.f32 1.0, %v2317_v22 }
 0x10a   : > { %v2321_v26 = vpop.eup %2320  ;;  %v802_v28 = vadd.f32 1.0, %v2319_v23 }
 0x10b   : > { %v2323_v29 = vpop.eup %2322  ;;  %v804_v30 = vmul.f32 %v800_v25, %v788_v24  ;;  %v799_v32 = vadd.f32 1.0, %v2321_v26  ;;  %v1125_v24 = vld [vmem:[%s2723_s1 + $0x28] sm:$0xff]  ;;  %s2376_s1 = sshll.u32 %s2487_s2, 4  ;;  %s2377_s1 = int_to_ptr.vmem [resolvable:$false] %s2376_s1 }
 0x10c   : > { %v806_v33 = vmul.f32 %v802_v28, %v790_v27  ;;  %v801_v35 = vadd.f32 1.0, %v2323_v29  ;;  %p2379_p1 = scmp.lt.s32.totalorder %s2956_s22, %s2377_s1 }
 0x10d   : > { %v803_v36 = vmul.f32 %v799_v32, %v787_v31  ;;  %808 = vst.msk [vmem:[%s2687_s0 + $0x8] sm:$0xff] %vm689_vm0, %v804_v30 }
 0x10e   : > { %v805_v38 = vmul.f32 %v801_v35, %v789_v34  ;;  %810 = vst.msk [vmem:[%s2687_s0 + $0x18] sm:$0xff] %vm689_vm0, %v806_v33 }
 0x10f   : > { %2157 = vmatmul.mubr.msk.f32.vlgmr.msra.gmra.mrb[2].mxu1 %vm689_vm0, %v803_v36  ;;  %807 = vst.msk [vmem:[%s2687_s0] sm:$0xff] %vm689_vm0, %v803_v36 }
 0x110   : > { %2160 = vmatpush3.msra.mxu1 %v812_v37  ;;  %2167 = vmatmul.mubr.msk.f32.vlgmr.msra.gmra.mrb[2].mxu0 %vm689_vm0, %v805_v38  ;;  %809 = vst.msk [vmem:[%s2687_s0 + $0x10] sm:$0xff] %vm689_vm0, %v805_v38  ;;  %s2378_s0 = scalar_lea.vmem %s2377_s1, 1024 }
 0x111   : > { %2161 = vmatprep.mubr.msk.f32.mxu1 %vm2485_vm1, %v2484_v6  ;;  %2169 = vmatprep.subr.mxu1 %v2484_v6  ;;  %p2380_p2 = scmp.lt.s32.totalorder %s2378_s0, %s2372_s16 }
 0x112   : > { %2178 = vmatprep.mubr.msk.bf16.mxu0 %vm1109_vm2, %v2302_v40 }
 0x113   : > { %2162 = vmatmul.mubr.msk.f32.vlgmr.msra.gmra.mrb[4].mxu1 %vm689_vm0, %v804_v30  ;;  %p2381_p3 = por %p2380_p2, %p2379_p1 }
 0x114   : > { %2170 = vmatpush3.msra.mxu1 %v814_v39  ;;  %2171 = vmatprep.mubr.msk.f32.mxu1 %vm2485_vm1, %v2484_v6 }
 0x115   : > { %p2382_p5 = pnand %p2381_p3, %p2375_p0 }
 0x117   : > { %2172 = vmatmul.mubr.msk.f32.vlgmr.msra.gmra.mrb[6].mxu1 %vm689_vm0, %v806_v33 }
 0x1e2   : > { %v884_v41 = vpop.f32.mrb[2].mxu1 }
 0x1e3   : > { %v1030_v42 = vpop.f32.mrb[2].mxu0  ;;  %v2158_v43 = vpop.f32.mrb[3].mxu1 }
 0x1e4   : > { %v2168_v44 = vpop.f32.mrb[3].mxu0 }
 0x1e6   : > { %v957_v45 = vpop.f32.mrb[4].mxu1 }
 0x1e7   : > { %v1107_v46 = vpack.c.bf16 %v957_v45, %v884_v41  ;;  %v2163_v47 = vpop.f32.mrb[5].mxu1 }
 0x1e9   : > { %1110 = vst.msk [vmem:[#allocation2] sm:$0xff] %vm1109_vm2, %v1107_v46 }
 0x1ea   : > { %v1103_v48 = vpop.f32.mrb[6].mxu1 }
 0x1eb   : > { %v1108_v49 = vpack.c.bf16 %v1103_v48, %v1030_v42  ;;  %v2173_v50 = vpop.f32.mrb[7].mxu1 }
 0x1ed   : > { %1111 = vst.msk [vmem:[#allocation2 + $0x8] sm:$0xff] %vm1109_vm2, %v1108_v49 }
 0x1f0   : > { %v1128_v51 = vld [vmem:[#allocation2] sm:$0xff] }
 0x1f1   : > { %2174 = vmatprep.subr.bf16.mxu0 %v1128_v51 }
 0x1f2   : > { %2175 = vmatpush3.bf16.msra.mxu0 %v1128_v51 }
 0x1f4   : > { %v1129_v52 = vld [vmem:[#allocation2 + $0x8] sm:$0xff] }
 0x1f5   : > { %2176 = vmatprep.subr.bf16.mxu0 %v1129_v52 }
 0x1f6   : > { %2177 = vmatpush3.bf16.msra.mxu0 %v1129_v52 }
 0x1f9   : > { %2179 = vmatmul.mubr.msk.bf16.vlgmr.msra.gmra.mrb[4].mxu0 %vm1109_vm2, %v2303_v53 }
 0x1fa   : > { %2182 = vmatprep.mubr.msk.bf16.mxu0 %vm1109_vm2, %v2304_v54 }
 0x201   : > { %2183 = vmatmul.mubr.msk.bf16.gmra.mrb[8].mxu0 %vm1109_vm2, %v2305_v55 }
 0x2cc   : > { %v2180_v58 = vpop.f32.mrb[4].mxu0 }
 0x2cd   : > { %v1213_v59 = vadd.f32 %v2180_v58, %v2064_v56  ;;  %v1204_v61 = vpop.f32.mrb[5].mxu0 }
 0x2ce   : > { %v1205_v62 = vadd.f32 %v2064_v56, %v1204_v61  ;;  %v2181_v0 = vpop.f32.mrb[6].mxu0 }
 0x2cf   : > { %v2731_v1 = vadd.f32 %v1213_v59, %v1122_v57  ;;  %v1216_v2 = vadd.f32 %v2181_v0, %v2064_v56  ;;  %v1207_v4 = vpop.f32.mrb[7].mxu0 }
 0x2d0   : > { %v2734_v5 = vadd.f32 %v1205_v62, %v1120_v60  ;;  %v1208_v7 = vadd.f32 %v2064_v56, %v1207_v4 }
 0x2d1   : > { %v2736_v8 = vadd.f32 %v1216_v2, %v1123_v63  ;;  %v1251_v9 = vsel %vm1109_vm2, %v2731_v1, 0.0 }
 0x2d2   : > { %v2740_v10 = vadd.f32 %v1208_v7, %v1121_v3  ;;  %1252 = vadd.xlane.f32.xlu1 %v1251_v9  ;;  %v1245_v11 = vsel %vm1109_vm2, %v2734_v5, 0.0 }
 0x2d3   : > { %1246 = vadd.xlane.f32.xlu0 %v1245_v11  ;;  %v1254_v17 = vsel %vm1109_vm2, %v2736_v8, 0.0 }
 0x2d4   : > { %v2184_v13 = vpop.f32.mrb[8].mxu0  ;;  %v1248_v21 = vsel %vm1109_vm2, %v2740_v10, 0.0 }
 0x2d5   : > { %v1229_v14 = vadd.f32 %v2184_v13, %v2064_v56  ;;  %v1220_v16 = vpop.f32.mrb[9].mxu0 }
 0x2d6   : > { %v1221_v18 = vadd.f32 %v2064_v56, %v1220_v16  ;;  %1255 = vadd.xlane.f32.xlu1 %v1254_v17  ;;  %v2185_v20 = vpop.f32.mrb[10].mxu0  ;;  %v2307_v16 = vld [vmem:[%s3049_s9 + $0x8] sm:$0xff]   ;;  %v2308_v17 = vld [vmem:[%s3051_s11] sm:$0xff]  }
 0x2d7   : > { %v2751_v22 = vadd.f32 %v1229_v14, %v1126_v12  ;;  %v1232_v23 = vadd.f32 %v2185_v20, %v2064_v56  ;;  %v1223_v25 = vpop.f32.mrb[11].mxu0  ;;  %1249 = vadd.xlane.f32.xlu0 %v1248_v21  ;;  %2198 = vmatprep.subr.bf16.mxu0 %v2308_v17 }
 0x2d8   : > { %v2754_v26 = vadd.f32 %v1221_v18, %v1124_v15  ;;  %v1224_v27 = vadd.f32 %v2064_v56, %v1223_v25  ;;  %v2306_v15 = vld [vmem:[%s3049_s9] sm:$0xff]   ;;  %v2309_v18 = vld [vmem:[%s3051_s11 + $0x8] sm:$0xff]   ;;  %2199 = vmatpush3.bf16.msra.mxu0 %v2308_v17 }
 0x2d9   : > { %v2756_v28 = vadd.f32 %v1232_v23, %v1127_v19  ;;  %v1263_v32 = vsel %vm1109_vm2, %v2751_v22, 0.0  ;;  %2186 = vmatprep.subr.bf16.mxu1 %v2306_v15  ;;  %2200 = vmatprep.subr.bf16.mxu0 %v2309_v18 }
 0x2da   : > { %v2758_v29 = vadd.f32 %v1224_v27, %v1125_v24  ;;  %v1257_v30 = vsel %vm1109_vm2, %v2754_v26, 0.0  ;;  %2187 = vmatpush3.bf16.msra.mxu1 %v2306_v15 }
 0x2db   : > { %1258 = vadd.xlane.f32.xlu0 %v1257_v30  ;;  %v1266_v33 = vsel %vm1109_vm2, %v2756_v28, 0.0  ;;  %2188 = vmatprep.subr.bf16.mxu1 %v2307_v16 }
 0x2dc   : > { %v1260_v31 = vsel %vm1109_vm2, %v2758_v29, 0.0  ;;  %2201 = vmatpush3.bf16.msra.mxu0 %v2309_v18 }
 0x2dd   : > { %1261 = vadd.xlane.f32.xlu1 %v1260_v31 }
 0x2de   : > { %2189 = vmatpush3.bf16.msra.mxu1 %v2307_v16 }
 0x2df   : > { %1264 = vadd.xlane.f32.xlu0 %v1263_v32  ;;  %2222 = vmatprep.subr.bf16.mxu1 %v2484_v6 }
 0x2e1   : > { %1267 = vadd.xlane.f32.xlu1 %v1266_v33 }
 0x35f   : > { %v1253_v34 = vpop.xlane.xlu1 %1252 }
 0x360   : > { %v1272_v35 = vmul.f32 0.03125, %v1253_v34  ;;  %v1247_v36 = vpop.xlane.xlu0 %1246 }
 0x361   : > { %v1270_v37 = vmul.f32 0.03125, %v1247_v36 }
 0x362   : > { %v2769_v38 = vsub.f32 %v2731_v1, %v1272_v35 }
 0x363   : > { %v2772_v39 = vsub.f32 %v2734_v5, %v1270_v37  ;;  %v1256_v40 = vpop.xlane.xlu1 %1255 }
 0x364   : > { %v1273_v41 = vmul.f32 0.03125, %v1256_v40  ;;  %v1250_v42 = vpop.xlane.xlu0 %1249  ;;  %v1288_v48 = vmul.f32 %v2769_v38, %v2769_v38 }
 0x365   : > { %v1271_v43 = vmul.f32 0.03125, %v1250_v42  ;;  %v1286_v44 = vmul.f32 %v2772_v39, %v2772_v39 }
 0x366   : > { %v2777_v45 = vsub.f32 %v2736_v8, %v1273_v41  ;;  %v1300_v56 = vsel %vm1109_vm2, %v1288_v48, 0.0 }
 0x367   : > { %v2780_v46 = vsub.f32 %v2740_v10, %v1271_v43  ;;  %v1294_v47 = vsel %vm1109_vm2, %v1286_v44, 0.0 }
 0x368   : > { %1295 = vadd.xlane.f32.xlu0 %v1294_v47  ;;  %v1259_v49 = vpop.xlane.xlu0 %1258  ;;  %v1289_v53 = vmul.f32 %v2777_v45, %v2777_v45 }
 0x369   : > { %v1274_v50 = vmul.f32 0.03125, %v1259_v49  ;;  %v1287_v51 = vmul.f32 %v2780_v46, %v2780_v46 }
 0x36a   : > { %v1262_v52 = vpop.xlane.xlu1 %1261  ;;  %v1303_v63 = vsel %vm1109_vm2, %v1289_v53, 0.0 }
 0x36b   : > { %v2790_v54 = vsub.f32 %v2754_v26, %v1274_v50  ;;  %v1275_v55 = vmul.f32 0.03125, %v1262_v52  ;;  %v1297_v57 = vsel %vm1109_vm2, %v1287_v51, 0.0  ;;  %v2073_v51 = vld [vmem:[%s3047_s7] ss:$0 sm:$0xff] }
 0x36c   : > { %1301 = vadd.xlane.f32.xlu0 %v1300_v56  ;;  %1298 = vadd.xlane.f32.xlu1 %v1297_v57  ;;  %v1265_v58 = vpop.xlane.xlu0 %1264 }
 0x36d   : > { %v2795_v59 = vsub.f32 %v2758_v29, %v1275_v55  ;;  %v1276_v60 = vmul.f32 0.03125, %v1265_v58  ;;  %v1290_v61 = vmul.f32 %v2790_v54, %v2790_v54 }
 0x36e   : > { %v1268_v62 = vpop.xlane.xlu1 %1267 }
 0x36f   : > { %v2801_v0 = vsub.f32 %v2751_v22, %v1276_v60  ;;  %v1277_v2 = vmul.f32 0.03125, %v1268_v62  ;;  %v1306_v3 = vsel %vm1109_vm2, %v1290_v61, 0.0  ;;  %v1291_v4 = vmul.f32 %v2795_v59, %v2795_v59 }
 0x370   : > { %1304 = vadd.xlane.f32.xlu1 %v1303_v63  ;;  %1307 = vadd.xlane.f32.xlu0 %v1306_v3 }
 0x371   : > { %v2807_v7 = vsub.f32 %v2756_v28, %v1277_v2  ;;  %v1292_v9 = vmul.f32 %v2801_v0, %v2801_v0  ;;  %v1309_v11 = vsel %vm1109_vm2, %v1291_v4, 0.0 }
 0x373   : > { %v1312_v12 = vsel %vm1109_vm2, %v1292_v9, 0.0  ;;  %v1293_v13 = vmul.f32 %v2807_v7, %v2807_v7 }
 0x374   : > { %1310 = vadd.xlane.f32.xlu1 %v1309_v11  ;;  %1313 = vadd.xlane.f32.xlu0 %v1312_v12 }
 0x375   : > { %v1315_v14 = vsel %vm1109_vm2, %v1293_v13, 0.0 }
 0x378   : > { %1316 = vadd.xlane.f32.xlu1 %v1315_v14 }
 0x3f5   : > { %v1296_v19 = vpop.xlane.xlu0 %1295 }
 0x3f6   : > { %v1318_v20 = vmul.f32 0.03125, %v1296_v19 }
 0x3f8   : > { %v1326_v21 = vadd.f32 1e-05, %v1318_v20 }
 0x3f9   : > { %v1299_v23 = vpop.xlane.xlu1 %1298  ;;  %v1302_v24 = vpop.xlane.xlu0 %1301 }
 0x3fa   : > { %2324 = vrsqrt.f32 %v1326_v21  ;;  %v1319_v25 = vmul.f32 0.03125, %v1299_v23  ;;  %v1320_v27 = vmul.f32 0.03125, %v1302_v24 }
 0x3fc   : > { %v1327_v30 = vadd.f32 1e-05, %v1319_v25  ;;  %v1328_v31 = vadd.f32 1e-05, %v1320_v27 }
 0x3fd   : > { %v1305_v32 = vpop.xlane.xlu1 %1304  ;;  %v1308_v33 = vpop.xlane.xlu0 %1307 }
 0x3fe   : > { %2326 = vrsqrt.f32 %v1327_v30  ;;  %v1321_v34 = vmul.f32 0.03125, %v1305_v32  ;;  %v1322_v35 = vmul.f32 0.03125, %v1308_v33  ;;  %v2312_v32 = vld [vmem:[%s3051_s11 + $0x20] sm:$0xff]   ;;  %v2313_v33 = vld [vmem:[%s3051_s11 + $0x28] sm:$0xff]  }
 0x3ff   : > { %2328 = vrsqrt.f32 %v1328_v31 }
 0x400   : > { %v1329_v36 = vadd.f32 1e-05, %v1321_v34  ;;  %v1330_v37 = vadd.f32 1e-05, %v1322_v35  ;;  %v2314_v34 = vld [vmem:[%s3051_s11 + $0x30] sm:$0xff]   ;;  %v2315_v35 = vld [vmem:[%s3051_s11 + $0x38] sm:$0xff]  }
 0x401   : > { %v1311_v40 = vpop.xlane.xlu1 %1310  ;;  %v1314_v41 = vpop.xlane.xlu0 %1313 }
 0x402   : > { %2330 = vrsqrt.f32 %v1329_v36  ;;  %v1323_v42 = vmul.f32 0.03125, %v1311_v40  ;;  %v1324_v43 = vmul.f32 0.03125, %v1314_v41  ;;  %v2075_v36 = vld [vmem:[%s3050_s10] ss:$0 sm:$0xff] }
 0x403   : > { %2332 = vrsqrt.f32 %v1330_v37 }
 0x404   : > { %v2325_v44 = vpop.eup %2324  ;;  %v1331_v47 = vadd.f32 1e-05, %v1323_v42  ;;  %v1332_v48 = vadd.f32 1e-05, %v1324_v43 }
 0x405   : > { %v1342_v49 = vmul.f32 %v2325_v44, %v2772_v39  ;;  %v1317_v50 = vpop.xlane.xlu1 %1316  ;;  %v2074_v39 = vld [vmem:[%s3048_s8] ss:$0 sm:$0xff] }
 0x406   : > { %2334 = vrsqrt.f32 %v1331_v47  ;;  %v1325_v52 = vmul.f32 0.03125, %v1317_v50 }
 0x407   : > { %2336 = vrsqrt.f32 %v1332_v48  ;;  %v1356_v58 = vmul.f32 %v2073_v51, %v1342_v49 }
 0x408   : > { %v2327_v53 = vpop.eup %2326  ;;  %v1333_v55 = vadd.f32 1e-05, %v1325_v52 }
 0x409   : > { %v2329_v56 = vpop.eup %2328  ;;  %v1343_v57 = vmul.f32 %v2327_v53, %v2780_v46  ;;  %v1370_v4 = vadd.f32 %v2074_v39, %v1356_v58 }
 0x40a   : > { %v1344_v60 = vmul.f32 %v2329_v56, %v2769_v38  ;;  %2338 = vrsqrt.f32 %v1333_v55 }
 0x40b   : > { %v1357_v61 = vmul.f32 %v2073_v51, %v1343_v57 }
 0x40c   : > { %v2331_v62 = vpop.eup %2330  ;;  %v1358_v2 = vmul.f32 %v2073_v51, %v1344_v60 }
 0x40d   : > { %v2333_v63 = vpop.eup %2332  ;;  %v1345_v3 = vmul.f32 %v2331_v62, %v2777_v45  ;;  %v1371_v9 = vadd.f32 %v2074_v39, %v1357_v61 }
 0x40e   : > { %v1346_v11 = vmul.f32 %v2333_v63, %v2790_v54  ;;  %v1372_v15 = vadd.f32 %v2074_v39, %v1358_v2 }
 0x40f   : > { %v1359_v12 = vmul.f32 %v2073_v51, %v1345_v3  ;;  %v1378_v46 = vpack.c.bf16 %v1371_v9, %v1370_v4 }
 0x410   : > { %v2335_v13 = vpop.eup %2334  ;;  %v1360_v17 = vmul.f32 %v2073_v51, %v1346_v11 }
 0x411   : > { %v2337_v14 = vpop.eup %2336  ;;  %v1347_v38 = vmul.f32 %v2335_v13, %v2795_v59  ;;  %2190 = vmatprep.mubr.msk.bf16.mxu1 %vm1109_vm2, %v1378_v46  ;;  %v1373_v16 = vadd.f32 %v2074_v39, %v1359_v12 }
 0x412   : > { %v1348_v18 = vmul.f32 %v2337_v14, %v2801_v0  ;;  %v1374_v54 = vadd.f32 %v2074_v39, %v1360_v17  ;;  %v2310_v0 = vld [vmem:[%s3051_s11 + $0x10] sm:$0xff]  }
 0x413   : > { %v1379_v19 = vpack.c.bf16 %v1373_v16, %v1372_v15  ;;  %v1361_v20 = vmul.f32 %v2073_v51, %v1347_v38  ;;  %2202 = vmatprep.subr.bf16.mxu0 %v2310_v0 }
 0x414   : > { %v2339_v45 = vpop.eup %2338  ;;  %v1362_v24 = vmul.f32 %v2073_v51, %v1348_v18  ;;  %2203 = vmatpush3.bf16.msra.mxu0 %v2310_v0 }
 0x415   : > { %v1349_v21 = vmul.f32 %v2339_v45, %v2807_v7  ;;  %2191 = vmatmul.mubr.msk.bf16.vlgmr.msra.gmra.mrb[8].mxu1 %vm1109_vm2, %v1379_v19  ;;  %v1375_v23 = vadd.f32 %v2074_v39, %v1361_v20  ;;  %v2311_v7 = vld [vmem:[%s3051_s11 + $0x18] sm:$0xff]  }
 0x416   : > { %v1376_v59 = vadd.f32 %v2074_v39, %v1362_v24  ;;  %2204 = vmatprep.subr.bf16.mxu0 %v2311_v7 }
 0x417   : > { %v1380_v25 = vpack.c.bf16 %v1375_v23, %v1374_v54  ;;  %v1363_v27 = vmul.f32 %v2073_v51, %v1349_v21 }
 0x418   : > { %2205 = vmatpush3.bf16.msra.mxu0 %v2311_v7 }
 0x419   : > { %2194 = vmatprep.mubr.msk.bf16.mxu1 %vm1109_vm2, %v1380_v25  ;;  %v1377_v30 = vadd.f32 %v2074_v39, %v1363_v27  ;;  %2206 = vmatprep.subr.bf16.mxu0 %v2312_v32 }
 0x41b   : > { %v1381_v31 = vpack.c.bf16 %v1377_v30, %v1376_v59 }
 0x41c   : > { %2207 = vmatpush3.bf16.msra.mxu0 %v2312_v32 }
 0x41d   : > { %2195 = vmatmul.mubr.msk.bf16.gmra.mrb[12].mxu1 %vm1109_vm2, %v1381_v31  ;;  %2208 = vmatprep.subr.bf16.mxu0 %v2313_v33 }
 0x41e   : > { %2230 = vmatprep.mubr.msk.bf16.mxu1 %vm2485_vm1, %v2484_v6 }
 0x420   : > { %2209 = vmatpush3.bf16.msra.mxu0 %v2313_v33 }
 0x421   : > { %2210 = vmatprep.subr.bf16.mxu0 %v2314_v34 }
 0x424   : > { %2211 = vmatpush3.bf16.msra.mxu0 %v2314_v34 }
 0x425   : > { %2212 = vmatprep.subr.bf16.mxu0 %v2315_v35 }
 0x428   : > { %2213 = vmatpush3.bf16.msra.mxu0 %v2315_v35 }
 0x4e8   : > { %v2192_v37 = vpop.f32.mrb[8].mxu1 }
 0x4e9   : > { %v1460_v40 = vadd.f32 %v2192_v37, %v2075_v36  ;;  %v1451_v41 = vpop.f32.mrb[9].mxu1 }
 0x4ea   : > { %v1452_v42 = vadd.f32 %v2075_v36, %v1451_v41  ;;  %v2193_v43 = vpop.f32.mrb[10].mxu1 }
 0x4eb   : > { %v1492_v44 = vmul.f32 0.70710677, %v1460_v40  ;;  %v1463_v47 = vadd.f32 %v2193_v43, %v2075_v36  ;;  %v1454_v48 = vpop.f32.mrb[11].mxu1  ;;  %v1484_v14 = vmul.f32 0.5, %v1460_v40 }
 0x4ec   : > { %v1490_v49 = vmul.f32 0.70710677, %v1452_v42  ;;  %v1455_v50 = vadd.f32 %v2075_v36, %v1454_v48  ;;  %v1482_v16 = vmul.f32 0.5, %v1452_v42 }
 0x4ed   : > { %2340 = verf.f32 %v1492_v44  ;;  %v1493_v51 = vmul.f32 0.70710677, %v1463_v47  ;;  %v1485_v38 = vmul.f32 0.5, %v1463_v47  ;;  %v2082_v44 = vld [vmem:[%s3052_s12] ss:$0 sm:$0xff] }
 0x4ee   : > { %2342 = verf.f32 %v1490_v49  ;;  %v1491_v52 = vmul.f32 0.70710677, %v1455_v50  ;;  %v1483_v17 = vmul.f32 0.5, %v1455_v50 }
 0x4ef   : > { %2344 = verf.f32 %v1493_v51 }
 0x4f0   : > { %2346 = verf.f32 %v1491_v52  ;;  %v2196_v53 = vpop.f32.mrb[12].mxu1 }
 0x4f1   : > { %v1476_v55 = vadd.f32 %v2196_v53, %v2075_v36  ;;  %v1467_v56 = vpop.f32.mrb[13].mxu1 }
 0x4f2   : > { %v1468_v57 = vadd.f32 %v2075_v36, %v1467_v56  ;;  %v2197_v58 = vpop.f32.mrb[14].mxu1 }
 0x4f3   : > { %v1496_v60 = vmul.f32 0.70710677, %v1476_v55  ;;  %v1479_v39 = vadd.f32 %v2197_v58, %v2075_v36  ;;  %v1470_v61 = vpop.f32.mrb[15].mxu1  ;;  %v1488_v0 = vmul.f32 0.5, %v1476_v55 }
 0x4f4   : > { %v1494_v62 = vmul.f32 0.70710677, %v1468_v57  ;;  %v1471_v63 = vadd.f32 %v2075_v36, %v1470_v61  ;;  %v1486_v33 = vmul.f32 0.5, %v1468_v57 }
 0x4f5   : > { %2348 = verf.f32 %v1496_v60  ;;  %v1497_v2 = vmul.f32 0.70710677, %v1479_v39  ;;  %v1489_v7 = vmul.f32 0.5, %v1479_v39 }
 0x4f6   : > { %2350 = verf.f32 %v1494_v62  ;;  %v1495_v3 = vmul.f32 0.70710677, %v1471_v63  ;;  %v1487_v34 = vmul.f32 0.5, %v1471_v63 }
 0x4f7   : > { %v2341_v4 = vpop.eup %2340  ;;  %2352 = verf.f32 %v1497_v2 }
 0x4f8   : > { %v2343_v9 = vpop.eup %2342  ;;  %v1508_v11 = vadd.f32 1.0, %v2341_v4  ;;  %2354 = verf.f32 %v1495_v3 }
 0x4f9   : > { %v2345_v12 = vpop.eup %2344  ;;  %v1506_v46 = vadd.f32 1.0, %v2343_v9 }
 0x4fa   : > { %v2347_v13 = vpop.eup %2346  ;;  %v1509_v15 = vadd.f32 1.0, %v2345_v12  ;;  %v1516_v19 = vmul.f32 %v1508_v11, %v1484_v14 }
 0x4fb   : > { %v1507_v18 = vadd.f32 1.0, %v2347_v13  ;;  %v1514_v45 = vmul.f32 %v1506_v46, %v1482_v16 }
 0x4fc   : > { %v1517_v20 = vmul.f32 %v1509_v15, %v1485_v38 }
 0x4fd   : > { %v1515_v21 = vmul.f32 %v1507_v18, %v1483_v17 }
 0x4fe   : > { %v1523_v54 = vpack.c.bf16 %v1517_v20, %v1516_v19 }
 0x4ff   : > { %v2349_v23 = vpop.eup %2348  ;;  %v1522_v24 = vpack.c.bf16 %v1515_v21, %v1514_v45 }
 0x500   : > { %v2351_v25 = vpop.eup %2350  ;;  %v1512_v27 = vadd.f32 1.0, %v2349_v23 }
 0x501   : > { %v2353_v59 = vpop.eup %2352  ;;  %v1510_v30 = vadd.f32 1.0, %v2351_v25  ;;  %2214 = vmatprep.mubr.bf16.mxu0 %v1522_v24 }
 0x502   : > { %v2355_v31 = vpop.eup %2354  ;;  %v1513_v32 = vadd.f32 1.0, %v2353_v59  ;;  %2215 = vmatmul.mubr.bf16.vlgmr.msra.gmra.mrb[12].mxu0 %v1523_v54  ;;  %v1520_v36 = vmul.f32 %v1512_v27, %v1488_v0 }
 0x503   : > { %v1511_v35 = vadd.f32 1.0, %v2355_v31  ;;  %v1518_v40 = vmul.f32 %v1510_v30, %v1486_v33 }
 0x504   : > { %v1521_v37 = vmul.f32 %v1513_v32, %v1489_v7 }
 0x505   : > { %v1519_v41 = vmul.f32 %v1511_v35, %v1487_v34 }
 0x506   : > { %v1525_v42 = vpack.c.bf16 %v1521_v37, %v1520_v36 }
 0x507   : > { %v1524_v43 = vpack.c.bf16 %v1519_v41, %v1518_v40 }
 0x509   : > { %2218 = vmatprep.mubr.bf16.mxu0 %v1524_v43 }
 0x50a   : > { %2219 = vmatmul.mubr.bf16.gmra.mrb[16].mxu0 %v1525_v42 }
 0x5d5   : > { %v2216_v47 = vpop.f32.mrb[12].mxu0 }
 0x5d6   : > { %v1631_v48 = vpop.f32.mrb[13].mxu0  ;;  %v1640_v49 = vadd.f32 %v2216_v47, %v2082_v44 }
 0x5d7   : > { %v1632_v50 = vadd.f32 %v2082_v44, %v1631_v48  ;;  %v2217_v51 = vpop.f32.mrb[14].mxu0 }
 0x5d8   : > { %v1634_v52 = vpop.f32.mrb[15].mxu0  ;;  %v1643_v53 = vadd.f32 %v2217_v51, %v2082_v44  ;;  %v1664_v60 = vadd.f32 %v1640_v49, %v2731_v1 }
 0x5d9   : > { %v1635_v55 = vadd.f32 %v2082_v44, %v1634_v52  ;;  %v1662_v56 = vadd.f32 %v1632_v50, %v2734_v5 }
 0x5da   : > { %v1665_v62 = vadd.f32 %v1643_v53, %v2736_v8  ;;  %v1678_v9 = vsel %vm1109_vm2, %v1664_v60, 0.0 }
 0x5db   : > { %v1672_v57 = vsel %vm1109_vm2, %v1662_v56, 0.0  ;;  %v1663_v58 = vadd.f32 %v1635_v55, %v2740_v10 }
 0x5dc   : > { %1673 = vadd.xlane.f32.xlu0 %v1672_v57  ;;  %v1681_v10 = vsel %vm1109_vm2, %v1665_v62, 0.0  ;;  %v1809_v57 = vld [vmem:[#allocation3] sm:$0x1] }
 0x5dd   : > { %v2220_v39 = vpop.f32.mrb[16].mxu0  ;;  %v1675_v61 = vsel %vm1109_vm2, %v1663_v58, 0.0 }
 0x5de   : > { %v1647_v63 = vpop.f32.mrb[17].mxu0  ;;  %1676 = vadd.xlane.f32.xlu1 %v1675_v61  ;;  %v1656_v2 = vadd.f32 %v2220_v39, %v2082_v44 }
 0x5df   : > { %v1648_v3 = vadd.f32 %v2082_v44, %v1647_v63  ;;  %v2221_v4 = vpop.f32.mrb[18].mxu0 }
 0x5e0   : > { %v1650_v5 = vpop.f32.mrb[19].mxu0  ;;  %1679 = vadd.xlane.f32.xlu0 %v1678_v9  ;;  %v1659_v11 = vadd.f32 %v2221_v4, %v2082_v44  ;;  %v1668_v13 = vadd.f32 %v1656_v2, %v2751_v22 }
 0x5e1   : > { %v1651_v12 = vadd.f32 %v2082_v44, %v1650_v5  ;;  %v1666_v1 = vadd.f32 %v1648_v3, %v2754_v26 }
 0x5e2   : > { %1682 = vadd.xlane.f32.xlu1 %v1681_v10  ;;  %v1669_v38 = vadd.f32 %v1659_v11, %v2756_v28  ;;  %v1690_v15 = vsel %vm1109_vm2, %v1668_v13, 0.0 }
 0x5e3   : > { %v1684_v46 = vsel %vm1109_vm2, %v1666_v1, 0.0  ;;  %v1667_v8 = vadd.f32 %v1651_v12, %v2758_v29 }
 0x5e4   : > { %1685 = vadd.xlane.f32.xlu0 %v1684_v46  ;;  %v1693_v16 = vsel %vm1109_vm2, %v1669_v38, 0.0 }
 0x5e5   : > { %v1687_v14 = vsel %vm1109_vm2, %v1667_v8, 0.0 }
 0x5e6   : > { %1688 = vadd.xlane.f32.xlu1 %v1687_v14 }
 0x5e8   : > { %1691 = vadd.xlane.f32.xlu0 %v1690_v15 }
 0x5ea   : > { %1694 = vadd.xlane.f32.xlu1 %v1693_v16 }
 0x669   : > { %v1674_v26 = vpop.xlane.xlu0 %1673 }
 0x66a   : > { %v1696_v17 = vmul.f32 0.03125, %v1674_v26 }
 0x66b   : > { %v1677_v18 = vpop.xlane.xlu1 %1676 }
 0x66c   : > { %v2889_v19 = vsub.f32 %v1662_v56, %v1696_v17  ;;  %v1697_v29 = vmul.f32 0.03125, %v1677_v18  ;;  %v2091_v18 = vld [vmem:[%s3053_s13] ss:$0 sm:$0xff] }
 0x66d   : > { %v1680_v20 = vpop.xlane.xlu0 %1679 }
 0x66e   : > { %v2891_v22 = vsub.f32 %v1663_v58, %v1697_v29  ;;  %v1698_v45 = vmul.f32 0.03125, %v1680_v20  ;;  %v1712_v28 = vmul.f32 %v2889_v19, %v2889_v19  ;;  %v2486_v58 = vmov 0  }
 0x66f   : > { %v1683_v21 = vpop.xlane.xlu1 %1682  ;;  %2301 = vset.pattern.permute.xlu0 %v2486_v58 }
 0x670   : > { %v2895_v54 = vsub.f32 %v1664_v60, %v1698_v45  ;;  %v1699_v23 = vmul.f32 0.03125, %v1683_v21  ;;  %v1720_v24 = vsel %vm1109_vm2, %v1712_v28, 0.0  ;;  %v1713_v25 = vmul.f32 %v2891_v22, %v2891_v22 }
 0x671   : > { %1721 = vadd.xlane.f32.xlu0 %v1720_v24  ;;  %v1686_v27 = vpop.xlane.xlu0 %1685 }
 0x672   : > { %v2900_v59 = vsub.f32 %v1665_v62, %v1699_v23  ;;  %v1700_v30 = vmul.f32 0.03125, %v1686_v27  ;;  %v1723_v31 = vsel %vm1109_vm2, %v1713_v25, 0.0  ;;  %v1714_v0 = vmul.f32 %v2895_v54, %v2895_v54  ;;  %v2092_v25 = vld [vmem:[%s3054_s14] ss:$0 sm:$0xff] }
 0x673   : > { %1724 = vadd.xlane.f32.xlu1 %v1723_v31  ;;  %v1689_v7 = vpop.xlane.xlu1 %1688 }
 0x674   : > { %v2905_v32 = vsub.f32 %v1666_v1, %v1700_v30  ;;  %v1701_v33 = vmul.f32 0.03125, %v1689_v7  ;;  %v1726_v34 = vsel %vm1109_vm2, %v1714_v0, 0.0  ;;  %v1715_v35 = vmul.f32 %v2900_v59, %v2900_v59 }
 0x675   : > { %1727 = vadd.xlane.f32.xlu0 %v1726_v34  ;;  %v1692_v36 = vpop.xlane.xlu0 %1691 }
 0x676   : > { %v2910_v37 = vsub.f32 %v1667_v8, %v1701_v33  ;;  %v1702_v40 = vmul.f32 0.03125, %v1692_v36  ;;  %v1729_v41 = vsel %vm1109_vm2, %v1715_v35, 0.0  ;;  %v1716_v42 = vmul.f32 %v2905_v32, %v2905_v32 }
 0x677   : > { %1730 = vadd.xlane.f32.xlu1 %v1729_v41  ;;  %v1695_v43 = vpop.xlane.xlu1 %1694 }
 0x678   : > { %v2915_v44 = vsub.f32 %v1668_v13, %v1702_v40  ;;  %v1703_v47 = vmul.f32 0.03125, %v1695_v43  ;;  %v1732_v48 = vsel %vm1109_vm2, %v1716_v42, 0.0  ;;  %v1717_v49 = vmul.f32 %v2910_v37, %v2910_v37 }
 0x679   : > { %1733 = vadd.xlane.f32.xlu0 %v1732_v48 }
 0x67a   : > { %v2920_v50 = vsub.f32 %v1669_v38, %v1703_v47  ;;  %v1735_v51 = vsel %vm1109_vm2, %v1717_v49, 0.0  ;;  %v1718_v52 = vmul.f32 %v2915_v44, %v2915_v44 }
 0x67b   : > { %1736 = vadd.xlane.f32.xlu1 %v1735_v51 }
 0x67c   : > { %v1738_v53 = vsel %vm1109_vm2, %v1718_v52, 0.0  ;;  %v1719_v55 = vmul.f32 %v2920_v50, %v2920_v50 }
 0x67d   : > { %1739 = vadd.xlane.f32.xlu0 %v1738_v53 }
 0x67e   : > { %v1741_v56 = vsel %vm1109_vm2, %v1719_v55, 0.0 }
 0x67f   : > { %1742 = vadd.xlane.f32.xlu1 %v1741_v56 }
 0x693   : > { %1812 = vperm.xlu0 %2301, %v1809_v57  }
 0x6fe   : > { %v1722_v60 = vpop.xlane.xlu0 %1721 }
 0x6ff   : > { %v1744_v39 = vmul.f32 0.03125, %v1722_v60 }
 0x700   : > { %v1725_v61 = vpop.xlane.xlu1 %1724 }
 0x701   : > { %v1752_v62 = vadd.f32 1e-05, %v1744_v39  ;;  %v1745_v63 = vmul.f32 0.03125, %v1725_v61 }
 0x702   : > { %v1728_v2 = vpop.xlane.xlu0 %1727 }
 0x703   : > { %2356 = vrsqrt.f32 %v1752_v62  ;;  %v1753_v3 = vadd.f32 1e-05, %v1745_v63  ;;  %v1746_v4 = vmul.f32 0.03125, %v1728_v2 }
 0x704   : > { %v1731_v9 = vpop.xlane.xlu1 %1730 }
 0x705   : > { %2358 = vrsqrt.f32 %v1753_v3  ;;  %v1754_v5 = vadd.f32 1e-05, %v1746_v4  ;;  %v1747_v11 = vmul.f32 0.03125, %v1731_v9 }
 0x706   : > { %v1734_v12 = vpop.xlane.xlu0 %1733 }
 0x707   : > { %2360 = vrsqrt.f32 %v1754_v5  ;;  %v1755_v10 = vadd.f32 1e-05, %v1747_v11  ;;  %v1748_v1 = vmul.f32 0.03125, %v1734_v12 }
 0x708   : > { %v1737_v46 = vpop.xlane.xlu1 %1736 }
 0x709   : > { %2362 = vrsqrt.f32 %v1755_v10  ;;  %v1756_v8 = vadd.f32 1e-05, %v1748_v1  ;;  %v1749_v13 = vmul.f32 0.03125, %v1737_v46 }
 0x70a   : > { %v1740_v14 = vpop.xlane.xlu0 %1739 }
 0x70b   : > { %v1757_v38 = vadd.f32 1e-05, %v1749_v13  ;;  %2364 = vrsqrt.f32 %v1756_v8  ;;  %v1750_v26 = vmul.f32 0.03125, %v1740_v14 }
 0x70c   : > { %v1743_v15 = vpop.xlane.xlu1 %1742 }
 0x70d   : > { %v2357_v16 = vpop.eup %2356  ;;  %2366 = vrsqrt.f32 %v1757_v38  ;;  %v1751_v17 = vmul.f32 0.03125, %v1743_v15  ;;  %v1758_v24 = vadd.f32 1e-05, %v1750_v26 }
 0x70e   : > { %v1768_v29 = vmul.f32 %v2357_v16, %v2889_v19 }
 0x70f   : > { %v2359_v20 = vpop.eup %2358  ;;  %v1759_v45 = vadd.f32 1e-05, %v1751_v17 }
 0x710   : > { %v1769_v28 = vmul.f32 %v2359_v20, %v2891_v22  ;;  %v1782_v21 = vmul.f32 %v2091_v18, %v1768_v29 }
 0x711   : > { %v2361_v23 = vpop.eup %2360  ;;  %2368 = vrsqrt.f32 %v1759_v45 }
 0x712   : > { %v1783_v27 = vmul.f32 %v2091_v18, %v1769_v28  ;;  %v1770_v30 = vmul.f32 %v2361_v23, %v2895_v54  ;;  %v1796_v0 = vadd.f32 %v2092_v25, %v1782_v21  ;;  %2370 = vrsqrt.f32 %v1758_v24 }
 0x713   : > { %v2363_v31 = vpop.eup %2362 }
 0x714   : > { %v1797_v7 = vadd.f32 %v2092_v25, %v1783_v27  ;;  %v1771_v19 = vmul.f32 %v2363_v31, %v2900_v59  ;;  %v1784_v22 = vmul.f32 %v2091_v18, %v1770_v30 }
 0x715   : > { %v2365_v33 = vpop.eup %2364 }
 0x716   : > { %v1805_v34 = vpack.c.bf16 %v1797_v7, %v1796_v0  ;;  %v1785_v35 = vmul.f32 %v2091_v18, %v1771_v19  ;;  %v1798_v54 = vadd.f32 %v2092_v25, %v1784_v22  ;;  %v1772_v43 = vmul.f32 %v2365_v33, %v2905_v32 }
 0x717   : > { %v2367_v36 = vpop.eup %2366 }
 0x718   : > { %v1823_v40 = vsel %vm1109_vm2, %v1805_v34, 0  ;;  %v1799_v41 = vadd.f32 %v2092_v25, %v1785_v35  ;;  %v1773_v42 = vmul.f32 %v2367_v36, %v2910_v37  ;;  %v1786_v49 = vmul.f32 %v2091_v18, %v1772_v43 }
 0x719   : > { %2223 = vmatpush3.bf16.xpose.msra.mxu1 %v1823_v40 }
 0x71a   : > { %2224 = vmatprep.subr.bf16.mxu1 %v2484_v6  ;;  %v1806_v47 = vpack.c.bf16 %v1799_v41, %v1798_v54  ;;  %v1787_v48 = vmul.f32 %v2091_v18, %v1773_v42  ;;  %v1800_v37 = vadd.f32 %v2092_v25, %v1786_v49 }
 0x71b   : > { %v2369_v59 = vpop.eup %2368 }
 0x71c   : > { %v2371_v51 = vpop.eup %2370  ;;  %v1826_v52 = vsel %vm1109_vm2, %v1806_v47, 0  ;;  %v1801_v53 = vadd.f32 %v2092_v25, %v1787_v48  ;;  %v1775_v55 = vmul.f32 %v2369_v59, %v2920_v50 }
 0x71d   : > { %v1774_v56 = vmul.f32 %v2371_v51, %v2915_v44  ;;  %v1804_v44 = vld [vmem:[%s3055_s15] sm:$0x1] }
 0x71e   : > { %v1807_v57 = vpack.c.bf16 %v1801_v53, %v1800_v37  ;;  %v1789_v32 = vmul.f32 %v2091_v18, %v1775_v55 }
 0x71f   : > { %v1788_v58 = vmul.f32 %v2091_v18, %v1774_v56 }
 0x720   : > { %v1829_v60 = vsel %vm1109_vm2, %v1807_v57, 0  ;;  %v1803_v39 = vadd.f32 %v2092_v25, %v1789_v32 }
 0x721   : > { %2225 = vmatpush3.bf16.xpose.msra.mxu1 %v1826_v52  ;;  %v1802_v50 = vadd.f32 %v2092_v25, %v1788_v58 }
 0x722   : > { %2226 = vmatprep.subr.bf16.mxu1 %v2484_v6 }
 0x723   : > { %v1808_v61 = vpack.c.bf16 %v1803_v39, %v1802_v50 }
 0x725   : > { %v1832_v62 = vsel %vm1109_vm2, %v1808_v61, 0 }
 0x729   : > { %2227 = vmatpush3.bf16.xpose.msra.mxu1 %v1829_v60 }
 0x72a   : > { %2228 = vmatprep.subr.bf16.mxu1 %v2484_v6 }
 0x731   : > { %2229 = vmatpush3.bf16.xpose.msra.mxu1 %v1832_v62 }
 0x738   : > { %2231 = vmatmul.mubr.msk.bf16.vlgmr.msra.gmra.mrb[16].mxu1 %vm1109_vm2, %v1804_v44 }
 0x739   : > { %2385 = shalt.err (!%p2382_p5)
}
 0x73a   : > { %s2386_s25 = scalar_lea.hbm %s2961_s26, 512  ;;  %s2390_s2 = scalar_lea.hbm %s3058_s18, 1024 }
 0x73b   : > { %p2387_p6 = scmp.ne.s32.totalorder %s2961_s26, %s2386_s25  ;;  %p2391_p10 = scmp.lt.u32.totalorder %s2961_s26, %s3058_s18 }
 0x73c   : > { %p2392_p11 = scmp.lt.u32.totalorder %s2390_s2, %s2386_s25  ;;  %p2394_p13 = scmp.lt.u32.totalorder %s2386_s25, %s2961_s26 }
 0x73d   : > { %p2388_p7 = pnand %p2387_p6, %p2629_p4 }
 0x73e   : > { %p2393_p12 = por %p2392_p11, %p2391_p10 }
 0x73f   : > { %p2389_p9 = pneg %p2388_p7 }
 0x740   : > { %p2395_p0 = por %p2394_p13, %p2393_p12 }
 0x742   : > { %p2396_p1 = pnand %p2395_p0, %p2389_p9 }
 0x744   : > { %2399 = shalt.err (!%p2396_p1)
}
 0x745   : > { %s2488_s16 = smov 128   ;;  %s2489_s0 = smov 8   ;;  %v1815_v6 = vlaneseq  ;;  %v1813_v3 = vpop.permute.xlu0 %1812  ;;  %vm1874_vm3 = vcmask 516096  }
 0x746   : > { %s3078_s21 = scalar_lea.sflag [#allocation7], %s2681_s24  ;;  %s2095_s28 = sshll.u32 %s2474_s19, 4 }
 0x747   : > { %2237 = dma.vmem_to_hbm [thread:$0]  (%p2629_p4), %s2956_s22, 512, %s2961_s26, %s3078_s21, %s2488_s16, %s2488_s16, %s2489_s0   ;;  %v1816_v63 = vshrl.u32 %v1815_v6, 7 }
 0x748   : > { %s639_s25 = scalar_lea.vmem [#allocation4], %s2681_s24  ;;  %s2992_s3 = scalar_lea.hbm %s3057_s17, %s2095_s28 }
 0x749   : > { %v1817_v2 = vsub.s32 0, %v1816_v63  ;;  %s1895_s27 = sshll.u32 %s639_s25, 4  ;;  %s1877_s19 = scalar_lea.sflag [#allocation5], %s2681_s24  ;;  %s2994_s27 = int_to_ptr.vmem [resolvable:$true] %s1895_s27 }
 0x74a   : > { %s2400_s22 = scalar_lea.vmem %s2994_s27, 16  ;;  %s2490_s26 = smov [#allocation4]  }
 0x74b   : > { %v1818_v4 = vrot.slane %v1813_v3, %v1817_v2  ;;  %p2401_p2 = scmp.ne.s32.totalorder %s2994_s27, %s2400_s22  ;;  %s2404_s16 = sshll.u32 %s2490_s26, 4  ;;  %s2405_s16 = int_to_ptr.vmem [resolvable:$false] %s2404_s16 }
 0x74c   : > { %s2406_s0 = scalar_lea.vmem %s2405_s16, 32  ;;  %p2407_p6 = scmp.lt.s32.totalorder %s2994_s27, %s2405_s16 }
 0x74d   : > { %p2402_p3 = pnand %p2401_p2, %p2629_p4  ;;  %p2408_p7 = scmp.lt.s32.totalorder %s2406_s0, %s2400_s22 }
 0x74f   : > { %p2403_p5 = pneg %p2402_p3  ;;  %p2409_p9 = por %p2408_p7, %p2407_p6 }
 0x751   : > { %p2410_p10 = pnand %p2409_p9, %p2403_p5 }
 0x80b   : > { %v1868_v9 = vpop.f32.mrb[16].mxu1 }
 0x80c   : > { %v1869_v5 = vadd.f32 %v1868_v9, %v1818_v4  ;;  %v2232_v11 = vpop.f32.mrb[17].mxu1 }
 0x80d   : > { %v1871_v12 = vpop.f32.mrb[18].mxu1 }
 0x80e   : > { %v2233_v10 = vpop.f32.mrb[19].mxu1  ;;  %1875 = vst.msk [vmem:[%s639_s25] sm:$0x1] %vm1874_vm3, %v1869_v5 }
 0x80f   : > { %2413 = shalt.err (!%p2410_p10)
}
 0x810   : > { %s2414_s24 = scalar_lea.hbm %s2992_s3, 16  ;;  %s2418_s25 = scalar_lea.hbm %s3057_s17, 32 }
 0x811   : > { %p2415_p11 = scmp.ne.s32.totalorder %s2992_s3, %s2414_s24  ;;  %p2419_p0 = scmp.lt.u32.totalorder %s2992_s3, %s3057_s17 }
 0x812   : > { %p2420_p1 = scmp.lt.u32.totalorder %s2418_s25, %s2414_s24  ;;  %p2422_p3 = scmp.lt.u32.totalorder %s2414_s24, %s2992_s3 }
 0x813   : > { %p2416_p12 = pnand %p2415_p11, %p2629_p4 }
 0x814   : > { %p2421_p2 = por %p2420_p1, %p2419_p0 }
 0x815   : > { %p2417_p13 = pneg %p2416_p12 }
 0x816   : > { %p2423_p5 = por %p2422_p3, %p2421_p2 }
 0x818   : > { %p2424_p6 = pnand %p2423_p5, %p2417_p13 }
 0x81a   : > { %2427 = shalt.err (!%p2424_p6)
}
 0x81b   : > { %2236 = dma.vmem_to_hbm [thread:$0]  (%p2629_p4), %s2994_s27, 16, %s2992_s3, %s1877_s19  }
 0x81c PF: > { %p2247_p7 = scmp.ge.s32.totalorder %s2482_s20, 2  ;;  %s1923_s26 = sand.u32 1, %s2462_s29  }
 0x81d   : > { %s1924_s16 = scalar_lea.sflag [#allocation5], %s1923_s26 }
 0x81e   : > { %p2241_p9 = pnand %p2247_p7, %p2636_p8 }
 0x820   : > { %2453 = dma.done.wait (!%p2241_p9), %s1924_s16, 16  }
 0x821   : > { %2455 = vsyncadd (!%p2241_p9), %s1924_s16, 4294967280  ;;  %s1932_s0 = scalar_lea.sflag [#allocation7], %s1923_s26 }
 0x822   : > { %2457 = dma.done.wait (!%p2241_p9), %s1932_s0, 512  }
 0x823   : > { %2459 = vsyncadd (!%p2241_p9), %s1932_s0, 4294966784  ;;  %s37_s20 = sadd.s32 1, %s2482_s20   ;;  %s3080_s23 = sld [smem:[#allocation10_spill]] }
 0x824   : > { %p34_p10 = scmp.ge.s32.totalorder %s37_s20, 4   ;;  %s3081_s0 = sld [smem:[#allocation14_spill]] }
 0x825   : > { %s3082_s19 = sld [smem:[#allocation11_spill]]  ;;  %s3083_s1 = sld [smem:[#allocation12_spill]] }
 0x826   : > { %s3084_s29 = smov %s2466_s30  ;;  %36 = sbr.rel (!%p34_p10) target bundleno = 11 (0xb), region = 150 }
 0x829   : > { %s3085_s30 = smov %s3080_s23 }
 0x82d   :  { %1937 = vsyncpa [#allocation5], 1 }
 0x82e   :  { %1939 = vsyncpa [#allocation5 + $0x1], 1 }
 0x82f   :  { %1940 = vsyncpa [#allocation7], 1 }
 0x830   :  { %1942 = vsyncpa [#allocation7 + $0x1], 1 }

// kernel: tpu_custom_call.1
= control target key start
LH: loop header
LB: loop body
LE: loop exit
PB: predicated region body
PF: predicated region fallthrough
CT: control target
= control target key end

     0   :  { %s3040_s0 = inlined_call_operand.vmem [shape: f32[2,4,8,8], index: 0, kind: input, shape index: {}]   ;;  %s3041_s1 = inlined_call_operand.vmem [shape: f32[8,8], index: 1, kind: input, shape index: {}]   ;;  %s3042_s2 = inlined_call_operand.vmem [shape: f32[1,8], index: 2, kind: input, shape index: {}]   ;;  %s3043_s3 = inlined_call_operand.vmem [shape: f32[4,8,32], index: 3, kind: input, shape index: {}]   ;;  %s3044_s4 = inlined_call_operand.vmem [shape: bf16[2,64,32], index: 4, kind: input, shape index: {}]   ;;  %s3045_s5 = inlined_call_operand.vmem [shape: f32[1,32], index: 5, kind: input, shape index: {}]   ;;  %s3046_s6 = inlined_call_operand.vmem [shape: f32[2,64,32], index: 6, kind: input, shape index: {}]   ;;  %s3047_s7 = inlined_call_operand.vmem [shape: f32[1,32], index: 7, kind: input, shape index: {}]   ;;  %s3048_s8 = inlined_call_operand.vmem [shape: f32[1,32], index: 8, kind: input, shape index: {}]   ;;  %s3049_s9 = inlined_call_operand.vmem [shape: bf16[32,128], index: 9, kind: input, shape index: {}]   ;;  %s3050_s10 = inlined_call_operand.vmem [shape: f32[1,128], index: 10, kind: input, shape index: {}]   ;;  %s3051_s11 = inlined_call_operand.vmem [shape: bf16[128,32], index: 11, kind: input, shape index: {}]   ;;  %s3052_s12 = inlined_call_operand.vmem [shape: f32[1,32], index: 12, kind: input, shape index: {}]   ;;  %s3053_s13 = inlined_call_operand.vmem [shape: f32[1,32], index: 13, kind: input, shape index: {}]   ;;  %s3054_s14 = inlined_call_operand.vmem [shape: f32[1,32], index: 14, kind: input, shape index: {}]   ;;  %s3055_s15 = inlined_call_operand.vmem [shape: bf16[1,32], index: 15, kind: input, shape index: {}]   ;;  %s3056_s16 = inlined_call_operand.<no memory space> [shape: f32[1,1], index: 16, kind: input, shape index: {}]   ;;  %s3057_s17 = inlined_call_operand.hbm [shape: f32[2,1,64], index: 17, kind: output, shape index: {0}]   ;;  %s3058_s18 = inlined_call_operand.hbm [shape: f32[2,4,8,8], index: 18, kind: output, shape index: {1}]  }
   0x1   :  { %3063 = sst [smem:[#allocation15_spill]] %s3040_s0  ;;  %v24_v0 = vstv %s3056_s16 }
   0x2   :  { %3064 = sst [smem:[#allocation16_spill]] %s3041_s1  ;;  %25 = vst [vmem:[#allocation3] sm:$0x1] %v24_v0 }
   0x3   :  { %3065 = sst [smem:[#allocation17_spill]] %s3042_s2 }
   0x4   :  { %3066 = sst [smem:[#allocation18_spill]] %s3043_s3 }
   0x5   :  { %26 = vsyncpa [#allocation5], 0 }
   0x6   :  { %28 = vsyncpa [#allocation5 + $0x1], 0 }
   0x7   :  { %29 = vsyncpa [#allocation7], 0 }
   0x8   :  { %31 = vsyncpa [#allocation7 + $0x1], 0  ;;  %s2589_s29 = smov 0   ;;  %s2591_s30 = smov 0  }
   0x9   :  { %s2593_s0 = smov 0   ;;  %s2595_s19 = smov 0  }
   0xa   :  { %s2597_s1 = smov 0   ;;  %s2599_s20 = smov 0  }
   0xb LB: > { %3067 = sst [smem:[#allocation10_spill]] %s2470_s0  ;;  %s2043_s16 = sadd.s32 4294967295, %s2482_s20   ;;  %s2482_s20 = sphi %s2599_s20, %s37_s20   ;;  %s2478_s1 = sphi %s2597_s1, %s3083_s1   ;;  %s2474_s19 = sphi %s2595_s19, %s3082_s19   ;;  %s2470_s0 = sphi %s2593_s0, %s3081_s0   ;;  %s2466_s30 = sphi %s2591_s30, %s3085_s30   ;;  %s2462_s29 = sphi %s2589_s29, %s3084_s29  }
   0xc   : > { %3068 = sst [smem:[#allocation11_spill]] %s2478_s1  ;;  %s2044_s21 = sadd.s32 4294967294, %s2482_s20  }
   0xd   : > { %s49_s22 = sadd.s32 1, %s2478_s1  ;;  %s434_s2 = sadd.s32 1, %s2470_s0 }
   0xe   : > { %p51_p0 = scmp.ge.s32.totalorder %s49_s22, 2  ;;  %p444_p1 = scmp.ne.s32.totalorder %s2470_s0, %s2466_s30 }
   0xf   : > { %p445_p2 = scmp.eq.s32.totalorder %s2043_s16, 1  ;;  %p450_p3 = scmp.ne.s32.totalorder %s2466_s30, %s2462_s29 }
  0x10   : > { %s3087_s22 = smov (%p51_p0, %s49_s22), 0  ;;  %p451_p5 = scmp.eq.s32.totalorder %s2044_s21, 1 }
  0x11   : > { %3069 = sst [smem:[#allocation12_spill]] %s3087_s22  ;;  %p2629_p4 = por %p445_p2, %p444_p1 }
  0x12   : > { %s429_s24 = ssub.s32 %s2478_s1, %s3087_s22  ;;  %p2047_p6 = scmp.ge.s32.totalorder %s2482_s20, 1 }
  0x13   : > { %p432_p7 = scmp.eq.s32.totalorder %s429_s24, 0  ;;  %p2636_p8 = por %p451_p5, %p450_p3 }
  0x14   : > { %p571_p9 = scmp.lt.s32.totalorder %s2482_s20, 3 }
  0x15   : > { %s3071_s25 = scalar_select %p2636_p8, 1, 0 }
  0x16   : > { %s2642_s26 = scalar_select %p432_p7, %s2470_s0, %s434_s2  }
  0x17   : > { %3072 = sst [smem:[#allocation13_spill]] %s3071_s25  ;;  %p572_p10 = pnand %p2047_p6, %p571_p9 }
  0x18   : > { %3073 = sst [smem:[#allocation14_spill]] %s2642_s26  ;;  %s3074_s16 = sld [smem:[#allocation16_spill]] (!%p572_p10)  ;;  %vm689_vm0 = vcmask (!%p572_p10), 64512   ;;  %v2484_v6 = vmov (!%p572_p10), 0.0   ;;  %vm2485_vm1 = vmmov (!%p572_p10), 0   ;;  %vm1109_vm2 = vcmask (!%p572_p10), 261120  }
  0x19   : > { %575 = sbr.rel (%p572_p10) target bundleno = 2076 (0x81c), region = 88  ;;  %p647_p11 = scmp.lt.s32.totalorder (!%p572_p10), %s2474_s19, 1  ;;  %v2064_v56 = vld [vmem:[%s3045_s5] ss:$0 sm:$0xff] (!%p572_p10) }
  0x1a   : > { %s3075_s1 = sld [smem:[#allocation15_spill]] (!%p572_p10)  ;;  %s3076_s3 = sld [smem:[#allocation18_spill]] (!%p572_p10) }
  0x1b   : > { %s2103_s25 = sshll.u32 (!%p572_p10), %s2474_s19, 9 }
  0x1e   : > { %v681_v1 = vld [vmem:[%s3074_s16] sm:$0xff] (!%p572_p10)  ;;  %s3077_s16 = sld [smem:[#allocation17_spill]] (!%p572_p10) }
  0x1f   : > { %2146 = vmatprep.subr.mxu0 (!%p572_p10), %v681_v1  ;;  %2234 = vmatprep.subr.mxu1 (!%p572_p10), %v681_v1 }
  0x20   : > { %2147 = vmatpush3.msra.mxu0 %v681_v1  ;;  %2235 = vmatpush3.msra.mxu1 %v681_v1  ;;  %s2649_s21 = scalar_select %p647_p11, %s2474_s19, 1  ;;  %v811_v7 = vld [vmem:[%s3076_s3] sm:$0xff]  ;;  %v813_v8 = vld [vmem:[%s3076_s3 + $0x10] sm:$0xff]  ;;  %v812_v37 = vld [vmem:[%s3076_s3 + $0x8] sm:$0xff] }
  0x21   : > { %2154 = vmatprep.subr.mxu1 %v2484_v6  ;;  %2164 = vmatprep.subr.mxu0 %v2484_v6  ;;  %v814_v39 = vld [vmem:[%s3076_s3 + $0x18] sm:$0xff] }
  0x22   : > { %s2100_s24 = sshll.u32 %s2649_s21, 5  ;;  %s2102_s28 = sshll.u32 %s2649_s21, 6 }
  0x23   : > { %s651_s26 = scalar_lea.vmem %s3075_s1, %s2100_s24  ;;  %s2658_s27 = scalar_lea.vmem %s3044_s4, %s2100_s24 }
  0x24   : > { %v677_v2 = vld [vmem:[%s651_s26] sm:$0xff]  ;;  %v679_v3 = vld [vmem:[%s651_s26 + $0x10] sm:$0xff]  ;;  %v678_v4 = vld [vmem:[%s651_s26 + $0x8] sm:$0xff]  ;;  %s2681_s24 = sand.u32 1, %s2466_s30   ;;  %s2723_s1 = scalar_lea.vmem %s3046_s6, %s2102_s28 }
  0x25   : > { %2148 = vmatprep.mubr.msk.f32.mxu0 %vm689_vm0, %v677_v2  ;;  %2151 = vmatprep.mubr.msk.f32.mxu1 %vm689_vm0, %v679_v3  ;;  %v680_v5 = vld [vmem:[%s651_s26 + $0x18] sm:$0xff]  ;;  %v2055_v9 = vld [vmem:[%s3077_s16] ss:$0 sm:$0xff]  ;;  %s2048_s2 = sshll.u32 %s2681_s24, 5  ;;  %v2303_v53 = vld [vmem:[%s2658_s27 + $0x8] sm:$0xff]   ;;  %s2961_s26 = scalar_lea.hbm %s3058_s18, %s2103_s25 }
  0x26   : > { %2149 = vmatmul.mubr.msk.f32.vlgmr.msra.gmra.mrb[0].mxu0 %vm689_vm0, %v678_v4  ;;  %2152 = vmatmul.mubr.msk.f32.vlgmr.msra.gmra.mrb[0].mxu1 %vm689_vm0, %v680_v5  ;;  %s2687_s0 = scalar_lea.vmem [#allocation6], %s2048_s2  ;;  %v2302_v40 = vld [vmem:[%s2658_s27] sm:$0xff]   ;;  %v2304_v54 = vld [vmem:[%s2658_s27 + $0x10] sm:$0xff]   ;;  %v2305_v55 = vld [vmem:[%s2658_s27 + $0x18] sm:$0xff]   ;;  %s2487_s2 = smov [#allocation6]  }
  0x27   : > { %2155 = vmatpush3.msra.mxu1 %v811_v7  ;;  %2156 = vmatprep.mubr.msk.f32.mxu1 %vm2485_vm1, %v2484_v6  ;;  %v1122_v57 = vld [vmem:[%s2723_s1 + $0x10] sm:$0xff]  ;;  %v1120_v60 = vld [vmem:[%s2723_s1] sm:$0xff]  ;;  %v1123_v63 = vld [vmem:[%s2723_s1 + $0x18] sm:$0xff]  ;;  %s1908_s22 = sshll.u32 %s2687_s0, 4  ;;  %s2956_s22 = int_to_ptr.vmem [resolvable:$true] %s1908_s22 }
  0x28   : > { %2159 = vmatprep.subr.mxu1 %v2484_v6  ;;  %2165 = vmatpush3.msra.mxu0 %v813_v8  ;;  %v1121_v3 = vld [vmem:[%s2723_s1 + $0x8] sm:$0xff]  ;;  %s2372_s16 = scalar_lea.vmem %s2956_s22, 512 }
  0x29   : > { %2166 = vmatprep.mubr.msk.f32.mxu0 %vm2485_vm1, %v2484_v6  ;;  %p2373_p12 = scmp.ne.s32.totalorder %s2956_s22, %s2372_s16 }
  0x2b   : > { %p2374_p13 = pnand %p2373_p12, %p2629_p4 }
  0x2d   : > { %p2375_p0 = pneg %p2374_p13 }
  0xf9   : > { %v2150_v10 = vpop.f32.mrb[0].mxu0  ;;  %v2153_v11 = vpop.f32.mrb[0].mxu1 }
  0xfa   : > { %v774_v12 = vadd.f32 %v2150_v10, %v2055_v9  ;;  %v784_v13 = vadd.f32 %v2153_v11, %v2055_v9  ;;  %v768_v14 = vpop.f32.mrb[1].mxu0  ;;  %v778_v15 = vpop.f32.mrb[1].mxu1 }
  0xfb   : > { %v769_v16 = vadd.f32 %v2055_v9, %v768_v14  ;;  %v779_v17 = vadd.f32 %v2055_v9, %v778_v15  ;;  %v1124_v15 = vld [vmem:[%s2723_s1 + $0x20] sm:$0xff] }
  0xfc   : > { %v792_v18 = vmul.f32 0.70710677, %v774_v12  ;;  %v794_v19 = vmul.f32 0.70710677, %v784_v13  ;;  %v788_v24 = vmul.f32 0.5, %v774_v12  ;;  %v790_v27 = vmul.f32 0.5, %v784_v13 }
  0xfd   : > { %v791_v20 = vmul.f32 0.70710677, %v769_v16  ;;  %v793_v21 = vmul.f32 0.70710677, %v779_v17  ;;  %v787_v31 = vmul.f32 0.5, %v769_v16  ;;  %v789_v34 = vmul.f32 0.5, %v779_v17 }
  0xfe   : > { %2316 = verf.f32 %v792_v18  ;;  %v1126_v12 = vld [vmem:[%s2723_s1 + $0x30] sm:$0xff] }
  0xff   : > { %2318 = verf.f32 %v794_v19  ;;  %v1127_v19 = vld [vmem:[%s2723_s1 + $0x38] sm:$0xff] }
 0x100   : > { %2320 = verf.f32 %v791_v20 }
 0x101   : > { %2322 = verf.f32 %v793_v21 }
 0x108   : > { %v2317_v22 = vpop.eup %2316 }
 0x109   : > { %v2319_v23 = vpop.eup %2318  ;;  %v800_v25 = vadd.f32 1.0, %v2317_v22 }
 0x10a   : > { %v2321_v26 = vpop.eup %2320  ;;  %v802_v28 = vadd.f32 1.0, %v2319_v23 }
 0x10b   : > { %v2323_v29 = vpop.eup %2322  ;;  %v804_v30 = vmul.f32 %v800_v25, %v788_v24  ;;  %v799_v32 = vadd.f32 1.0, %v2321_v26  ;;  %v1125_v24 = vld [vmem:[%s2723_s1 + $0x28] sm:$0xff]  ;;  %s2376_s1 = sshll.u32 %s2487_s2, 4  ;;  %s2377_s1 = int_to_ptr.vmem [resolvable:$false] %s2376_s1 }
 0x10c   : > { %v806_v33 = vmul.f32 %v802_v28, %v790_v27  ;;  %v801_v35 = vadd.f32 1.0, %v2323_v29  ;;  %p2379_p1 = scmp.lt.s32.totalorder %s2956_s22, %s2377_s1 }
 0x10d   : > { %v803_v36 = vmul.f32 %v799_v32, %v787_v31  ;;  %808 = vst.msk [vmem:[%s2687_s0 + $0x8] sm:$0xff] %vm689_vm0, %v804_v30 }
 0x10e   : > { %v805_v38 = vmul.f32 %v801_v35, %v789_v34  ;;  %810 = vst.msk [vmem:[%s2687_s0 + $0x18] sm:$0xff] %vm689_vm0, %v806_v33 }
 0x10f   : > { %2157 = vmatmul.mubr.msk.f32.vlgmr.msra.gmra.mrb[2].mxu1 %vm689_vm0, %v803_v36  ;;  %807 = vst.msk [vmem:[%s2687_s0] sm:$0xff] %vm689_vm0, %v803_v36 }
 0x110   : > { %2160 = vmatpush3.msra.mxu1 %v812_v37  ;;  %2167 = vmatmul.mubr.msk.f32.vlgmr.msra.gmra.mrb[2].mxu0 %vm689_vm0, %v805_v38  ;;  %809 = vst.msk [vmem:[%s2687_s0 + $0x10] sm:$0xff] %vm689_vm0, %v805_v38  ;;  %s2378_s0 = scalar_lea.vmem %s2377_s1, 1024 }
 0x111   : > { %2161 = vmatprep.mubr.msk.f32.mxu1 %vm2485_vm1, %v2484_v6  ;;  %2169 = vmatprep.subr.mxu1 %v2484_v6  ;;  %p2380_p2 = scmp.lt.s32.totalorder %s2378_s0, %s2372_s16 }
 0x112   : > { %2178 = vmatprep.mubr.msk.bf16.mxu0 %vm1109_vm2, %v2302_v40 }
 0x113   : > { %2162 = vmatmul.mubr.msk.f32.vlgmr.msra.gmra.mrb[4].mxu1 %vm689_vm0, %v804_v30  ;;  %p2381_p3 = por %p2380_p2, %p2379_p1 }
 0x114   : > { %2170 = vmatpush3.msra.mxu1 %v814_v39  ;;  %2171 = vmatprep.mubr.msk.f32.mxu1 %vm2485_vm1, %v2484_v6 }
 0x115   : > { %p2382_p5 = pnand %p2381_p3, %p2375_p0 }
 0x117   : > { %2172 = vmatmul.mubr.msk.f32.vlgmr.msra.gmra.mrb[6].mxu1 %vm689_vm0, %v806_v33 }
 0x1e2   : > { %v884_v41 = vpop.f32.mrb[2].mxu1 }
 0x1e3   : > { %v1030_v42 = vpop.f32.mrb[2].mxu0  ;;  %v2158_v43 = vpop.f32.mrb[3].mxu1 }
 0x1e4   : > { %v2168_v44 = vpop.f32.mrb[3].mxu0 }
 0x1e6   : > { %v957_v45 = vpop.f32.mrb[4].mxu1 }
 0x1e7   : > { %v1107_v46 = vpack.c.bf16 %v957_v45, %v884_v41  ;;  %v2163_v47 = vpop.f32.mrb[5].mxu1 }
 0x1e9   : > { %1110 = vst.msk [vmem:[#allocation2] sm:$0xff] %vm1109_vm2, %v1107_v46 }
 0x1ea   : > { %v1103_v48 = vpop.f32.mrb[6].mxu1 }
 0x1eb   : > { %v1108_v49 = vpack.c.bf16 %v1103_v48, %v1030_v42  ;;  %v2173_v50 = vpop.f32.mrb[7].mxu1 }
 0x1ed   : > { %1111 = vst.msk [vmem:[#allocation2 + $0x8] sm:$0xff] %vm1109_vm2, %v1108_v49 }
 0x1f0   : > { %v1128_v51 = vld [vmem:[#allocation2] sm:$0xff] }
 0x1f1   : > { %2174 = vmatprep.subr.bf16.mxu0 %v1128_v51 }
 0x1f2   : > { %2175 = vmatpush3.bf16.msra.mxu0 %v1128_v51 }
 0x1f4   : > { %v1129_v52 = vld [vmem:[#allocation2 + $0x8] sm:$0xff] }
 0x1f5   : > { %2176 = vmatprep.subr.bf16.mxu0 %v1129_v52 }
 0x1f6   : > { %2177 = vmatpush3.bf16.msra.mxu0 %v1129_v52 }
 0x1f9   : > { %2179 = vmatmul.mubr.msk.bf16.vlgmr.msra.gmra.mrb[4].mxu0 %vm1109_vm2, %v2303_v53 }
 0x1fa   : > { %2182 = vmatprep.mubr.msk.bf16.mxu0 %vm1109_vm2, %v2304_v54 }
 0x201   : > { %2183 = vmatmul.mubr.msk.bf16.gmra.mrb[8].mxu0 %vm1109_vm2, %v2305_v55 }
 0x2cc   : > { %v2180_v58 = vpop.f32.mrb[4].mxu0 }
 0x2cd   : > { %v1213_v59 = vadd.f32 %v2180_v58, %v2064_v56  ;;  %v1204_v61 = vpop.f32.mrb[5].mxu0 }
 0x2ce   : > { %v1205_v62 = vadd.f32 %v2064_v56, %v1204_v61  ;;  %v2181_v0 = vpop.f32.mrb[6].mxu0 }
 0x2cf   : > { %v2731_v1 = vadd.f32 %v1213_v59, %v1122_v57  ;;  %v1216_v2 = vadd.f32 %v2181_v0, %v2064_v56  ;;  %v1207_v4 = vpop.f32.mrb[7].mxu0 }
 0x2d0   : > { %v2734_v5 = vadd.f32 %v1205_v62, %v1120_v60  ;;  %v1208_v7 = vadd.f32 %v2064_v56, %v1207_v4 }
 0x2d1   : > { %v2736_v8 = vadd.f32 %v1216_v2, %v1123_v63  ;;  %v1251_v9 = vsel %vm1109_vm2, %v2731_v1, 0.0 }
 0x2d2   : > { %v2740_v10 = vadd.f32 %v1208_v7, %v1121_v3  ;;  %1252 = vadd.xlane.f32.xlu1 %v1251_v9  ;;  %v1245_v11 = vsel %vm1109_vm2, %v2734_v5, 0.0 }
 0x2d3   : > { %1246 = vadd.xlane.f32.xlu0 %v1245_v11  ;;  %v1254_v17 = vsel %vm1109_vm2, %v2736_v8, 0.0 }
 0x2d4   : > { %v2184_v13 = vpop.f32.mrb[8].mxu0  ;;  %v1248_v21 = vsel %vm1109_vm2, %v2740_v10, 0.0 }
 0x2d5   : > { %v1229_v14 = vadd.f32 %v2184_v13, %v2064_v56  ;;  %v1220_v16 = vpop.f32.mrb[9].mxu0 }
 0x2d6   : > { %v1221_v18 = vadd.f32 %v2064_v56, %v1220_v16  ;;  %1255 = vadd.xlane.f32.xlu1 %v1254_v17  ;;  %v2185_v20 = vpop.f32.mrb[10].mxu0  ;;  %v2307_v16 = vld [vmem:[%s3049_s9 + $0x8] sm:$0xff]   ;;  %v2308_v17 = vld [vmem:[%s3051_s11] sm:$0xff]  }
 0x2d7   : > { %v2751_v22 = vadd.f32 %v1229_v14, %v1126_v12  ;;  %v1232_v23 = vadd.f32 %v2185_v20, %v2064_v56  ;;  %v1223_v25 = vpop.f32.mrb[11].mxu0  ;;  %1249 = vadd.xlane.f32.xlu0 %v1248_v21  ;;  %2198 = vmatprep.subr.bf16.mxu0 %v2308_v17 }
 0x2d8   : > { %v2754_v26 = vadd.f32 %v1221_v18, %v1124_v15  ;;  %v1224_v27 = vadd.f32 %v2064_v56, %v1223_v25  ;;  %v2306_v15 = vld [vmem:[%s3049_s9] sm:$0xff]   ;;  %v2309_v18 = vld [vmem:[%s3051_s11 + $0x8] sm:$0xff]   ;;  %2199 = vmatpush3.bf16.msra.mxu0 %v2308_v17 }
 0x2d9   : > { %v2756_v28 = vadd.f32 %v1232_v23, %v1127_v19  ;;  %v1263_v32 = vsel %vm1109_vm2, %v2751_v22, 0.0  ;;  %2186 = vmatprep.subr.bf16.mxu1 %v2306_v15  ;;  %2200 = vmatprep.subr.bf16.mxu0 %v2309_v18 }
 0x2da   : > { %v2758_v29 = vadd.f32 %v1224_v27, %v1125_v24  ;;  %v1257_v30 = vsel %vm1109_vm2, %v2754_v26, 0.0  ;;  %2187 = vmatpush3.bf16.msra.mxu1 %v2306_v15 }
 0x2db   : > { %1258 = vadd.xlane.f32.xlu0 %v1257_v30  ;;  %v1266_v33 = vsel %vm1109_vm2, %v2756_v28, 0.0  ;;  %2188 = vmatprep.subr.bf16.mxu1 %v2307_v16 }
 0x2dc   : > { %v1260_v31 = vsel %vm1109_vm2, %v2758_v29, 0.0  ;;  %2201 = vmatpush3.bf16.msra.mxu0 %v2309_v18 }
 0x2dd   : > { %1261 = vadd.xlane.f32.xlu1 %v1260_v31 }
 0x2de   : > { %2189 = vmatpush3.bf16.msra.mxu1 %v2307_v16 }
 0x2df   : > { %1264 = vadd.xlane.f32.xlu0 %v1263_v32  ;;  %2222 = vmatprep.subr.bf16.mxu1 %v2484_v6 }
 0x2e1   : > { %1267 = vadd.xlane.f32.xlu1 %v1266_v33 }
 0x35f   : > { %v1253_v34 = vpop.xlane.xlu1 %1252 }
 0x360   : > { %v1272_v35 = vmul.f32 0.03125, %v1253_v34  ;;  %v1247_v36 = vpop.xlane.xlu0 %1246 }
 0x361   : > { %v1270_v37 = vmul.f32 0.03125, %v1247_v36 }
 0x362   : > { %v2769_v38 = vsub.f32 %v2731_v1, %v1272_v35 }
 0x363   : > { %v2772_v39 = vsub.f32 %v2734_v5, %v1270_v37  ;;  %v1256_v40 = vpop.xlane.xlu1 %1255 }
 0x364   : > { %v1273_v41 = vmul.f32 0.03125, %v1256_v40  ;;  %v1250_v42 = vpop.xlane.xlu0 %1249  ;;  %v1288_v48 = vmul.f32 %v2769_v38, %v2769_v38 }
 0x365   : > { %v1271_v43 = vmul.f32 0.03125, %v1250_v42  ;;  %v1286_v44 = vmul.f32 %v2772_v39, %v2772_v39 }
 0x366   : > { %v2777_v45 = vsub.f32 %v2736_v8, %v1273_v41  ;;  %v1300_v56 = vsel %vm1109_vm2, %v1288_v48, 0.0 }
 0x367   : > { %v2780_v46 = vsub.f32 %v2740_v10, %v1271_v43  ;;  %v1294_v47 = vsel %vm1109_vm2, %v1286_v44, 0.0 }
 0x368   : > { %1295 = vadd.xlane.f32.xlu0 %v1294_v47  ;;  %v1259_v49 = vpop.xlane.xlu0 %1258  ;;  %v1289_v53 = vmul.f32 %v2777_v45, %v2777_v45 }
 0x369   : > { %v1274_v50 = vmul.f32 0.03125, %v1259_v49  ;;  %v1287_v51 = vmul.f32 %v2780_v46, %v2780_v46 }
 0x36a   : > { %v1262_v52 = vpop.xlane.xlu1 %1261  ;;  %v1303_v63 = vsel %vm1109_vm2, %v1289_v53, 0.0 }
 0x36b   : > { %v2790_v54 = vsub.f32 %v2754_v26, %v1274_v50  ;;  %v1275_v55 = vmul.f32 0.03125, %v1262_v52  ;;  %v1297_v57 = vsel %vm1109_vm2, %v1287_v51, 0.0  ;;  %v2073_v51 = vld [vmem:[%s3047_s7] ss:$0 sm:$0xff] }
 0x36c   : > { %1301 = vadd.xlane.f32.xlu0 %v1300_v56  ;;  %1298 = vadd.xlane.f32.xlu1 %v1297_v57  ;;  %v1265_v58 = vpop.xlane.xlu0 %1264 }
 0x36d   : > { %v2795_v59 = vsub.f32 %v2758_v29, %v1275_v55  ;;  %v1276_v60 = vmul.f32 0.03125, %v1265_v58  ;;  %v1290_v61 = vmul.f32 %v2790_v54, %v2790_v54 }
 0x36e   : > { %v1268_v62 = vpop.xlane.xlu1 %1267 }
 0x36f   : > { %v2801_v0 = vsub.f32 %v2751_v22, %v1276_v60  ;;  %v1277_v2 = vmul.f32 0.03125, %v1268_v62  ;;  %v1306_v3 = vsel %vm1109_vm2, %v1290_v61, 0.0  ;;  %v1291_v4 = vmul.f32 %v2795_v59, %v2795_v59 }
 0x370   : > { %1304 = vadd.xlane.f32.xlu1 %v1303_v63  ;;  %1307 = vadd.xlane.f32.xlu0 %v1306_v3 }
 0x371   : > { %v2807_v7 = vsub.f32 %v2756_v28, %v1277_v2  ;;  %v1292_v9 = vmul.f32 %v2801_v0, %v2801_v0  ;;  %v1309_v11 = vsel %vm1109_vm2, %v1291_v4, 0.0 }
 0x373   : > { %v1312_v12 = vsel %vm1109_vm2, %v1292_v9, 0.0  ;;  %v1293_v13 = vmul.f32 %v2807_v7, %v2807_v7 }
 0x374   : > { %1310 = vadd.xlane.f32.xlu1 %v1309_v11  ;;  %1313 = vadd.xlane.f32.xlu0 %v1312_v12 }
 0x375   : > { %v1315_v14 = vsel %vm1109_vm2, %v1293_v13, 0.0 }
 0x378   : > { %1316 = vadd.xlane.f32.xlu1 %v1315_v14 }
 0x3f5   : > { %v1296_v19 = vpop.xlane.xlu0 %1295 }
 0x3f6   : > { %v1318_v20 = vmul.f32 0.03125, %v1296_v19 }
 0x3f8   : > { %v1326_v21 = vadd.f32 1e-05, %v1318_v20 }
 0x3f9   : > { %v1299_v23 = vpop.xlane.xlu1 %1298  ;;  %v1302_v24 = vpop.xlane.xlu0 %1301 }
 0x3fa   : > { %2324 = vrsqrt.f32 %v1326_v21  ;;  %v1319_v25 = vmul.f32 0.03125, %v1299_v23  ;;  %v1320_v27 = vmul.f32 0.03125, %v1302_v24 }
 0x3fc   : > { %v1327_v30 = vadd.f32 1e-05, %v1319_v25  ;;  %v1328_v31 = vadd.f32 1e-05, %v1320_v27 }
 0x3fd   : > { %v1305_v32 = vpop.xlane.xlu1 %1304  ;;  %v1308_v33 = vpop.xlane.xlu0 %1307 }
 0x3fe   : > { %2326 = vrsqrt.f32 %v1327_v30  ;;  %v1321_v34 = vmul.f32 0.03125, %v1305_v32  ;;  %v1322_v35 = vmul.f32 0.03125, %v1308_v33  ;;  %v2312_v32 = vld [vmem:[%s3051_s11 + $0x20] sm:$0xff]   ;;  %v2313_v33 = vld [vmem:[%s3051_s11 + $0x28] sm:$0xff]  }
 0x3ff   : > { %2328 = vrsqrt.f32 %v1328_v31 }
 0x400   : > { %v1329_v36 = vadd.f32 1e-05, %v1321_v34  ;;  %v1330_v37 = vadd.f32 1e-05, %v1322_v35  ;;  %v2314_v34 = vld [vmem:[%s3051_s11 + $0x30] sm:$0xff]   ;;  %v2315_v35 = vld [vmem:[%s3051_s11 + $0x38] sm:$0xff]  }
 0x401   : > { %v1311_v40 = vpop.xlane.xlu1 %1310  ;;  %v1314_v41 = vpop.xlane.xlu0 %1313 }
 0x402   : > { %2330 = vrsqrt.f32 %v1329_v36  ;;  %v1323_v42 = vmul.f32 0.03125, %v1311_v40  ;;  %v1324_v43 = vmul.f32 0.03125, %v1314_v41  ;;  %v2075_v36 = vld [vmem:[%s3050_s10] ss:$0 sm:$0xff] }
 0x403   : > { %2332 = vrsqrt.f32 %v1330_v37 }
 0x404   : > { %v2325_v44 = vpop.eup %2324  ;;  %v1331_v47 = vadd.f32 1e-05, %v1323_v42  ;;  %v1332_v48 = vadd.f32 1e-05, %v1324_v43 }
 0x405   : > { %v1342_v49 = vmul.f32 %v2325_v44, %v2772_v39  ;;  %v1317_v50 = vpop.xlane.xlu1 %1316  ;;  %v2074_v39 = vld [vmem:[%s3048_s8] ss:$0 sm:$0xff] }
 0x406   : > { %2334 = vrsqrt.f32 %v1331_v47  ;;  %v1325_v52 = vmul.f32 0.03125, %v1317_v50 }
 0x407   : > { %2336 = vrsqrt.f32 %v1332_v48  ;;  %v1356_v58 = vmul.f32 %v2073_v51, %v1342_v49 }
 0x408   : > { %v2327_v53 = vpop.eup %2326  ;;  %v1333_v55 = vadd.f32 1e-05, %v1325_v52 }
 0x409   : > { %v2329_v56 = vpop.eup %2328  ;;  %v1343_v57 = vmul.f32 %v2327_v53, %v2780_v46  ;;  %v1370_v4 = vadd.f32 %v2074_v39, %v1356_v58 }
 0x40a   : > { %v1344_v60 = vmul.f32 %v2329_v56, %v2769_v38  ;;  %2338 = vrsqrt.f32 %v1333_v55 }
 0x40b   : > { %v1357_v61 = vmul.f32 %v2073_v51, %v1343_v57 }
 0x40c   : > { %v2331_v62 = vpop.eup %2330  ;;  %v1358_v2 = vmul.f32 %v2073_v51, %v1344_v60 }
 0x40d   : > { %v2333_v63 = vpop.eup %2332  ;;  %v1345_v3 = vmul.f32 %v2331_v62, %v2777_v45  ;;  %v1371_v9 = vadd.f32 %v2074_v39, %v1357_v61 }
 0x40e   : > { %v1346_v11 = vmul.f32 %v2333_v63, %v2790_v54  ;;  %v1372_v15 = vadd.f32 %v2074_v39, %v1358_v2 }
 0x40f   : > { %v1359_v12 = vmul.f32 %v2073_v51, %v1345_v3  ;;  %v1378_v46 = vpack.c.bf16 %v1371_v9, %v1370_v4 }
 0x410   : > { %v2335_v13 = vpop.eup %2334  ;;  %v1360_v17 = vmul.f32 %v2073_v51, %v1346_v11 }
 0x411   : > { %v2337_v14 = vpop.eup %2336  ;;  %v1347_v38 = vmul.f32 %v2335_v13, %v2795_v59  ;;  %2190 = vmatprep.mubr.msk.bf16.mxu1 %vm1109_vm2, %v1378_v46  ;;  %v1373_v16 = vadd.f32 %v2074_v39, %v1359_v12 }
 0x412   : > { %v1348_v18 = vmul.f32 %v2337_v14, %v2801_v0  ;;  %v1374_v54 = vadd.f32 %v2074_v39, %v1360_v17  ;;  %v2310_v0 = vld [vmem:[%s3051_s11 + $0x10] sm:$0xff]  }
 0x413   : > { %v1379_v19 = vpack.c.bf16 %v1373_v16, %v1372_v15  ;;  %v1361_v20 = vmul.f32 %v2073_v51, %v1347_v38  ;;  %2202 = vmatprep.subr.bf16.mxu0 %v2310_v0 }
 0x414   : > { %v2339_v45 = vpop.eup %2338  ;;  %v1362_v24 = vmul.f32 %v2073_v51, %v1348_v18  ;;  %2203 = vmatpush3.bf16.msra.mxu0 %v2310_v0 }
 0x415   : > { %v1349_v21 = vmul.f32 %v2339_v45, %v2807_v7  ;;  %2191 = vmatmul.mubr.msk.bf16.vlgmr.msra.gmra.mrb[8].mxu1 %vm1109_vm2, %v1379_v19  ;;  %v1375_v23 = vadd.f32 %v2074_v39, %v1361_v20  ;;  %v2311_v7 = vld [vmem:[%s3051_s11 + $0x18] sm:$0xff]  }
 0x416   : > { %v1376_v59 = vadd.f32 %v2074_v39, %v1362_v24  ;;  %2204 = vmatprep.subr.bf16.mxu0 %v2311_v7 }
 0x417   : > { %v1380_v25 = vpack.c.bf16 %v1375_v23, %v1374_v54  ;;  %v1363_v27 = vmul.f32 %v2073_v51, %v1349_v21 }
 0x418   : > { %2205 = vmatpush3.bf16.msra.mxu0 %v2311_v7 }
 0x419   : > { %2194 = vmatprep.mubr.msk.bf16.mxu1 %vm1109_vm2, %v1380_v25  ;;  %v1377_v30 = vadd.f32 %v2074_v39, %v1363_v27  ;;  %2206 = vmatprep.subr.bf16.mxu0 %v2312_v32 }
 0x41b   : > { %v1381_v31 = vpack.c.bf16 %v1377_v30, %v1376_v59 }
 0x41c   : > { %2207 = vmatpush3.bf16.msra.mxu0 %v2312_v32 }
 0x41d   : > { %2195 = vmatmul.mubr.msk.bf16.gmra.mrb[12].mxu1 %vm1109_vm2, %v1381_v31  ;;  %2208 = vmatprep.subr.bf16.mxu0 %v2313_v33 }
 0x41e   : > { %2230 = vmatprep.mubr.msk.bf16.mxu1 %vm2485_vm1, %v2484_v6 }
 0x420   : > { %2209 = vmatpush3.bf16.msra.mxu0 %v2313_v33 }
 0x421   : > { %2210 = vmatprep.subr.bf16.mxu0 %v2314_v34 }
 0x424   : > { %2211 = vmatpush3.bf16.msra.mxu0 %v2314_v34 }
 0x425   : > { %2212 = vmatprep.subr.bf16.mxu0 %v2315_v35 }
 0x428   : > { %2213 = vmatpush3.bf16.msra.mxu0 %v2315_v35 }
 0x4e8   : > { %v2192_v37 = vpop.f32.mrb[8].mxu1 }
 0x4e9   : > { %v1460_v40 = vadd.f32 %v2192_v37, %v2075_v36  ;;  %v1451_v41 = vpop.f32.mrb[9].mxu1 }
 0x4ea   : > { %v1452_v42 = vadd.f32 %v2075_v36, %v1451_v41  ;;  %v2193_v43 = vpop.f32.mrb[10].mxu1 }
 0x4eb   : > { %v1492_v44 = vmul.f32 0.70710677, %v1460_v40  ;;  %v1463_v47 = vadd.f32 %v2193_v43, %v2075_v36  ;;  %v1454_v48 = vpop.f32.mrb[11].mxu1  ;;  %v1484_v14 = vmul.f32 0.5, %v1460_v40 }
 0x4ec   : > { %v1490_v49 = vmul.f32 0.70710677, %v1452_v42  ;;  %v1455_v50 = vadd.f32 %v2075_v36, %v1454_v48  ;;  %v1482_v16 = vmul.f32 0.5, %v1452_v42 }
 0x4ed   : > { %2340 = verf.f32 %v1492_v44  ;;  %v1493_v51 = vmul.f32 0.70710677, %v1463_v47  ;;  %v1485_v38 = vmul.f32 0.5, %v1463_v47  ;;  %v2082_v44 = vld [vmem:[%s3052_s12] ss:$0 sm:$0xff] }
 0x4ee   : > { %2342 = verf.f32 %v1490_v49  ;;  %v1491_v52 = vmul.f32 0.70710677, %v1455_v50  ;;  %v1483_v17 = vmul.f32 0.5, %v1455_v50 }
 0x4ef   : > { %2344 = verf.f32 %v1493_v51 }
 0x4f0   : > { %2346 = verf.f32 %v1491_v52  ;;  %v2196_v53 = vpop.f32.mrb[12].mxu1 }
 0x4f1   : > { %v1476_v55 = vadd.f32 %v2196_v53, %v2075_v36  ;;  %v1467_v56 = vpop.f32.mrb[13].mxu1 }
 0x4f2   : > { %v1468_v57 = vadd.f32 %v2075_v36, %v1467_v56  ;;  %v2197_v58 = vpop.f32.mrb[14].mxu1 }
 0x4f3   : > { %v1496_v60 = vmul.f32 0.70710677, %v1476_v55  ;;  %v1479_v39 = vadd.f32 %v2197_v58, %v2075_v36  ;;  %v1470_v61 = vpop.f32.mrb[15].mxu1  ;;  %v1488_v0 = vmul.f32 0.5, %v1476_v55 }
 0x4f4   : > { %v1494_v62 = vmul.f32 0.70710677, %v1468_v57  ;;  %v1471_v63 = vadd.f32 %v2075_v36, %v1470_v61  ;;  %v1486_v33 = vmul.f32 0.5, %v1468_v57 }
 0x4f5   : > { %2348 = verf.f32 %v1496_v60  ;;  %v1497_v2 = vmul.f32 0.70710677, %v1479_v39  ;;  %v1489_v7 = vmul.f32 0.5, %v1479_v39 }
 0x4f6   : > { %2350 = verf.f32 %v1494_v62  ;;  %v1495_v3 = vmul.f32 0.70710677, %v1471_v63  ;;  %v1487_v34 = vmul.f32 0.5, %v1471_v63 }
 0x4f7   : > { %v2341_v4 = vpop.eup %2340  ;;  %2352 = verf.f32 %v1497_v2 }
 0x4f8   : > { %v2343_v9 = vpop.eup %2342  ;;  %v1508_v11 = vadd.f32 1.0, %v2341_v4  ;;  %2354 = verf.f32 %v1495_v3 }
 0x4f9   : > { %v2345_v12 = vpop.eup %2344  ;;  %v1506_v46 = vadd.f32 1.0, %v2343_v9 }
 0x4fa   : > { %v2347_v13 = vpop.eup %2346  ;;  %v1509_v15 = vadd.f32 1.0, %v2345_v12  ;;  %v1516_v19 = vmul.f32 %v1508_v11, %v1484_v14 }
 0x4fb   : > { %v1507_v18 = vadd.f32 1.0, %v2347_v13  ;;  %v1514_v45 = vmul.f32 %v1506_v46, %v1482_v16 }
 0x4fc   : > { %v1517_v20 = vmul.f32 %v1509_v15, %v1485_v38 }
 0x4fd   : > { %v1515_v21 = vmul.f32 %v1507_v18, %v1483_v17 }
 0x4fe   : > { %v1523_v54 = vpack.c.bf16 %v1517_v20, %v1516_v19 }
 0x4ff   : > { %v2349_v23 = vpop.eup %2348  ;;  %v1522_v24 = vpack.c.bf16 %v1515_v21, %v1514_v45 }
 0x500   : > { %v2351_v25 = vpop.eup %2350  ;;  %v1512_v27 = vadd.f32 1.0, %v2349_v23 }
 0x501   : > { %v2353_v59 = vpop.eup %2352  ;;  %v1510_v30 = vadd.f32 1.0, %v2351_v25  ;;  %2214 = vmatprep.mubr.bf16.mxu0 %v1522_v24 }
 0x502   : > { %v2355_v31 = vpop.eup %2354  ;;  %v1513_v32 = vadd.f32 1.0, %v2353_v59  ;;  %2215 = vmatmul.mubr.bf16.vlgmr.msra.gmra.mrb[12].mxu0 %v1523_v54  ;;  %v1520_v36 = vmul.f32 %v1512_v27, %v1488_v0 }
 0x503   : > { %v1511_v35 = vadd.f32 1.0, %v2355_v31  ;;  %v1518_v40 = vmul.f32 %v1510_v30, %v1486_v33 }
 0x504   : > { %v1521_v37 = vmul.f32 %v1513_v32, %v1489_v7 }
 0x505   : > { %v1519_v41 = vmul.f32 %v1511_v35, %v1487_v34 }
 0x506   : > { %v1525_v42 = vpack.c.bf16 %v1521_v37, %v1520_v36 }
 0x507   : > { %v1524_v43 = vpack.c.bf16 %v1519_v41, %v1518_v40 }
 0x509   : > { %2218 = vmatprep.mubr.bf16.mxu0 %v1524_v43 }
 0x50a   : > { %2219 = vmatmul.mubr.bf16.gmra.mrb[16].mxu0 %v1525_v42 }
 0x5d5   : > { %v2216_v47 = vpop.f32.mrb[12].mxu0 }
 0x5d6   : > { %v1631_v48 = vpop.f32.mrb[13].mxu0  ;;  %v1640_v49 = vadd.f32 %v2216_v47, %v2082_v44 }
 0x5d7   : > { %v1632_v50 = vadd.f32 %v2082_v44, %v1631_v48  ;;  %v2217_v51 = vpop.f32.mrb[14].mxu0 }
 0x5d8   : > { %v1634_v52 = vpop.f32.mrb[15].mxu0  ;;  %v1643_v53 = vadd.f32 %v2217_v51, %v2082_v44  ;;  %v1664_v60 = vadd.f32 %v1640_v49, %v2731_v1 }
 0x5d9   : > { %v1635_v55 = vadd.f32 %v2082_v44, %v1634_v52  ;;  %v1662_v56 = vadd.f32 %v1632_v50, %v2734_v5 }
 0x5da   : > { %v1665_v62 = vadd.f32 %v1643_v53, %v2736_v8  ;;  %v1678_v9 = vsel %vm1109_vm2, %v1664_v60, 0.0 }
 0x5db   : > { %v1672_v57 = vsel %vm1109_vm2, %v1662_v56, 0.0  ;;  %v1663_v58 = vadd.f32 %v1635_v55, %v2740_v10 }
 0x5dc   : > { %1673 = vadd.xlane.f32.xlu0 %v1672_v57  ;;  %v1681_v10 = vsel %vm1109_vm2, %v1665_v62, 0.0  ;;  %v1809_v57 = vld [vmem:[#allocation3] sm:$0x1] }
 0x5dd   : > { %v2220_v39 = vpop.f32.mrb[16].mxu0  ;;  %v1675_v61 = vsel %vm1109_vm2, %v1663_v58, 0.0 }
 0x5de   : > { %v1647_v63 = vpop.f32.mrb[17].mxu0  ;;  %1676 = vadd.xlane.f32.xlu1 %v1675_v61  ;;  %v1656_v2 = vadd.f32 %v2220_v39, %v2082_v44 }
 0x5df   : > { %v1648_v3 = vadd.f32 %v2082_v44, %v1647_v63  ;;  %v2221_v4 = vpop.f32.mrb[18].mxu0 }
 0x5e0   : > { %v1650_v5 = vpop.f32.mrb[19].mxu0  ;;  %1679 = vadd.xlane.f32.xlu0 %v1678_v9  ;;  %v1659_v11 = vadd.f32 %v2221_v4, %v2082_v44  ;;  %v1668_v13 = vadd.f32 %v1656_v2, %v2751_v22 }
 0x5e1   : > { %v1651_v12 = vadd.f32 %v2082_v44, %v1650_v5  ;;  %v1666_v1 = vadd.f32 %v1648_v3, %v2754_v26 }
 0x5e2   : > { %1682 = vadd.xlane.f32.xlu1 %v1681_v10  ;;  %v1669_v38 = vadd.f32 %v1659_v11, %v2756_v28  ;;  %v1690_v15 = vsel %vm1109_vm2, %v1668_v13, 0.0 }
 0x5e3   : > { %v1684_v46 = vsel %vm1109_vm2, %v1666_v1, 0.0  ;;  %v1667_v8 = vadd.f32 %v1651_v12, %v2758_v29 }
 0x5e4   : > { %1685 = vadd.xlane.f32.xlu0 %v1684_v46  ;;  %v1693_v16 = vsel %vm1109_vm2, %v1669_v38, 0.0 }
 0x5e5   : > { %v1687_v14 = vsel %vm1109_vm2, %v1667_v8, 0.0 }
 0x5e6   : > { %1688 = vadd.xlane.f32.xlu1 %v1687_v14 }
 0x5e8   : > { %1691 = vadd.xlane.f32.xlu0 %v1690_v15 }
 0x5ea   : > { %1694 = vadd.xlane.f32.xlu1 %v1693_v16 }
 0x669   : > { %v1674_v26 = vpop.xlane.xlu0 %1673 }
 0x66a   : > { %v1696_v17 = vmul.f32 0.03125, %v1674_v26 }
 0x66b   : > { %v1677_v18 = vpop.xlane.xlu1 %1676 }
 0x66c   : > { %v2889_v19 = vsub.f32 %v1662_v56, %v1696_v17  ;;  %v1697_v29 = vmul.f32 0.03125, %v1677_v18  ;;  %v2091_v18 = vld [vmem:[%s3053_s13] ss:$0 sm:$0xff] }
 0x66d   : > { %v1680_v20 = vpop.xlane.xlu0 %1679 }
 0x66e   : > { %v2891_v22 = vsub.f32 %v1663_v58, %v1697_v29  ;;  %v1698_v45 = vmul.f32 0.03125, %v1680_v20  ;;  %v1712_v28 = vmul.f32 %v2889_v19, %v2889_v19  ;;  %v2486_v58 = vmov 0  }
 0x66f   : > { %v1683_v21 = vpop.xlane.xlu1 %1682  ;;  %2301 = vset.pattern.permute.xlu0 %v2486_v58 }
 0x670   : > { %v2895_v54 = vsub.f32 %v1664_v60, %v1698_v45  ;;  %v1699_v23 = vmul.f32 0.03125, %v1683_v21  ;;  %v1720_v24 = vsel %vm1109_vm2, %v1712_v28, 0.0  ;;  %v1713_v25 = vmul.f32 %v2891_v22, %v2891_v22 }
 0x671   : > { %1721 = vadd.xlane.f32.xlu0 %v1720_v24  ;;  %v1686_v27 = vpop.xlane.xlu0 %1685 }
 0x672   : > { %v2900_v59 = vsub.f32 %v1665_v62, %v1699_v23  ;;  %v1700_v30 = vmul.f32 0.03125, %v1686_v27  ;;  %v1723_v31 = vsel %vm1109_vm2, %v1713_v25, 0.0  ;;  %v1714_v0 = vmul.f32 %v2895_v54, %v2895_v54  ;;  %v2092_v25 = vld [vmem:[%s3054_s14] ss:$0 sm:$0xff] }
 0x673   : > { %1724 = vadd.xlane.f32.xlu1 %v1723_v31  ;;  %v1689_v7 = vpop.xlane.xlu1 %1688 }
 0x674   : > { %v2905_v32 = vsub.f32 %v1666_v1, %v1700_v30  ;;  %v1701_v33 = vmul.f32 0.03125, %v1689_v7  ;;  %v1726_v34 = vsel %vm1109_vm2, %v1714_v0, 0.0  ;;  %v1715_v35 = vmul.f32 %v2900_v59, %v2900_v59 }
 0x675   : > { %1727 = vadd.xlane.f32.xlu0 %v1726_v34  ;;  %v1692_v36 = vpop.xlane.xlu0 %1691 }
 0x676   : > { %v2910_v37 = vsub.f32 %v1667_v8, %v1701_v33  ;;  %v1702_v40 = vmul.f32 0.03125, %v1692_v36  ;;  %v1729_v41 = vsel %vm1109_vm2, %v1715_v35, 0.0  ;;  %v1716_v42 = vmul.f32 %v2905_v32, %v2905_v32 }
 0x677   : > { %1730 = vadd.xlane.f32.xlu1 %v1729_v41  ;;  %v1695_v43 = vpop.xlane.xlu1 %1694 }
 0x678   : > { %v2915_v44 = vsub.f32 %v1668_v13, %v1702_v40  ;;  %v1703_v47 = vmul.f32 0.03125, %v1695_v43  ;;  %v1732_v48 = vsel %vm1109_vm2, %v1716_v42, 0.0  ;;  %v1717_v49 = vmul.f32 %v2910_v37, %v2910_v37 }
 0x679   : > { %1733 = vadd.xlane.f32.xlu0 %v1732_v48 }
 0x67a   : > { %v2920_v50 = vsub.f32 %v1669_v38, %v1703_v47  ;;  %v1735_v51 = vsel %vm1109_vm2, %v1717_v49, 0.0  ;;  %v1718_v52 = vmul.f32 %v2915_v44, %v2915_v44 }
 0x67b   : > { %1736 = vadd.xlane.f32.xlu1 %v1735_v51 }
 0x67c   : > { %v1738_v53 = vsel %vm1109_vm2, %v1718_v52, 0.0  ;;  %v1719_v55 = vmul.f32 %v2920_v50, %v2920_v50 }
 0x67d   : > { %1739 = vadd.xlane.f32.xlu0 %v1738_v53 }
 0x67e   : > { %v1741_v56 = vsel %vm1109_vm2, %v1719_v55, 0.0 }
 0x67f   : > { %1742 = vadd.xlane.f32.xlu1 %v1741_v56 }
 0x693   : > { %1812 = vperm.xlu0 %2301, %v1809_v57  }
 0x6fe   : > { %v1722_v60 = vpop.xlane.xlu0 %1721 }
 0x6ff   : > { %v1744_v39 = vmul.f32 0.03125, %v1722_v60 }
 0x700   : > { %v1725_v61 = vpop.xlane.xlu1 %1724 }
 0x701   : > { %v1752_v62 = vadd.f32 1e-05, %v1744_v39  ;;  %v1745_v63 = vmul.f32 0.03125, %v1725_v61 }
 0x702   : > { %v1728_v2 = vpop.xlane.xlu0 %1727 }
 0x703   : > { %2356 = vrsqrt.f32 %v1752_v62  ;;  %v1753_v3 = vadd.f32 1e-05, %v1745_v63  ;;  %v1746_v4 = vmul.f32 0.03125, %v1728_v2 }
 0x704   : > { %v1731_v9 = vpop.xlane.xlu1 %1730 }
 0x705   : > { %2358 = vrsqrt.f32 %v1753_v3  ;;  %v1754_v5 = vadd.f32 1e-05, %v1746_v4  ;;  %v1747_v11 = vmul.f32 0.03125, %v1731_v9 }
 0x706   : > { %v1734_v12 = vpop.xlane.xlu0 %1733 }
 0x707   : > { %2360 = vrsqrt.f32 %v1754_v5  ;;  %v1755_v10 = vadd.f32 1e-05, %v1747_v11  ;;  %v1748_v1 = vmul.f32 0.03125, %v1734_v12 }
 0x708   : > { %v1737_v46 = vpop.xlane.xlu1 %1736 }
 0x709   : > { %2362 = vrsqrt.f32 %v1755_v10  ;;  %v1756_v8 = vadd.f32 1e-05, %v1748_v1  ;;  %v1749_v13 = vmul.f32 0.03125, %v1737_v46 }
 0x70a   : > { %v1740_v14 = vpop.xlane.xlu0 %1739 }
 0x70b   : > { %v1757_v38 = vadd.f32 1e-05, %v1749_v13  ;;  %2364 = vrsqrt.f32 %v1756_v8  ;;  %v1750_v26 = vmul.f32 0.03125, %v1740_v14 }
 0x70c   : > { %v1743_v15 = vpop.xlane.xlu1 %1742 }
 0x70d   : > { %v2357_v16 = vpop.eup %2356  ;;  %2366 = vrsqrt.f32 %v1757_v38  ;;  %v1751_v17 = vmul.f32 0.03125, %v1743_v15  ;;  %v1758_v24 = vadd.f32 1e-05, %v1750_v26 }
 0x70e   : > { %v1768_v29 = vmul.f32 %v2357_v16, %v2889_v19 }
 0x70f   : > { %v2359_v20 = vpop.eup %2358  ;;  %v1759_v45 = vadd.f32 1e-05, %v1751_v17 }
 0x710   : > { %v1769_v28 = vmul.f32 %v2359_v20, %v2891_v22  ;;  %v1782_v21 = vmul.f32 %v2091_v18, %v1768_v29 }
 0x711   : > { %v2361_v23 = vpop.eup %2360  ;;  %2368 = vrsqrt.f32 %v1759_v45 }
 0x712   : > { %v1783_v27 = vmul.f32 %v2091_v18, %v1769_v28  ;;  %v1770_v30 = vmul.f32 %v2361_v23, %v2895_v54  ;;  %v1796_v0 = vadd.f32 %v2092_v25, %v1782_v21  ;;  %2370 = vrsqrt.f32 %v1758_v24 }
 0x713   : > { %v2363_v31 = vpop.eup %2362 }
 0x714   : > { %v1797_v7 = vadd.f32 %v2092_v25, %v1783_v27  ;;  %v1771_v19 = vmul.f32 %v2363_v31, %v2900_v59  ;;  %v1784_v22 = vmul.f32 %v2091_v18, %v1770_v30 }
 0x715   : > { %v2365_v33 = vpop.eup %2364 }
 0x716   : > { %v1805_v34 = vpack.c.bf16 %v1797_v7, %v1796_v0  ;;  %v1785_v35 = vmul.f32 %v2091_v18, %v1771_v19  ;;  %v1798_v54 = vadd.f32 %v2092_v25, %v1784_v22  ;;  %v1772_v43 = vmul.f32 %v2365_v33, %v2905_v32 }
 0x717   : > { %v2367_v36 = vpop.eup %2366 }
 0x718   : > { %v1823_v40 = vsel %vm1109_vm2, %v1805_v34, 0  ;;  %v1799_v41 = vadd.f32 %v2092_v25, %v1785_v35  ;;  %v1773_v42 = vmul.f32 %v2367_v36, %v2910_v37  ;;  %v1786_v49 = vmul.f32 %v2091_v18, %v1772_v43 }
 0x719   : > { %2223 = vmatpush3.bf16.xpose.msra.mxu1 %v1823_v40 }
 0x71a   : > { %2224 = vmatprep.subr.bf16.mxu1 %v2484_v6  ;;  %v1806_v47 = vpack.c.bf16 %v1799_v41, %v1798_v54  ;;  %v1787_v48 = vmul.f32 %v2091_v18, %v1773_v42  ;;  %v1800_v37 = vadd.f32 %v2092_v25, %v1786_v49 }
 0x71b   : > { %v2369_v59 = vpop.eup %2368 }
 0x71c   : > { %v2371_v51 = vpop.eup %2370  ;;  %v1826_v52 = vsel %vm1109_vm2, %v1806_v47, 0  ;;  %v1801_v53 = vadd.f32 %v2092_v25, %v1787_v48  ;;  %v1775_v55 = vmul.f32 %v2369_v59, %v2920_v50 }
 0x71d   : > { %v1774_v56 = vmul.f32 %v2371_v51, %v2915_v44  ;;  %v1804_v44 = vld [vmem:[%s3055_s15] sm:$0x1] }
 0x71e   : > { %v1807_v57 = vpack.c.bf16 %v1801_v53, %v1800_v37  ;;  %v1789_v32 = vmul.f32 %v2091_v18, %v1775_v55 }
 0x71f   : > { %v1788_v58 = vmul.f32 %v2091_v18, %v1774_v56 }
 0x720   : > { %v1829_v60 = vsel %vm1109_vm2, %v1807_v57, 0  ;;  %v1803_v39 = vadd.f32 %v2092_v25, %v1789_v32 }
 0x721   : > { %2225 = vmatpush3.bf16.xpose.msra.mxu1 %v1826_v52  ;;  %v1802_v50 = vadd.f32 %v2092_v25, %v1788_v58 }
 0x722   : > { %2226 = vmatprep.subr.bf16.mxu1 %v2484_v6 }
 0x723   : > { %v1808_v61 = vpack.c.bf16 %v1803_v39, %v1802_v50 }
 0x725   : > { %v1832_v62 = vsel %vm1109_vm2, %v1808_v61, 0 }
 0x729   : > { %2227 = vmatpush3.bf16.xpose.msra.mxu1 %v1829_v60 }
 0x72a   : > { %2228 = vmatprep.subr.bf16.mxu1 %v2484_v6 }
 0x731   : > { %2229 = vmatpush3.bf16.xpose.msra.mxu1 %v1832_v62 }
 0x738   : > { %2231 = vmatmul.mubr.msk.bf16.vlgmr.msra.gmra.mrb[16].mxu1 %vm1109_vm2, %v1804_v44 }
 0x739   : > { %2385 = shalt.err (!%p2382_p5)
}
 0x73a   : > { %s2386_s25 = scalar_lea.hbm %s2961_s26, 512  ;;  %s2390_s2 = scalar_lea.hbm %s3058_s18, 1024 }
 0x73b   : > { %p2387_p6 = scmp.ne.s32.totalorder %s2961_s26, %s2386_s25  ;;  %p2391_p10 = scmp.lt.u32.totalorder %s2961_s26, %s3058_s18 }
 0x73c   : > { %p2392_p11 = scmp.lt.u32.totalorder %s2390_s2, %s2386_s25  ;;  %p2394_p13 = scmp.lt.u32.totalorder %s2386_s25, %s2961_s26 }
 0x73d   : > { %p2388_p7 = pnand %p2387_p6, %p2629_p4 }
 0x73e   : > { %p2393_p12 = por %p2392_p11, %p2391_p10 }
 0x73f   : > { %p2389_p9 = pneg %p2388_p7 }
 0x740   : > { %p2395_p0 = por %p2394_p13, %p2393_p12 }
 0x742   : > { %p2396_p1 = pnand %p2395_p0, %p2389_p9 }
 0x744   : > { %2399 = shalt.err (!%p2396_p1)
}
 0x745   : > { %s2488_s16 = smov 128   ;;  %s2489_s0 = smov 8   ;;  %v1815_v6 = vlaneseq  ;;  %v1813_v3 = vpop.permute.xlu0 %1812  ;;  %vm1874_vm3 = vcmask 516096  }
 0x746   : > { %s3078_s21 = scalar_lea.sflag [#allocation7], %s2681_s24  ;;  %s2095_s28 = sshll.u32 %s2474_s19, 4 }
 0x747   : > { %2237 = dma.vmem_to_hbm [thread:$0]  (%p2629_p4), %s2956_s22, 512, %s2961_s26, %s3078_s21, %s2488_s16, %s2488_s16, %s2489_s0   ;;  %v1816_v63 = vshrl.u32 %v1815_v6, 7 }
 0x748   : > { %s639_s25 = scalar_lea.vmem [#allocation4], %s2681_s24  ;;  %s2992_s3 = scalar_lea.hbm %s3057_s17, %s2095_s28 }
 0x749   : > { %v1817_v2 = vsub.s32 0, %v1816_v63  ;;  %s1895_s27 = sshll.u32 %s639_s25, 4  ;;  %s1877_s19 = scalar_lea.sflag [#allocation5], %s2681_s24  ;;  %s2994_s27 = int_to_ptr.vmem [resolvable:$true] %s1895_s27 }
 0x74a   : > { %s2400_s22 = scalar_lea.vmem %s2994_s27, 16  ;;  %s2490_s26 = smov [#allocation4]  }
 0x74b   : > { %v1818_v4 = vrot.slane %v1813_v3, %v1817_v2  ;;  %p2401_p2 = scmp.ne.s32.totalorder %s2994_s27, %s2400_s22  ;;  %s2404_s16 = sshll.u32 %s2490_s26, 4  ;;  %s2405_s16 = int_to_ptr.vmem [resolvable:$false] %s2404_s16 }
 0x74c   : > { %s2406_s0 = scalar_lea.vmem %s2405_s16, 32  ;;  %p2407_p6 = scmp.lt.s32.totalorder %s2994_s27, %s2405_s16 }
 0x74d   : > { %p2402_p3 = pnand %p2401_p2, %p2629_p4  ;;  %p2408_p7 = scmp.lt.s32.totalorder %s2406_s0, %s2400_s22 }
 0x74f   : > { %p2403_p5 = pneg %p2402_p3  ;;  %p2409_p9 = por %p2408_p7, %p2407_p6 }
 0x751   : > { %p2410_p10 = pnand %p2409_p9, %p2403_p5 }
 0x80b   : > { %v1868_v9 = vpop.f32.mrb[16].mxu1 }
 0x80c   : > { %v1869_v5 = vadd.f32 %v1868_v9, %v1818_v4  ;;  %v2232_v11 = vpop.f32.mrb[17].mxu1 }
 0x80d   : > { %v1871_v12 = vpop.f32.mrb[18].mxu1 }
 0x80e   : > { %v2233_v10 = vpop.f32.mrb[19].mxu1  ;;  %1875 = vst.msk [vmem:[%s639_s25] sm:$0x1] %vm1874_vm3, %v1869_v5 }
 0x80f   : > { %2413 = shalt.err (!%p2410_p10)
}
 0x810   : > { %s2414_s24 = scalar_lea.hbm %s2992_s3, 16  ;;  %s2418_s25 = scalar_lea.hbm %s3057_s17, 32 }
 0x811   : > { %p2415_p11 = scmp.ne.s32.totalorder %s2992_s3, %s2414_s24  ;;  %p2419_p0 = scmp.lt.u32.totalorder %s2992_s3, %s3057_s17 }
 0x812   : > { %p2420_p1 = scmp.lt.u32.totalorder %s2418_s25, %s2414_s24  ;;  %p2422_p3 = scmp.lt.u32.totalorder %s2414_s24, %s2992_s3 }
 0x813   : > { %p2416_p12 = pnand %p2415_p11, %p2629_p4 }
 0x814   : > { %p2421_p2 = por %p2420_p1, %p2419_p0 }
 0x815   : > { %p2417_p13 = pneg %p2416_p12 }
 0x816   : > { %p2423_p5 = por %p2422_p3, %p2421_p2 }
 0x818   : > { %p2424_p6 = pnand %p2423_p5, %p2417_p13 }
 0x81a   : > { %2427 = shalt.err (!%p2424_p6)
}
 0x81b   : > { %2236 = dma.vmem_to_hbm [thread:$0]  (%p2629_p4), %s2994_s27, 16, %s2992_s3, %s1877_s19  }
 0x81c PF: > { %p2247_p7 = scmp.ge.s32.totalorder %s2482_s20, 2  ;;  %s1923_s26 = sand.u32 1, %s2462_s29  }
 0x81d   : > { %s1924_s16 = scalar_lea.sflag [#allocation5], %s1923_s26 }
 0x81e   : > { %p2241_p9 = pnand %p2247_p7, %p2636_p8 }
 0x820   : > { %2453 = dma.done.wait (!%p2241_p9), %s1924_s16, 16  }
 0x821   : > { %2455 = vsyncadd (!%p2241_p9), %s1924_s16, 4294967280  ;;  %s1932_s0 = scalar_lea.sflag [#allocation7], %s1923_s26 }
 0x822   : > { %2457 = dma.done.wait (!%p2241_p9), %s1932_s0, 512  }
 0x823   : > { %2459 = vsyncadd (!%p2241_p9), %s1932_s0, 4294966784  ;;  %s37_s20 = sadd.s32 1, %s2482_s20   ;;  %s3080_s23 = sld [smem:[#allocation10_spill]] }
 0x824   : > { %p34_p10 = scmp.ge.s32.totalorder %s37_s20, 4   ;;  %s3081_s0 = sld [smem:[#allocation14_spill]] }
 0x825   : > { %s3082_s19 = sld [smem:[#allocation11_spill]]  ;;  %s3083_s1 = sld [smem:[#allocation12_spill]] }
 0x826   : > { %s3084_s29 = smov %s2466_s30  ;;  %36 = sbr.rel (!%p34_p10) target bundleno = 11 (0xb), region = 150 }
 0x829   : > { %s3085_s30 = smov %s3080_s23 }
 0x82d   :  { %1937 = vsyncpa [#allocation5], 1 }
 0x82e   :  { %1939 = vsyncpa [#allocation5 + $0x1], 1 }
 0x82f   :  { %1940 = vsyncpa [#allocation7], 1 }
 0x830   :  { %1942 = vsyncpa [#allocation7 + $0x1], 1 }

</bundles_post_ra>
